<compile_context>
chip_gen: v6e
topology: v6e:2x2x1
jax: 0.10.0
libtpu: 0.0.40
codegen_flags: <defaults>
</compile_context>

<pallas_src>
import functools

import jax
import jax.numpy as jnp
from jax.experimental import pallas as pl
from jax.experimental.pallas import tpu as pltpu

_LANE = 128
_SUBLANE = 8


def _round_up(x, m):
    return ((x + m - 1) // m) * m


def _vmem_budgets():
    """Generation-aware VMEM budgets (block bytes, scoped limit)."""
    cap = 64 << 20                       # conservative default = v7x per-TC VMEM
    try:
        info = pltpu.get_tpu_info()
        cap = int(getattr(info, "vmem_capacity_bytes", cap)) or cap
    except Exception:
        pass
    block_budget = min((cap * 3) // 8, 40 << 20)   # 24 MiB on v7x, 40 MiB on v5e/v6e
    vmem_limit = min((cap * 3) // 4, 96 << 20)     # 48 MiB on v7x, 96 MiB on v5e/v6e
    return block_budget, vmem_limit


_VMEM_BLOCK_BUDGET, _VMEM_LIMIT_BYTES = _vmem_budgets()


def _pick_tile_m(m_rows, c, x_itemsize, need_elem):
    """Largest row tile whose blocks + in-kernel f32 temporaries fit the budget."""
    c_pad = _round_up(max(c, 1), _LANE)
    per_row = 2 * c_pad * x_itemsize        # double-buffered logits block (native dtype)
    per_row += 3 * c_pad * 4                # f32 temporaries: upcast, exp(x-m), mask/select
    per_row += 2 * _LANE * 4                # int32 labels, lane-padded to 128, double-buffered
    if need_elem:
        per_row += 2 * _LANE * 4            # per-element f32 output block
    if per_row * 16 > _VMEM_LIMIT_BYTES:
        # TODO(synk): online-LSE class-axis tiling for huge vocabularies.
        raise NotImplementedError(
            f"num_classes={c} too large for a full-row VMEM block on this TPU; "
            "class-axis (online logsumexp) tiling is not implemented.")
    t = int(_VMEM_BLOCK_BUDGET // per_row)
    t = min(max(t, 16), 8192)
    t = max(16, (t // 16) * 16)                   # multiple of 16 (bf16 sublane packing)
    t = min(t, _round_up(max(m_rows, 1), 16))     # avoid over-padding tiny problems
    return t


# ---------------------------------------------------------------------------
# kernel bodies
# ---------------------------------------------------------------------------

def _row_nll(x_ref, lbl_ref):
    """Per-row unweighted NLL (tm,1), one-hot mask (tm,C) and labels (tm,1)."""
    x = x_ref[...].astype(jnp.float32)                      # (tm, C) f32 math
    lbl = lbl_ref[...]                                      # (tm, 1) int32
    m = jnp.max(x, axis=-1, keepdims=True)
    lse = m + jnp.log(jnp.sum(jnp.exp(x - m), axis=-1, keepdims=True))
    # (1, C) class index row, broadcast-compared against (tm, 1) labels.
    cls = jax.lax.broadcasted_iota(jnp.int32, (1, x.shape[-1]), 1)
    mask = cls == lbl                                       # (tm, C)
    picked = jnp.sum(jnp.where(mask, x, 0.0), axis=-1, keepdims=True)
    return lse - picked, mask, lbl


def _valid_rows(lbl, c):
    # rows whose label hits no class (padding -1, ignore_index, ...) contribute 0
    return jnp.logical_and(lbl >= 0, lbl < c).astype(jnp.float32)   # (tm, 1)


def _ce_sum_kernel_w(x_ref, lbl_ref, w_ref, lsum_ref, wsum_ref):
    nll, mask, _ = _row_nll(x_ref, lbl_ref)
    w = w_ref[...].astype(jnp.float32)                               # (1, C)
    w_i = jnp.sum(jnp.where(mask, w, 0.0), axis=-1, keepdims=True)   # (tm, 1)
    lsum_ref[...] = jnp.broadcast_to(jnp.sum(w_i * nll), lsum_ref.shape)
    wsum_ref[...] = jnp.broadcast_to(jnp.sum(w_i), wsum_ref.shape)


def _ce_sum_kernel_nw(x_ref, lbl_ref, lsum_ref, wsum_ref):
    nll, _, lbl = _row_nll(x_ref, lbl_ref)
    w_i = _valid_rows(lbl, x_ref.shape[-1])                          # (tm, 1)
    lsum_ref[...] = jnp.broadcast_to(jnp.sum(w_i * nll), lsum_ref.shape)
    wsum_ref[...] = jnp.broadcast_to(jnp.sum(w_i), wsum_ref.shape)


def _ce_elem_kernel_w(x_ref, lbl_ref, w_ref, elem_ref):
    nll, mask, _ = _row_nll(x_ref, lbl_ref)
    w = w_ref[...].astype(jnp.float32)
    w_i = jnp.sum(jnp.where(mask, w, 0.0), axis=-1, keepdims=True)
    elem_ref[...] = w_i * nll


def _ce_elem_kernel_nw(x_ref, lbl_ref, elem_ref):
    nll, _, lbl = _row_nll(x_ref, lbl_ref)
    elem_ref[...] = _valid_rows(lbl, x_ref.shape[-1]) * nll


# ---------------------------------------------------------------------------
# wrapper
# ---------------------------------------------------------------------------

@functools.partial(jax.jit, static_argnames=("reduce", "reduction", "tile_m"))
def cross_entropy_pallas(x, label, weight=None, reduce=True, reduction="mean",
                         tile_m=None):
    """Matches F.cross_entropy(input=x (N,C,...) or (N,C), target=label, weight=weight)."""
    x = jnp.asarray(x)
    if not jnp.issubdtype(x.dtype, jnp.floating):
        x = x.astype(jnp.float32)
    label = jnp.asarray(label)

    c = x.shape[1]
    if x.ndim == 2:
        logits2d = x
    else:
        # (N, C, d1, ...) -> (N, d1, ..., C) -> (M, C): class axis on lanes
        perm = (0,) + tuple(range(2, x.ndim)) + (1,)
        logits2d = jnp.transpose(x, perm).reshape(-1, c)
    lbl_flat = label.reshape(-1).astype(jnp.int32)
    m_rows = logits2d.shape[0]

    # torch legacy: reduce=False -> per-element losses
    eff_reduction = reduction if reduce else "none"
    need_elem = eff_reduction == "none"
    weighted = weight is not None

    if tile_m is None:
        tile_m = _pick_tile_m(m_rows, c, logits2d.dtype.itemsize, need_elem)

    # Pad rows so M % tile_m == 0; padded rows use label=-1 (match no class ->
    # zero weight, zero contribution to either sum).
    m_pad = _round_up(m_rows, tile_m)
    if m_pad != m_rows:
        pad = m_pad - m_rows
        logits2d = jnp.pad(logits2d, ((0, pad), (0, 0)))
        lbl_flat = jnp.pad(lbl_flat, (0, pad), constant_values=-1)
    lbl2d = lbl_flat.reshape(m_pad, 1)

    num_tiles = m_pad // tile_m
    grid = (num_tiles,)

    in_specs = [
        pl.BlockSpec((tile_m, c), lambda i: (i, 0)),   # logits (native dtype)
        pl.BlockSpec((tile_m, 1), lambda i: (i, 0)),   # labels int32
    ]
    operands = [logits2d, lbl2d]
    if weighted:
        w = jnp.asarray(weight, jnp.float32).reshape(1, c)
        in_specs.append(pl.BlockSpec((1, c), lambda i: (0, 0)))   # broadcast weights
        operands.append(w)

    compiler_params = pltpu.CompilerParams(
        dimension_semantics=("parallel",),             # row tiles are independent
        vmem_limit_bytes=_VMEM_LIMIT_BYTES,
    )

    if need_elem:
        kernel = _ce_elem_kernel_w if weighted else _ce_elem_kernel_nw
        elem = pl.pallas_call(
            kernel,
            out_shape=jax.ShapeDtypeStruct((m_pad, 1), jnp.float32),
            grid_spec=pltpu.PrefetchScalarGridSpec(
                num_scalar_prefetch=0,
                grid=grid,
                in_specs=in_specs,
                out_specs=pl.BlockSpec((tile_m, 1), lambda i: (i, 0)),
            ),
            compiler_params=compiler_params,
        )(*operands)
        return elem[:m_rows, 0].reshape(label.shape)

    kernel = _ce_sum_kernel_w if weighted else _ce_sum_kernel_nw
    lsum, wsum = pl.pallas_call(
        kernel,
        out_shape=(
            jax.ShapeDtypeStruct((num_tiles, _SUBLANE, _LANE), jnp.float32),
            jax.ShapeDtypeStruct((num_tiles, _SUBLANE, _LANE), jnp.float32),
        ),
        grid_spec=pltpu.PrefetchScalarGridSpec(
            num_scalar_prefetch=0,
            grid=grid,
            in_specs=in_specs,
            out_specs=[
                pl.BlockSpec((1, _SUBLANE, _LANE), lambda i: (i, 0, 0)),
                pl.BlockSpec((1, _SUBLANE, _LANE), lambda i: (i, 0, 0)),
            ],
        ),
        compiler_params=compiler_params,
    )(*operands)

    total = jnp.sum(lsum[:, 0, 0])
    if eff_reduction == "sum":
        return total
    # 'mean': weighted mean (denominator = sum of per-target class weights)
    return total / jnp.sum(wsum[:, 0, 0])


# ---------------------------------------------------------------------------
# pure-JAX reference for validation
# ---------------------------------------------------------------------------

def _reference_ce(x, label, weight, reduction):
    c = x.shape[1]
    if x.ndim == 2:
        logits = x
    else:
        perm = (0,) + tuple(range(2, x.ndim)) + (1,)
        logits = jnp.transpose(x, perm).reshape(-1, c)
    lbl = label.reshape(-1)
    logp = jax.nn.log_softmax(logits.astype(jnp.float32), axis=-1)
    nll = -jnp.take_along_axis(logp, lbl[:, None], axis=-1)[:, 0]
    w = weight[lbl] if weight is not None else jnp.ones_like(nll)
    wl = w * nll
    if reduction == "mean":
        return jnp.sum(wl) / jnp.sum(w)
    if reduction == "sum":
        return jnp.sum(wl)
    return wl.reshape(label.shape)


if __name__ == "__main__":
    key = jax.random.PRNGKey(0)
    kx, kl, kx2, kl2 = jax.random.split(key, 4)

    N, C, H, W = 2, 4, 16, 16
    x = jax.random.normal(kx, (N, C, H, W), jnp.float32)
    label = jax.random.randint(kl, (N, H, W), 0, C, jnp.int32)
    weight = 0.5 + 0.25 * jnp.arange(C, dtype=jnp.float32)

    # default: reduce=True, reduction='mean' (weighted mean)
    out = jax.block_until_ready(cross_entropy_pallas(x, label, weight))
    ref = _reference_ce(x, label, weight, "mean")
    assert jnp.allclose(out, ref, rtol=1e-5, atol=1e-5), (out, ref)

    # reduction='sum'
    out_s = jax.block_until_ready(
        cross_entropy_pallas(x, label, weight, reduction="sum"))
    ref_s = _reference_ce(x, label, weight, "sum")
    assert jnp.allclose(out_s, ref_s, rtol=1e-5, atol=1e-5), (out_s, ref_s)

    # reduce=False (per-element losses, weighted)
    out_n = jax.block_until_ready(
        cross_entropy_pallas(x, label, weight, reduce=False))
    ref_n = _reference_ce(x, label, weight, "none")
    assert jnp.allclose(out_n, ref_n, rtol=1e-5, atol=1e-5)

    # unweighted mean (specialized kernel path)
    out_nw = jax.block_until_ready(cross_entropy_pallas(x, label, None))
    ref_nw = _reference_ce(x, label, None, "mean")
    assert jnp.allclose(out_nw, ref_nw, rtol=1e-5, atol=1e-5)

    # bf16 logits read straight from HBM (kernel upcasts to f32 internally)
    x_bf16 = x.astype(jnp.bfloat16)
    out_bf = jax.block_until_ready(cross_entropy_pallas(x_bf16, label, weight))
    ref_bf = _reference_ce(x_bf16.astype(jnp.float32), label, weight, "mean")
    assert jnp.allclose(out_bf, ref_bf, rtol=1e-4, atol=1e-4), (out_bf, ref_bf)

    # ragged 2-D (N, C) case exercising the padded tail (label=-1 rows),
    # unweighted per-element path
    x2 = jax.random.normal(kx2, (7, 5), jnp.float32)
    label2 = jax.random.randint(kl2, (7,), 0, 5, jnp.int32)
    out2 = jax.block_until_ready(
        cross_entropy_pallas(x2, label2, None, reduce=False))
    ref2 = _reference_ce(x2, label2, None, "none")
    assert jnp.allclose(out2, ref2, rtol=1e-5, atol=1e-5)

    print("KERNEL_OK")
</pallas_src>

<mosaic_0001>
module attributes {stable_mosaic.version = 11 : i64} {
  func.func @_ce_sum_kernel_w(%arg0: i32, %arg1: memref<512x4xf32, #tpu.memory_space<vmem>>, %arg2: memref<512x1xi32, #tpu.memory_space<vmem>>, %arg3: memref<1x4xf32, #tpu.memory_space<vmem>>, %arg4: memref<1x8x128xf32, #tpu.memory_space<vmem>>, %arg5: memref<1x8x128xf32, #tpu.memory_space<vmem>>) attributes {dimension_semantics = [#tpu.dimension_semantics<parallel>], iteration_bounds = array<i64: 1>, scalar_prefetch = 0 : i64, scratch_operands = 0 : i64, tpu.core_type = #tpu.core_type<tc>, window_params = [{transform_indices = @transform_0, window_bounds = array<i64: 512, 4>}, {transform_indices = @transform_1, window_bounds = array<i64: 512, 1>}, {pipeline_mode = #tpu.pipeline_mode<synchronous>, transform_indices = @transform_2, window_bounds = array<i64: 1, 4>}, {transform_indices = @transform_3, window_bounds = array<i64: 1, 8, 128>}, {transform_indices = @transform_4, window_bounds = array<i64: 1, 8, 128>}]} {
    %c0 = arith.constant 0 : index
    %c0_0 = arith.constant 0 : index
    %0 = vector.load %arg1[%c0, %c0_0] : memref<512x4xf32, #tpu.memory_space<vmem>>, vector<512x4xf32>
    %c0_1 = arith.constant 0 : index
    %c0_2 = arith.constant 0 : index
    %1 = vector.load %arg2[%c0_1, %c0_2] : memref<512x1xi32, #tpu.memory_space<vmem>>, vector<512x1xi32>
    %cst = arith.constant dense<0xFF800000> : vector<512xf32>
    %2 = vector.multi_reduction <maximumf>, %0, %cst [1] : vector<512x4xf32> to vector<512xf32>
    %3 = vector.shape_cast %2 : vector<512xf32> to vector<512x1xf32>
    %4 = vector.broadcast %3 : vector<512x1xf32> to vector<512x4xf32>
    %5 = arith.subf %0, %4 : vector<512x4xf32>
    %6 = math.exp %5 : vector<512x4xf32>
    %cst_3 = arith.constant dense<0.000000e+00> : vector<512xf32>
    %7 = vector.multi_reduction <add>, %6, %cst_3 [1] : vector<512x4xf32> to vector<512xf32>
    %8 = vector.shape_cast %7 : vector<512xf32> to vector<512x1xf32>
    %9 = math.log %8 : vector<512x1xf32>
    %10 = arith.addf %3, %9 : vector<512x1xf32>
    %11 = tpu.iota {dimensions = array<i32: 1>} : vector<1x4xi32>
    %12 = vector.broadcast %11 : vector<1x4xi32> to vector<512x4xi32>
    %13 = vector.broadcast %1 : vector<512x1xi32> to vector<512x4xi32>
    %14 = arith.cmpi eq, %12, %13 : vector<512x4xi32>
    %cst_4 = arith.constant 0.000000e+00 : f32
    %15 = vector.broadcast %cst_4 : f32 to vector<512x4xf32>
    %16 = arith.select %14, %0, %15 : vector<512x4xi1>, vector<512x4xf32>
    %cst_5 = arith.constant dense<0.000000e+00> : vector<512xf32>
    %17 = vector.multi_reduction <add>, %16, %cst_5 [1] : vector<512x4xf32> to vector<512xf32>
    %18 = vector.shape_cast %17 : vector<512xf32> to vector<512x1xf32>
    %19 = arith.subf %10, %18 : vector<512x1xf32>
    %c0_6 = arith.constant 0 : index
    %c0_7 = arith.constant 0 : index
    %20 = vector.load %arg3[%c0_6, %c0_7] : memref<1x4xf32, #tpu.memory_space<vmem>>, vector<1x4xf32>
    %cst_8 = arith.constant 0.000000e+00 : f32
    %21 = vector.shape_cast %20 : vector<1x4xf32> to vector<1x4xf32>
    %22 = vector.broadcast %21 : vector<1x4xf32> to vector<512x4xf32>
    %23 = vector.broadcast %cst_8 : f32 to vector<512x4xf32>
    %24 = arith.select %14, %22, %23 : vector<512x4xi1>, vector<512x4xf32>
    %cst_9 = arith.constant dense<0.000000e+00> : vector<512xf32>
    %25 = vector.multi_reduction <add>, %24, %cst_9 [1] : vector<512x4xf32> to vector<512xf32>
    %26 = vector.shape_cast %25 : vector<512xf32> to vector<512x1xf32>
    %27 = arith.mulf %26, %19 : vector<512x1xf32>
    %28 = vector.shape_cast %27 : vector<512x1xf32> to vector<1x512x1xf32>
    %cst_10 = arith.constant dense<0.000000e+00> : vector<1xf32>
    %29 = vector.multi_reduction <add>, %28, %cst_10 [1, 2] : vector<1x512x1xf32> to vector<1xf32>
    %30 = vector.shape_cast %29 : vector<1xf32> to vector<1x1x1xf32>
    %31 = vector.extract %30[0, 0, 0] : f32 from vector<1x1x1xf32>
    %32 = vector.broadcast %31 : f32 to vector<1x8x128xf32>
    %c0_11 = arith.constant 0 : index
    %c0_12 = arith.constant 0 : index
    %c0_13 = arith.constant 0 : index
    %33 = vector.load %arg4[%c0_11, %c0_12, %c0_13] : memref<1x8x128xf32, #tpu.memory_space<vmem>>, vector<1x8x128xf32>
    tpu.vector_store %arg4[%c0_11, %c0_12, %c0_13], %32 {strides = array<i32>} : memref<1x8x128xf32, #tpu.memory_space<vmem>>, vector<1x8x128xf32>,
    %34 = vector.shape_cast %26 : vector<512x1xf32> to vector<1x512x1xf32>
    %cst_14 = arith.constant dense<0.000000e+00> : vector<1xf32>
    %35 = vector.multi_reduction <add>, %34, %cst_14 [1, 2] : vector<1x512x1xf32> to vector<1xf32>
    %36 = vector.shape_cast %35 : vector<1xf32> to vector<1x1x1xf32>
    %37 = vector.extract %36[0, 0, 0] : f32 from vector<1x1x1xf32>
    %38 = vector.broadcast %37 : f32 to vector<1x8x128xf32>
    %c0_15 = arith.constant 0 : index
    %c0_16 = arith.constant 0 : index
    %c0_17 = arith.constant 0 : index
    %39 = vector.load %arg5[%c0_15, %c0_16, %c0_17] : memref<1x8x128xf32, #tpu.memory_space<vmem>>, vector<1x8x128xf32>
    tpu.vector_store %arg5[%c0_15, %c0_16, %c0_17], %38 {strides = array<i32>} : memref<1x8x128xf32, #tpu.memory_space<vmem>>, vector<1x8x128xf32>,
    return
  }
  func.func @transform_0(%arg0: i32) -> (i32, i32) {
    %c0_i32 = arith.constant 0 : i32
    %c0_i32_0 = arith.constant 0 : i32
    return %arg0, %c0_i32 : i32, i32
  }
  func.func @transform_1(%arg0: i32) -> (i32, i32) {
    %c0_i32 = arith.constant 0 : i32
    %c0_i32_0 = arith.constant 0 : i32
    return %arg0, %c0_i32 : i32, i32
  }
  func.func @transform_2(%arg0: i32) -> (i32, i32) {
    %c0_i32 = arith.constant 0 : i32
    %c0_i32_0 = arith.constant 0 : i32
    %c0_i32_1 = arith.constant 0 : i32
    return %c0_i32, %c0_i32_0 : i32, i32
  }
  func.func @transform_3(%arg0: i32) -> (i32, i32, i32) {
    %c0_i32 = arith.constant 0 : i32
    %c0_i32_0 = arith.constant 0 : i32
    %c0_i32_1 = arith.constant 0 : i32
    return %arg0, %c0_i32, %c0_i32_0 : i32, i32, i32
  }
  func.func @transform_4(%arg0: i32) -> (i32, i32, i32) {
    %c0_i32 = arith.constant 0 : i32
    %c0_i32_0 = arith.constant 0 : i32
    %c0_i32_1 = arith.constant 0 : i32
    return %arg0, %c0_i32, %c0_i32_0 : i32, i32, i32
  }
}

</mosaic_0001>

<bundles_post_ra>
// kernel: cross_entropy_pallas.1
= control target key start
LH: loop header
LB: loop body
LE: loop exit
PB: predicated region body
PF: predicated region fallthrough
CT: control target
= control target key end

     0   :  { %vm144_vm0 = vcmask 31744   ;;  %s5111_s0 = inlined_call_operand.vmem [shape: f32[512,4], index: 0, kind: input, shape index: {}]   ;;  %s5112_s1 = inlined_call_operand.vmem [shape: s32[512,1], index: 1, kind: input, shape index: {}]   ;;  %s5113_s2 = inlined_call_operand.vmem [shape: f32[1,4], index: 2, kind: input, shape index: {}]   ;;  %s5114_s3 = inlined_call_operand.vmem [shape: f32[1,8,128], index: 3, kind: output, shape index: {0}]   ;;  %s5115_s4 = inlined_call_operand.vmem [shape: f32[1,8,128], index: 4, kind: output, shape index: {1}]  }
   0x1   :  { %v2461_v0 = vld [vmem:[%s5111_s0] sm:$0xff]  ;;  %v2466_v1 = vld [vmem:[%s5111_s0 + $0x10] sm:$0xff]  ;;  %v2471_v2 = vld [vmem:[%s5111_s0 + $0x8] sm:$0xff] }
   0x2   :  { %v145_v3 = vsel %vm144_vm0, %v2461_v0, -inf  ;;  %v151_v4 = vsel %vm144_vm0, %v2466_v1, -inf  ;;  %v2480_v5 = vld [vmem:[%s5111_s0 + $0x18] sm:$0xff]  ;;  %v148_v6 = vsel %vm144_vm0, %v2471_v2, -inf  ;;  %v2489_v8 = vld [vmem:[%s5111_s0 + $0x20] sm:$0xff]  ;;  %v2494_v9 = vld [vmem:[%s5111_s0 + $0x28] sm:$0xff] }
   0x3   :  { %146 = vmax.xlane.f32.xlu0 %v145_v3  ;;  %152 = vmax.xlane.f32.xlu1 %v151_v4  ;;  %v154_v7 = vsel %vm144_vm0, %v2480_v5, -inf  ;;  %v157_v10 = vsel %vm144_vm0, %v2489_v8, -inf  ;;  %v160_v11 = vsel %vm144_vm0, %v2494_v9, -inf  ;;  %v2503_v12 = vld [vmem:[%s5111_s0 + $0x30] sm:$0xff]  ;;  %v2508_v13 = vld [vmem:[%s5111_s0 + $0x38] sm:$0xff]  ;;  %v2517_v16 = vld [vmem:[%s5111_s0 + $0x40] sm:$0xff] }
   0x4   :  { %v163_v14 = vsel %vm144_vm0, %v2503_v12, -inf  ;;  %v166_v15 = vsel %vm144_vm0, %v2508_v13, -inf  ;;  %v2522_v17 = vld [vmem:[%s5111_s0 + $0x48] sm:$0xff]  ;;  %v169_v18 = vsel %vm144_vm0, %v2517_v16, -inf  ;;  %v2531_v20 = vld [vmem:[%s5111_s0 + $0x50] sm:$0xff]  ;;  %v2536_v21 = vld [vmem:[%s5111_s0 + $0x58] sm:$0xff] }
   0x5   :  { %v172_v19 = vsel %vm144_vm0, %v2522_v17, -inf  ;;  %v175_v22 = vsel %vm144_vm0, %v2531_v20, -inf  ;;  %v178_v23 = vsel %vm144_vm0, %v2536_v21, -inf  ;;  %v2545_v24 = vld [vmem:[%s5111_s0 + $0x60] sm:$0xff]  ;;  %v2550_v25 = vld [vmem:[%s5111_s0 + $0x68] sm:$0xff]  ;;  %v2559_v28 = vld [vmem:[%s5111_s0 + $0x70] sm:$0xff] }
   0x6   :  { %v181_v26 = vsel %vm144_vm0, %v2545_v24, -inf  ;;  %v184_v27 = vsel %vm144_vm0, %v2550_v25, -inf  ;;  %v2564_v29 = vld [vmem:[%s5111_s0 + $0x78] sm:$0xff]  ;;  %v187_v30 = vsel %vm144_vm0, %v2559_v28, -inf  ;;  %v2573_v32 = vld [vmem:[%s5111_s0 + $0x80] sm:$0xff]  ;;  %v2578_v33 = vld [vmem:[%s5111_s0 + $0x88] sm:$0xff] }
   0x7   :  { %149 = vmax.xlane.f32.xlu0 %v148_v6  ;;  %155 = vmax.xlane.f32.xlu1 %v154_v7  ;;  %v190_v31 = vsel %vm144_vm0, %v2564_v29, -inf  ;;  %v193_v34 = vsel %vm144_vm0, %v2573_v32, -inf  ;;  %v196_v35 = vsel %vm144_vm0, %v2578_v33, -inf  ;;  %v2587_v36 = vld [vmem:[%s5111_s0 + $0x90] sm:$0xff]  ;;  %v2592_v37 = vld [vmem:[%s5111_s0 + $0x98] sm:$0xff]  ;;  %v2601_v40 = vld [vmem:[%s5111_s0 + $0xa0] sm:$0xff] }
   0x8   :  { %v199_v38 = vsel %vm144_vm0, %v2587_v36, -inf  ;;  %v202_v39 = vsel %vm144_vm0, %v2592_v37, -inf  ;;  %v2606_v41 = vld [vmem:[%s5111_s0 + $0xa8] sm:$0xff]  ;;  %v205_v42 = vsel %vm144_vm0, %v2601_v40, -inf  ;;  %v2615_v44 = vld [vmem:[%s5111_s0 + $0xb0] sm:$0xff]  ;;  %v2620_v45 = vld [vmem:[%s5111_s0 + $0xb8] sm:$0xff] }
   0x9   :  { %v208_v43 = vsel %vm144_vm0, %v2606_v41, -inf  ;;  %v211_v46 = vsel %vm144_vm0, %v2615_v44, -inf  ;;  %v214_v47 = vsel %vm144_vm0, %v2620_v45, -inf  ;;  %v2629_v48 = vld [vmem:[%s5111_s0 + $0xc0] sm:$0xff]  ;;  %v2634_v49 = vld [vmem:[%s5111_s0 + $0xc8] sm:$0xff]  ;;  %v2643_v52 = vld [vmem:[%s5111_s0 + $0xd0] sm:$0xff] }
   0xa   :  { %v217_v50 = vsel %vm144_vm0, %v2629_v48, -inf  ;;  %v220_v51 = vsel %vm144_vm0, %v2634_v49, -inf  ;;  %v2648_v53 = vld [vmem:[%s5111_s0 + $0xd8] sm:$0xff]  ;;  %v223_v54 = vsel %vm144_vm0, %v2643_v52, -inf  ;;  %v2657_v56 = vld [vmem:[%s5111_s0 + $0xe0] sm:$0xff]  ;;  %v2662_v57 = vld [vmem:[%s5111_s0 + $0xe8] sm:$0xff] }
   0xb   :  { %158 = vmax.xlane.f32.xlu0 %v157_v10  ;;  %161 = vmax.xlane.f32.xlu1 %v160_v11  ;;  %v226_v55 = vsel %vm144_vm0, %v2648_v53, -inf  ;;  %v229_v58 = vsel %vm144_vm0, %v2657_v56, -inf  ;;  %v232_v59 = vsel %vm144_vm0, %v2662_v57, -inf  ;;  %v2671_v60 = vld [vmem:[%s5111_s0 + $0xf0] sm:$0xff]  ;;  %v2676_v61 = vld [vmem:[%s5111_s0 + $0xf8] sm:$0xff]  ;;  %v2685_v3 = vld [vmem:[%s5111_s0 + $0x100] sm:$0xff] }
   0xc   :  { %v235_v62 = vsel %vm144_vm0, %v2671_v60, -inf  ;;  %v238_v63 = vsel %vm144_vm0, %v2676_v61, -inf  ;;  %v2690_v4 = vld [vmem:[%s5111_s0 + $0x108] sm:$0xff]  ;;  %v241_v6 = vsel %vm144_vm0, %v2685_v3, -inf  ;;  %v2699_v10 = vld [vmem:[%s5111_s0 + $0x110] sm:$0xff]  ;;  %v2704_v11 = vld [vmem:[%s5111_s0 + $0x118] sm:$0xff] }
   0xd   :  { %v244_v7 = vsel %vm144_vm0, %v2690_v4, -inf }
   0xf   :  { %164 = vmax.xlane.f32.xlu0 %v163_v14  ;;  %167 = vmax.xlane.f32.xlu1 %v166_v15  ;;  %v247_v14 = vsel %vm144_vm0, %v2699_v10, -inf  ;;  %v250_v15 = vsel %vm144_vm0, %v2704_v11, -inf }
  0x13   :  { %170 = vmax.xlane.f32.xlu0 %v169_v18  ;;  %173 = vmax.xlane.f32.xlu1 %v172_v19  ;;  %v2713_v18 = vld [vmem:[%s5111_s0 + $0x120] sm:$0xff]  ;;  %v2718_v19 = vld [vmem:[%s5111_s0 + $0x128] sm:$0xff] }
  0x17   :  { %176 = vmax.xlane.f32.xlu0 %v175_v22  ;;  %179 = vmax.xlane.f32.xlu1 %v178_v23  ;;  %v253_v22 = vsel %vm144_vm0, %v2713_v18, -inf  ;;  %v256_v23 = vsel %vm144_vm0, %v2718_v19, -inf }
  0x1b   :  { %182 = vmax.xlane.f32.xlu0 %v181_v26  ;;  %185 = vmax.xlane.f32.xlu1 %v184_v27  ;;  %v2727_v26 = vld [vmem:[%s5111_s0 + $0x130] sm:$0xff]  ;;  %v2732_v27 = vld [vmem:[%s5111_s0 + $0x138] sm:$0xff] }
  0x1f   :  { %188 = vmax.xlane.f32.xlu0 %v187_v30  ;;  %191 = vmax.xlane.f32.xlu1 %v190_v31  ;;  %v259_v30 = vsel %vm144_vm0, %v2727_v26, -inf  ;;  %v262_v31 = vsel %vm144_vm0, %v2732_v27, -inf }
  0x23   :  { %194 = vmax.xlane.f32.xlu0 %v193_v34  ;;  %197 = vmax.xlane.f32.xlu1 %v196_v35  ;;  %v2741_v34 = vld [vmem:[%s5111_s0 + $0x140] sm:$0xff]  ;;  %v2746_v35 = vld [vmem:[%s5111_s0 + $0x148] sm:$0xff] }
  0x27   :  { %200 = vmax.xlane.f32.xlu0 %v199_v38  ;;  %203 = vmax.xlane.f32.xlu1 %v202_v39  ;;  %v265_v38 = vsel %vm144_vm0, %v2741_v34, -inf  ;;  %v268_v39 = vsel %vm144_vm0, %v2746_v35, -inf }
  0x2b   :  { %206 = vmax.xlane.f32.xlu0 %v205_v42  ;;  %209 = vmax.xlane.f32.xlu1 %v208_v43  ;;  %v2755_v42 = vld [vmem:[%s5111_s0 + $0x150] sm:$0xff]  ;;  %v2760_v43 = vld [vmem:[%s5111_s0 + $0x158] sm:$0xff] }
  0x2f   :  { %212 = vmax.xlane.f32.xlu0 %v211_v46  ;;  %215 = vmax.xlane.f32.xlu1 %v214_v47  ;;  %v271_v46 = vsel %vm144_vm0, %v2755_v42, -inf  ;;  %v274_v47 = vsel %vm144_vm0, %v2760_v43, -inf }
  0x33   :  { %218 = vmax.xlane.f32.xlu0 %v217_v50  ;;  %221 = vmax.xlane.f32.xlu1 %v220_v51  ;;  %v2769_v50 = vld [vmem:[%s5111_s0 + $0x160] sm:$0xff]  ;;  %v2774_v51 = vld [vmem:[%s5111_s0 + $0x168] sm:$0xff] }
  0x37   :  { %224 = vmax.xlane.f32.xlu0 %v223_v54  ;;  %227 = vmax.xlane.f32.xlu1 %v226_v55  ;;  %v277_v54 = vsel %vm144_vm0, %v2769_v50, -inf  ;;  %v280_v55 = vsel %vm144_vm0, %v2774_v51, -inf }
  0x3b   :  { %230 = vmax.xlane.f32.xlu0 %v229_v58  ;;  %233 = vmax.xlane.f32.xlu1 %v232_v59  ;;  %v2783_v58 = vld [vmem:[%s5111_s0 + $0x170] sm:$0xff]  ;;  %v2788_v59 = vld [vmem:[%s5111_s0 + $0x178] sm:$0xff] }
  0x3f   :  { %236 = vmax.xlane.f32.xlu0 %v235_v62  ;;  %239 = vmax.xlane.f32.xlu1 %v238_v63  ;;  %v283_v62 = vsel %vm144_vm0, %v2783_v58, -inf  ;;  %v286_v63 = vsel %vm144_vm0, %v2788_v59, -inf }
  0x43   :  { %242 = vmax.xlane.f32.xlu0 %v241_v6  ;;  %245 = vmax.xlane.f32.xlu1 %v244_v7  ;;  %v2797_v6 = vld [vmem:[%s5111_s0 + $0x180] sm:$0xff]  ;;  %v2802_v7 = vld [vmem:[%s5111_s0 + $0x188] sm:$0xff] }
  0x47   :  { %248 = vmax.xlane.f32.xlu0 %v247_v14  ;;  %251 = vmax.xlane.f32.xlu1 %v250_v15  ;;  %v289_v14 = vsel %vm144_vm0, %v2797_v6, -inf  ;;  %v292_v15 = vsel %vm144_vm0, %v2802_v7, -inf }
  0x4b   :  { %254 = vmax.xlane.f32.xlu0 %v253_v22  ;;  %257 = vmax.xlane.f32.xlu1 %v256_v23  ;;  %v2811_v22 = vld [vmem:[%s5111_s0 + $0x190] sm:$0xff]  ;;  %v2816_v23 = vld [vmem:[%s5111_s0 + $0x198] sm:$0xff] }
  0x4f   :  { %260 = vmax.xlane.f32.xlu0 %v259_v30  ;;  %263 = vmax.xlane.f32.xlu1 %v262_v31  ;;  %v295_v30 = vsel %vm144_vm0, %v2811_v22, -inf  ;;  %v298_v31 = vsel %vm144_vm0, %v2816_v23, -inf }
  0x53   :  { %266 = vmax.xlane.f32.xlu0 %v265_v38  ;;  %269 = vmax.xlane.f32.xlu1 %v268_v39  ;;  %v2825_v38 = vld [vmem:[%s5111_s0 + $0x1a0] sm:$0xff]  ;;  %v2830_v39 = vld [vmem:[%s5111_s0 + $0x1a8] sm:$0xff] }
  0x54   :  { %5205 = vst [vmem:[#allocation2_spill] sm:$0xff] %v2825_v38  ;;  %5206 = vst [vmem:[#allocation3_spill] sm:$0xff] %v2830_v39 }
  0x57   :  { %272 = vmax.xlane.f32.xlu0 %v271_v46  ;;  %275 = vmax.xlane.f32.xlu1 %v274_v47  ;;  %v301_v46 = vsel %vm144_vm0, %v2825_v38, -inf  ;;  %v304_v47 = vsel %vm144_vm0, %v2830_v39, -inf }
  0x5b   :  { %278 = vmax.xlane.f32.xlu0 %v277_v54  ;;  %281 = vmax.xlane.f32.xlu1 %v280_v55  ;;  %v2839_v54 = vld [vmem:[%s5111_s0 + $0x1b0] sm:$0xff]  ;;  %v2844_v55 = vld [vmem:[%s5111_s0 + $0x1b8] sm:$0xff] }
  0x5c   :  { %5207 = vst [vmem:[#allocation4_spill] sm:$0xff] %v2839_v54  ;;  %5208 = vst [vmem:[#allocation5_spill] sm:$0xff] %v2844_v55 }
  0x5f   :  { %284 = vmax.xlane.f32.xlu0 %v283_v62  ;;  %287 = vmax.xlane.f32.xlu1 %v286_v63  ;;  %v307_v62 = vsel %vm144_vm0, %v2839_v54, -inf  ;;  %v310_v63 = vsel %vm144_vm0, %v2844_v55, -inf }
  0x63   :  { %290 = vmax.xlane.f32.xlu0 %v289_v14  ;;  %293 = vmax.xlane.f32.xlu1 %v292_v15  ;;  %v2853_v14 = vld [vmem:[%s5111_s0 + $0x1c0] sm:$0xff]  ;;  %v2858_v15 = vld [vmem:[%s5111_s0 + $0x1c8] sm:$0xff] }
  0x64   :  { %5209 = vst [vmem:[#allocation6_spill] sm:$0xff] %v2853_v14  ;;  %5210 = vst [vmem:[#allocation7_spill] sm:$0xff] %v2858_v15 }
  0x67   :  { %296 = vmax.xlane.f32.xlu0 %v295_v30  ;;  %299 = vmax.xlane.f32.xlu1 %v298_v31  ;;  %v313_v30 = vsel %vm144_vm0, %v2853_v14, -inf  ;;  %v316_v31 = vsel %vm144_vm0, %v2858_v15, -inf  ;;  %v2881_v15 = vld [vmem:[%s5111_s0 + $0x1e0] sm:$0xff]  ;;  %v2886_v14 = vld [vmem:[%s5111_s0 + $0x1e8] sm:$0xff] }
  0x68   :  { %5213 = vst [vmem:[#allocation10_spill] sm:$0xff] %v2881_v15  ;;  %5214 = vst [vmem:[#allocation11_spill] sm:$0xff] %v2886_v14 }
  0x6b   :  { %302 = vmax.xlane.f32.xlu0 %v301_v46  ;;  %305 = vmax.xlane.f32.xlu1 %v304_v47  ;;  %v2867_v46 = vld [vmem:[%s5111_s0 + $0x1d0] sm:$0xff]  ;;  %v2872_v47 = vld [vmem:[%s5111_s0 + $0x1d8] sm:$0xff] }
  0x6c   :  { %5211 = vst [vmem:[#allocation8_spill] sm:$0xff] %v2867_v46  ;;  %5212 = vst [vmem:[#allocation9_spill] sm:$0xff] %v2872_v47 }
  0x6f   :  { %308 = vmax.xlane.f32.xlu0 %v307_v62  ;;  %311 = vmax.xlane.f32.xlu1 %v310_v63  ;;  %v319_v62 = vsel %vm144_vm0, %v2867_v46, -inf  ;;  %v322_v63 = vsel %vm144_vm0, %v2872_v47, -inf  ;;  %v2895_v47 = vld [vmem:[%s5111_s0 + $0x1f0] sm:$0xff]  ;;  %v2900_v46 = vld [vmem:[%s5111_s0 + $0x1f8] sm:$0xff] }
  0x70   :  { %5215 = vst [vmem:[#allocation12_spill] sm:$0xff] %v2895_v47  ;;  %5216 = vst [vmem:[#allocation13_spill] sm:$0xff] %v2900_v46 }
  0x73   :  { %314 = vmax.xlane.f32.xlu0 %v313_v30  ;;  %317 = vmax.xlane.f32.xlu1 %v316_v31  ;;  %v325_v30 = vsel %vm144_vm0, %v2881_v15, -inf  ;;  %v328_v31 = vsel %vm144_vm0, %v2886_v14, -inf }
  0x77   :  { %320 = vmax.xlane.f32.xlu0 %v319_v62  ;;  %323 = vmax.xlane.f32.xlu1 %v322_v63  ;;  %v331_v62 = vsel %vm144_vm0, %v2895_v47, -inf  ;;  %v334_v63 = vsel %vm144_vm0, %v2900_v46, -inf }
  0x7b   :  { %326 = vmax.xlane.f32.xlu0 %v325_v30  ;;  %329 = vmax.xlane.f32.xlu1 %v328_v31 }
  0x7f   :  { %332 = vmax.xlane.f32.xlu0 %v331_v62  ;;  %335 = vmax.xlane.f32.xlu1 %v334_v63 }
  0x8c   :  { %v2906_v14 = vpop.xlane.xlu0 %146  ;;  %v2908_v15 = vpop.xlane.xlu1 %152 }
  0x8d   :  { %5217 = vst [vmem:[#allocation14_spill] sm:$0xff] %v2906_v14  ;;  %v337_v55 = vsub.f32 %v2461_v0, %v2906_v14  ;;  %v339_v54 = vsub.f32 %v2466_v1, %v2908_v15 }
  0x8f   :  { %v401_v30 = vmul.f32 1.442695, %v337_v55  ;;  %v405_v31 = vmul.f32 1.442695, %v339_v54 }
  0x90   :  { %v2914_v39 = vpop.xlane.xlu0 %149  ;;  %v2916_v47 = vpop.xlane.xlu1 %155 }
  0x91   :  { %2111 = vpow2.f32 %v401_v30  ;;  %v338_v62 = vsub.f32 %v2471_v2, %v2914_v39  ;;  %v340_v63 = vsub.f32 %v2480_v5, %v2916_v47 }
  0x92   :  { %2113 = vpow2.f32 %v405_v31 }
  0x93   :  { %v403_v46 = vmul.f32 1.442695, %v338_v62  ;;  %v407_v38 = vmul.f32 1.442695, %v340_v63 }
  0x94   :  { %v2922_v0 = vpop.xlane.xlu0 %158  ;;  %v2924_v14 = vpop.xlane.xlu1 %161 }
  0x95   :  { %2115 = vpow2.f32 %v403_v46  ;;  %v341_v1 = vsub.f32 %v2489_v8, %v2922_v0  ;;  %v342_v54 = vsub.f32 %v2494_v9, %v2924_v14 }
  0x96   :  { %2117 = vpow2.f32 %v407_v38 }
  0x97   :  { %v409_v55 = vmul.f32 1.442695, %v341_v1  ;;  %v411_v2 = vmul.f32 1.442695, %v342_v54 }
  0x98   :  { %v2930_v30 = vpop.xlane.xlu0 %164  ;;  %v2932_v5 = vpop.xlane.xlu1 %167 }
  0x99   :  { %5218 = vst [vmem:[#allocation15_spill] sm:$0xff] %v2930_v30  ;;  %2119 = vpow2.f32 %v409_v55  ;;  %v343_v31 = vsub.f32 %v2503_v12, %v2930_v30  ;;  %v344_v46 = vsub.f32 %v2508_v13, %v2932_v5 }
  0x9a   :  { %2121 = vpow2.f32 %v411_v2 }
  0x9b   :  { %v413_v62 = vmul.f32 1.442695, %v343_v31  ;;  %v415_v8 = vmul.f32 1.442695, %v344_v46 }
  0x9c   :  { %v2938_v63 = vpop.xlane.xlu0 %170  ;;  %v2940_v9 = vpop.xlane.xlu1 %173 }
  0x9d   :  { %2123 = vpow2.f32 %v413_v62  ;;  %v345_v38 = vsub.f32 %v2517_v16, %v2938_v63  ;;  %v346_v1 = vsub.f32 %v2522_v17, %v2940_v9 }
  0x9e   :  { %v2112_v54 = vpop.eup %2111  ;;  %2125 = vpow2.f32 %v415_v8 }
  0x9f   :  { %v2114_v12 = vpop.eup %2113  ;;  %v417_v55 = vmul.f32 1.442695, %v345_v38  ;;  %v419_v30 = vmul.f32 1.442695, %v346_v1  ;;  %v529_v13 = vsel %vm144_vm0, %v2112_v54, 0.0 }
  0xa0   :  { %530 = vadd.xlane.f32.xlu0 %v529_v13  ;;  %v2947_v2 = vpop.xlane.xlu0 %176  ;;  %v2949_v31 = vpop.xlane.xlu1 %179  ;;  %v535_v17 = vsel %vm144_vm0, %v2114_v12, 0.0 }
  0xa1   :  { %2127 = vpow2.f32 %v417_v55  ;;  %v347_v46 = vsub.f32 %v2531_v20, %v2947_v2  ;;  %v348_v16 = vsub.f32 %v2536_v21, %v2949_v31 }
  0xa2   :  { %v2116_v62 = vpop.eup %2115  ;;  %2129 = vpow2.f32 %v419_v30 }
  0xa3   :  { %v2118_v8 = vpop.eup %2117  ;;  %v421_v38 = vmul.f32 1.442695, %v347_v46  ;;  %v423_v1 = vmul.f32 1.442695, %v348_v16  ;;  %v532_v54 = vsel %vm144_vm0, %v2116_v62, 0.0 }
  0xa4   :  { %536 = vadd.xlane.f32.xlu0 %v535_v17  ;;  %533 = vadd.xlane.f32.xlu1 %v532_v54  ;;  %v2957_v13 = vpop.xlane.xlu0 %182  ;;  %v2959_v55 = vpop.xlane.xlu1 %185  ;;  %v538_v30 = vsel %vm144_vm0, %v2118_v8, 0.0 }
  0xa5   :  { %2131 = vpow2.f32 %v421_v38  ;;  %v349_v20 = vsub.f32 %v2545_v24, %v2957_v13  ;;  %v350_v21 = vsub.f32 %v2550_v25, %v2959_v55 }
  0xa6   :  { %v2120_v12 = vpop.eup %2119  ;;  %2133 = vpow2.f32 %v423_v1 }
  0xa7   :  { %v2122_v46 = vpop.eup %2121  ;;  %v425_v16 = vmul.f32 1.442695, %v349_v20  ;;  %v427_v62 = vmul.f32 1.442695, %v350_v21  ;;  %v541_v17 = vsel %vm144_vm0, %v2120_v12, 0.0 }
  0xa8   :  { %539 = vadd.xlane.f32.xlu1 %v538_v30  ;;  %542 = vadd.xlane.f32.xlu0 %v541_v17  ;;  %v2967_v54 = vpop.xlane.xlu0 %188  ;;  %v2969_v38 = vpop.xlane.xlu1 %191  ;;  %v544_v8 = vsel %vm144_vm0, %v2122_v46, 0.0 }
  0xa9   :  { %2135 = vpow2.f32 %v425_v16  ;;  %v351_v24 = vsub.f32 %v2559_v28, %v2967_v54  ;;  %v352_v25 = vsub.f32 %v2564_v29, %v2969_v38 }
  0xaa   :  { %v2124_v1 = vpop.eup %2123  ;;  %2137 = vpow2.f32 %v427_v62 }
  0xab   :  { %v2126_v20 = vpop.eup %2125  ;;  %v429_v21 = vmul.f32 1.442695, %v351_v24  ;;  %v431_v12 = vmul.f32 1.442695, %v352_v25  ;;  %v547_v30 = vsel %vm144_vm0, %v2124_v1, 0.0 }
  0xac   :  { %545 = vadd.xlane.f32.xlu1 %v544_v8  ;;  %548 = vadd.xlane.f32.xlu0 %v547_v30  ;;  %v2977_v17 = vpop.xlane.xlu0 %194  ;;  %v2979_v16 = vpop.xlane.xlu1 %197  ;;  %v550_v46 = vsel %vm144_vm0, %v2126_v20, 0.0 }
  0xad   :  { %5219 = vst [vmem:[#allocation16_spill] sm:$0xff] %v2979_v16  ;;  %2139 = vpow2.f32 %v429_v21  ;;  %v353_v28 = vsub.f32 %v2573_v32, %v2977_v17  ;;  %v354_v29 = vsub.f32 %v2578_v33, %v2979_v16 }
  0xae   :  { %v2128_v62 = vpop.eup %2127  ;;  %2141 = vpow2.f32 %v431_v12  ;;  %v2432_v12 = vmov 0  }
  0xaf   :  { %v2130_v24 = vpop.eup %2129  ;;  %v433_v25 = vmul.f32 1.442695, %v353_v28  ;;  %v435_v1 = vmul.f32 1.442695, %v354_v29  ;;  %v553_v8 = vsel %vm144_vm0, %v2128_v62, 0.0  ;;  %2110 = vset.pattern.permute.xlu1 %v2432_v12  ;;  %2109 = vset.pattern.permute.xlu0 %v2432_v12 }
  0xb0   :  { %551 = vadd.xlane.f32.xlu1 %v550_v46  ;;  %554 = vadd.xlane.f32.xlu0 %v553_v8  ;;  %v2987_v30 = vpop.xlane.xlu0 %200  ;;  %v2989_v21 = vpop.xlane.xlu1 %203  ;;  %v556_v20 = vsel %vm144_vm0, %v2130_v24, 0.0 }
  0xb1   :  { %5220 = vst [vmem:[#allocation17_spill] sm:$0xff] %v2987_v30  ;;  %5221 = vst [vmem:[#allocation18_spill] sm:$0xff] %v2989_v21  ;;  %2143 = vpow2.f32 %v433_v25  ;;  %v355_v32 = vsub.f32 %v2587_v36, %v2987_v30  ;;  %v356_v33 = vsub.f32 %v2592_v37, %v2989_v21 }
  0xb2   :  { %v2132_v28 = vpop.eup %2131  ;;  %2145 = vpow2.f32 %v435_v1 }
  0xb3   :  { %v2134_v29 = vpop.eup %2133  ;;  %v437_v46 = vmul.f32 1.442695, %v355_v32  ;;  %v439_v62 = vmul.f32 1.442695, %v356_v33  ;;  %v559_v8 = vsel %vm144_vm0, %v2132_v28, 0.0 }
  0xb4   :  { %557 = vadd.xlane.f32.xlu1 %v556_v20  ;;  %560 = vadd.xlane.f32.xlu0 %v559_v8  ;;  %v2997_v25 = vpop.xlane.xlu0 %206  ;;  %v2999_v36 = vpop.xlane.xlu1 %209  ;;  %v562_v1 = vsel %vm144_vm0, %v2134_v29, 0.0 }
  0xb5   :  { %5222 = vst [vmem:[#allocation19_spill] sm:$0xff] %v2997_v25  ;;  %5223 = vst [vmem:[#allocation20_spill] sm:$0xff] %v2999_v36  ;;  %2147 = vpow2.f32 %v437_v46  ;;  %v357_v37 = vsub.f32 %v2601_v40, %v2997_v25  ;;  %v358_v24 = vsub.f32 %v2606_v41, %v2999_v36 }
  0xb6   :  { %v2136_v12 = vpop.eup %2135  ;;  %2149 = vpow2.f32 %v439_v62 }
  0xb7   :  { %v2138_v32 = vpop.eup %2137  ;;  %v441_v33 = vmul.f32 1.442695, %v357_v37  ;;  %v443_v28 = vmul.f32 1.442695, %v358_v24  ;;  %v565_v20 = vsel %vm144_vm0, %v2136_v12, 0.0 }
  0xb8   :  { %563 = vadd.xlane.f32.xlu1 %v562_v1  ;;  %566 = vadd.xlane.f32.xlu0 %v565_v20  ;;  %v3007_v8 = vpop.xlane.xlu0 %212  ;;  %v3009_v46 = vpop.xlane.xlu1 %215  ;;  %v568_v29 = vsel %vm144_vm0, %v2138_v32, 0.0 }
  0xb9   :  { %5224 = vst [vmem:[#allocation21_spill] sm:$0xff] %v3007_v8  ;;  %5225 = vst [vmem:[#allocation22_spill] sm:$0xff] %v3009_v46  ;;  %2151 = vpow2.f32 %v441_v33  ;;  %v359_v40 = vsub.f32 %v2615_v44, %v3007_v8  ;;  %v360_v41 = vsub.f32 %v2620_v45, %v3009_v46 }
  0xba   :  { %v2140_v62 = vpop.eup %2139  ;;  %2153 = vpow2.f32 %v443_v28 }
  0xbb   :  { %v2142_v37 = vpop.eup %2141  ;;  %v445_v24 = vmul.f32 1.442695, %v359_v40  ;;  %v447_v12 = vmul.f32 1.442695, %v360_v41  ;;  %v571_v1 = vsel %vm144_vm0, %v2140_v62, 0.0 }
  0xbc   :  { %569 = vadd.xlane.f32.xlu1 %v568_v29  ;;  %572 = vadd.xlane.f32.xlu0 %v571_v1  ;;  %v3017_v20 = vpop.xlane.xlu0 %218  ;;  %v3019_v33 = vpop.xlane.xlu1 %221  ;;  %v574_v32 = vsel %vm144_vm0, %v2142_v37, 0.0 }
  0xbd   :  { %5226 = vst [vmem:[#allocation23_spill] sm:$0xff] %v3017_v20  ;;  %5227 = vst [vmem:[#allocation24_spill] sm:$0xff] %v3019_v33  ;;  %2155 = vpow2.f32 %v445_v24  ;;  %v361_v44 = vsub.f32 %v2629_v48, %v3017_v20  ;;  %v362_v45 = vsub.f32 %v2634_v49, %v3019_v33 }
  0xbe   :  { %v2144_v28 = vpop.eup %2143  ;;  %2157 = vpow2.f32 %v447_v12 }
  0xbf   :  { %v2146_v40 = vpop.eup %2145  ;;  %v449_v41 = vmul.f32 1.442695, %v361_v44  ;;  %v451_v62 = vmul.f32 1.442695, %v362_v45  ;;  %v577_v29 = vsel %vm144_vm0, %v2144_v28, 0.0 }
  0xc0   :  { %575 = vadd.xlane.f32.xlu1 %v574_v32  ;;  %578 = vadd.xlane.f32.xlu0 %v577_v29  ;;  %v3027_v1 = vpop.xlane.xlu0 %224  ;;  %v3029_v24 = vpop.xlane.xlu1 %227  ;;  %v580_v37 = vsel %vm144_vm0, %v2146_v40, 0.0 }
  0xc1   :  { %5228 = vst [vmem:[#allocation25_spill] sm:$0xff] %v3027_v1  ;;  %5229 = vst [vmem:[#allocation26_spill] sm:$0xff] %v3029_v24  ;;  %2159 = vpow2.f32 %v449_v41  ;;  %v363_v48 = vsub.f32 %v2643_v52, %v3027_v1  ;;  %v364_v49 = vsub.f32 %v2648_v53, %v3029_v24 }
  0xc2   :  { %v2148_v12 = vpop.eup %2147  ;;  %2161 = vpow2.f32 %v451_v62 }
  0xc3   :  { %v2150_v44 = vpop.eup %2149  ;;  %v453_v45 = vmul.f32 1.442695, %v363_v48  ;;  %v455_v28 = vmul.f32 1.442695, %v364_v49  ;;  %v583_v32 = vsel %vm144_vm0, %v2148_v12, 0.0 }
  0xc4   :  { %581 = vadd.xlane.f32.xlu1 %v580_v37  ;;  %584 = vadd.xlane.f32.xlu0 %v583_v32  ;;  %v3037_v29 = vpop.xlane.xlu0 %230  ;;  %v3039_v41 = vpop.xlane.xlu1 %233  ;;  %v586_v40 = vsel %vm144_vm0, %v2150_v44, 0.0 }
  0xc5   :  { %5230 = vst [vmem:[#allocation27_spill] sm:$0xff] %v3037_v29  ;;  %5231 = vst [vmem:[#allocation28_spill] sm:$0xff] %v3039_v41  ;;  %2163 = vpow2.f32 %v453_v45  ;;  %v365_v52 = vsub.f32 %v2657_v56, %v3037_v29  ;;  %v366_v53 = vsub.f32 %v2662_v57, %v3039_v41  ;;  %v106_v29 = vld [vmem:[%s5112_s1 + $0xd0] sm:$0xff] }
  0xc6   :  { %v2152_v62 = vpop.eup %2151  ;;  %2165 = vpow2.f32 %v455_v28 }
  0xc7   :  { %v2154_v48 = vpop.eup %2153  ;;  %v457_v49 = vmul.f32 1.442695, %v365_v52  ;;  %v459_v12 = vmul.f32 1.442695, %v366_v53  ;;  %v589_v37 = vsel %vm144_vm0, %v2152_v62, 0.0 }
  0xc8   :  { %587 = vadd.xlane.f32.xlu1 %v586_v40  ;;  %590 = vadd.xlane.f32.xlu0 %v589_v37  ;;  %v3047_v32 = vpop.xlane.xlu0 %236  ;;  %v3049_v45 = vpop.xlane.xlu1 %239  ;;  %v592_v44 = vsel %vm144_vm0, %v2154_v48, 0.0 }
  0xc9   :  { %5232 = vst [vmem:[#allocation29_spill] sm:$0xff] %v3047_v32  ;;  %5233 = vst [vmem:[#allocation30_spill] sm:$0xff] %v3049_v45  ;;  %2167 = vpow2.f32 %v457_v49  ;;  %v367_v56 = vsub.f32 %v2671_v60, %v3047_v32  ;;  %v368_v57 = vsub.f32 %v2676_v61, %v3049_v45  ;;  %v104_v32 = vld [vmem:[%s5112_s1 + $0xc0] sm:$0xff] }
  0xca   :  { %v2156_v28 = vpop.eup %2155  ;;  %2169 = vpow2.f32 %v459_v12 }
  0xcb   :  { %v2158_v52 = vpop.eup %2157  ;;  %v461_v53 = vmul.f32 1.442695, %v367_v56  ;;  %v463_v62 = vmul.f32 1.442695, %v368_v57  ;;  %v595_v40 = vsel %vm144_vm0, %v2156_v28, 0.0 }
  0xcc   :  { %593 = vadd.xlane.f32.xlu1 %v592_v44  ;;  %596 = vadd.xlane.f32.xlu0 %v595_v40  ;;  %v3057_v37 = vpop.xlane.xlu0 %242  ;;  %v3059_v49 = vpop.xlane.xlu1 %245  ;;  %v598_v48 = vsel %vm144_vm0, %v2158_v52, 0.0 }
  0xcd   :  { %5234 = vst [vmem:[#allocation31_spill] sm:$0xff] %v3057_v37  ;;  %5235 = vst [vmem:[#allocation32_spill] sm:$0xff] %v3059_v49  ;;  %2171 = vpow2.f32 %v461_v53  ;;  %v369_v60 = vsub.f32 %v2685_v3, %v3057_v37  ;;  %v370_v61 = vsub.f32 %v2690_v4, %v3059_v49  ;;  %v100_v49 = vld [vmem:[%s5112_s1 + $0xa0] sm:$0xff] }
  0xce   :  { %v2160_v12 = vpop.eup %2159  ;;  %2173 = vpow2.f32 %v463_v62 }
  0xcf   :  { %v2162_v56 = vpop.eup %2161  ;;  %v465_v57 = vmul.f32 1.442695, %v369_v60  ;;  %v467_v28 = vmul.f32 1.442695, %v370_v61  ;;  %v601_v44 = vsel %vm144_vm0, %v2160_v12, 0.0 }
  0xd0   :  { %599 = vadd.xlane.f32.xlu1 %v598_v48  ;;  %602 = vadd.xlane.f32.xlu0 %v601_v44  ;;  %v3067_v40 = vpop.xlane.xlu0 %248  ;;  %v3069_v53 = vpop.xlane.xlu1 %251  ;;  %v604_v52 = vsel %vm144_vm0, %v2162_v56, 0.0 }
  0xd1   :  { %5236 = vst [vmem:[#allocation33_spill] sm:$0xff] %v3067_v40  ;;  %5237 = vst [vmem:[#allocation34_spill] sm:$0xff] %v3069_v53  ;;  %2175 = vpow2.f32 %v465_v57  ;;  %v371_v3 = vsub.f32 %v2699_v10, %v3067_v40  ;;  %v372_v4 = vsub.f32 %v2704_v11, %v3069_v53 }
  0xd2   :  { %v2164_v62 = vpop.eup %2163  ;;  %2177 = vpow2.f32 %v467_v28 }
  0xd3   :  { %v2166_v60 = vpop.eup %2165  ;;  %v469_v61 = vmul.f32 1.442695, %v371_v3  ;;  %v471_v12 = vmul.f32 1.442695, %v372_v4  ;;  %v607_v48 = vsel %vm144_vm0, %v2164_v62, 0.0 }
  0xd4   :  { %605 = vadd.xlane.f32.xlu1 %v604_v52  ;;  %608 = vadd.xlane.f32.xlu0 %v607_v48  ;;  %v3077_v44 = vpop.xlane.xlu0 %254  ;;  %v3079_v57 = vpop.xlane.xlu1 %257  ;;  %v610_v56 = vsel %vm144_vm0, %v2166_v60, 0.0 }
  0xd5   :  { %5238 = vst [vmem:[#allocation35_spill] sm:$0xff] %v3077_v44  ;;  %5239 = vst [vmem:[#allocation36_spill] sm:$0xff] %v3079_v57  ;;  %2179 = vpow2.f32 %v469_v61  ;;  %v373_v10 = vsub.f32 %v2713_v18, %v3077_v44  ;;  %v374_v11 = vsub.f32 %v2718_v19, %v3079_v57 }
  0xd6   :  { %v2168_v28 = vpop.eup %2167  ;;  %2181 = vpow2.f32 %v471_v12 }
  0xd7   :  { %v2170_v3 = vpop.eup %2169  ;;  %v473_v4 = vmul.f32 1.442695, %v373_v10  ;;  %v475_v62 = vmul.f32 1.442695, %v374_v11  ;;  %v613_v52 = vsel %vm144_vm0, %v2168_v28, 0.0 }
  0xd8   :  { %611 = vadd.xlane.f32.xlu1 %v610_v56  ;;  %614 = vadd.xlane.f32.xlu0 %v613_v52  ;;  %v3087_v48 = vpop.xlane.xlu0 %260  ;;  %v3089_v61 = vpop.xlane.xlu1 %263  ;;  %v616_v60 = vsel %vm144_vm0, %v2170_v3, 0.0 }
  0xd9   :  { %5240 = vst [vmem:[#allocation37_spill] sm:$0xff] %v3087_v48  ;;  %5241 = vst [vmem:[#allocation38_spill] sm:$0xff] %v3089_v61  ;;  %2183 = vpow2.f32 %v473_v4  ;;  %v375_v18 = vsub.f32 %v2727_v26, %v3087_v48  ;;  %v376_v19 = vsub.f32 %v2732_v27, %v3089_v61 }
  0xda   :  { %v2172_v12 = vpop.eup %2171  ;;  %2185 = vpow2.f32 %v475_v62 }
  0xdb   :  { %v2174_v10 = vpop.eup %2173  ;;  %v477_v11 = vmul.f32 1.442695, %v375_v18  ;;  %v479_v28 = vmul.f32 1.442695, %v376_v19  ;;  %v619_v56 = vsel %vm144_vm0, %v2172_v12, 0.0 }
  0xdc   :  { %617 = vadd.xlane.f32.xlu1 %v616_v60  ;;  %620 = vadd.xlane.f32.xlu0 %v619_v56  ;;  %v3097_v52 = vpop.xlane.xlu0 %266  ;;  %v3099_v4 = vpop.xlane.xlu1 %269  ;;  %v622_v3 = vsel %vm144_vm0, %v2174_v10, 0.0 }
  0xdd   :  { %5242 = vst [vmem:[#allocation39_spill] sm:$0xff] %v3097_v52  ;;  %5243 = vst [vmem:[#allocation40_spill] sm:$0xff] %v3099_v4  ;;  %2187 = vpow2.f32 %v477_v11  ;;  %v377_v26 = vsub.f32 %v2741_v34, %v3097_v52  ;;  %v378_v27 = vsub.f32 %v2746_v35, %v3099_v4 }
  0xde   :  { %v2176_v62 = vpop.eup %2175  ;;  %2189 = vpow2.f32 %v479_v28 }
  0xdf   :  { %v2178_v18 = vpop.eup %2177  ;;  %v481_v19 = vmul.f32 1.442695, %v377_v26  ;;  %v483_v12 = vmul.f32 1.442695, %v378_v27  ;;  %v625_v60 = vsel %vm144_vm0, %v2176_v62, 0.0 }
  0xe0   :  { %623 = vadd.xlane.f32.xlu1 %v622_v3  ;;  %626 = vadd.xlane.f32.xlu0 %v625_v60  ;;  %v3107_v56 = vpop.xlane.xlu0 %272  ;;  %v3109_v11 = vpop.xlane.xlu1 %275  ;;  %v628_v10 = vsel %vm144_vm0, %v2178_v18, 0.0 }
  0xe1   :  { %5244 = vst [vmem:[#allocation41_spill] sm:$0xff] %v3107_v56  ;;  %5245 = vst [vmem:[#allocation42_spill] sm:$0xff] %v3109_v11  ;;  %2191 = vpow2.f32 %v481_v19  ;;  %v379_v34 = vsub.f32 %v2755_v42, %v3107_v56  ;;  %v380_v35 = vsub.f32 %v2760_v43, %v3109_v11 }
  0xe2   :  { %v2180_v28 = vpop.eup %2179  ;;  %2193 = vpow2.f32 %v483_v12 }
  0xe3   :  { %v2182_v26 = vpop.eup %2181  ;;  %v485_v27 = vmul.f32 1.442695, %v379_v34  ;;  %v487_v62 = vmul.f32 1.442695, %v380_v35  ;;  %v631_v3 = vsel %vm144_vm0, %v2180_v28, 0.0 }
  0xe4   :  { %629 = vadd.xlane.f32.xlu1 %v628_v10  ;;  %632 = vadd.xlane.f32.xlu0 %v631_v3  ;;  %v3117_v60 = vpop.xlane.xlu0 %278  ;;  %v3119_v19 = vpop.xlane.xlu1 %281  ;;  %v634_v18 = vsel %vm144_vm0, %v2182_v26, 0.0 }
  0xe5   :  { %5246 = vst [vmem:[#allocation43_spill] sm:$0xff] %v3117_v60  ;;  %5247 = vst [vmem:[#allocation44_spill] sm:$0xff] %v3119_v19  ;;  %2195 = vpow2.f32 %v485_v27  ;;  %v381_v42 = vsub.f32 %v2769_v50, %v3117_v60  ;;  %v382_v43 = vsub.f32 %v2774_v51, %v3119_v19 }
  0xe6   :  { %v2184_v12 = vpop.eup %2183  ;;  %2197 = vpow2.f32 %v487_v62 }
  0xe7   :  { %v2186_v34 = vpop.eup %2185  ;;  %v489_v35 = vmul.f32 1.442695, %v381_v42  ;;  %v491_v28 = vmul.f32 1.442695, %v382_v43  ;;  %v637_v10 = vsel %vm144_vm0, %v2184_v12, 0.0 }
  0xe8   :  { %635 = vadd.xlane.f32.xlu1 %v634_v18  ;;  %638 = vadd.xlane.f32.xlu0 %v637_v10  ;;  %v3127_v3 = vpop.xlane.xlu0 %284  ;;  %v3129_v27 = vpop.xlane.xlu1 %287  ;;  %v640_v26 = vsel %vm144_vm0, %v2186_v34, 0.0 }
  0xe9   :  { %5248 = vst [vmem:[#allocation45_spill] sm:$0xff] %v3127_v3  ;;  %5249 = vst [vmem:[#allocation46_spill] sm:$0xff] %v3129_v27  ;;  %2199 = vpow2.f32 %v489_v35  ;;  %v383_v50 = vsub.f32 %v2783_v58, %v3127_v3  ;;  %v384_v51 = vsub.f32 %v2788_v59, %v3129_v27 }
  0xea   :  { %v2188_v62 = vpop.eup %2187  ;;  %2201 = vpow2.f32 %v491_v28 }
  0xeb   :  { %v2190_v42 = vpop.eup %2189  ;;  %v493_v43 = vmul.f32 1.442695, %v383_v50  ;;  %v495_v12 = vmul.f32 1.442695, %v384_v51  ;;  %v643_v18 = vsel %vm144_vm0, %v2188_v62, 0.0 }
  0xec   :  { %641 = vadd.xlane.f32.xlu1 %v640_v26  ;;  %644 = vadd.xlane.f32.xlu0 %v643_v18  ;;  %v3137_v10 = vpop.xlane.xlu0 %290  ;;  %v3139_v35 = vpop.xlane.xlu1 %293  ;;  %v646_v34 = vsel %vm144_vm0, %v2190_v42, 0.0 }
  0xed   :  { %5250 = vst [vmem:[#allocation47_spill] sm:$0xff] %v3137_v10  ;;  %5251 = vst [vmem:[#allocation48_spill] sm:$0xff] %v3139_v35  ;;  %2203 = vpow2.f32 %v493_v43  ;;  %v385_v58 = vsub.f32 %v2797_v6, %v3137_v10  ;;  %v386_v59 = vsub.f32 %v2802_v7, %v3139_v35 }
  0xee   :  { %v2192_v28 = vpop.eup %2191  ;;  %2205 = vpow2.f32 %v495_v12 }
  0xef   :  { %v2194_v50 = vpop.eup %2193  ;;  %v497_v51 = vmul.f32 1.442695, %v385_v58  ;;  %v499_v62 = vmul.f32 1.442695, %v386_v59  ;;  %v649_v26 = vsel %vm144_vm0, %v2192_v28, 0.0 }
  0xf0   :  { %647 = vadd.xlane.f32.xlu1 %v646_v34  ;;  %650 = vadd.xlane.f32.xlu0 %v649_v26  ;;  %v3147_v18 = vpop.xlane.xlu0 %296  ;;  %v3149_v43 = vpop.xlane.xlu1 %299  ;;  %v652_v42 = vsel %vm144_vm0, %v2194_v50, 0.0 }
  0xf1   :  { %5252 = vst [vmem:[#allocation49_spill] sm:$0xff] %v3147_v18  ;;  %5253 = vst [vmem:[#allocation50_spill] sm:$0xff] %v3149_v43  ;;  %2207 = vpow2.f32 %v497_v51  ;;  %v387_v6 = vsub.f32 %v2811_v22, %v3147_v18  ;;  %v388_v7 = vsub.f32 %v2816_v23, %v3149_v43  ;;  %v5256_v22 = vld [vmem:[#allocation2_spill] sm:$0xff]  ;;  %v5257_v23 = vld [vmem:[#allocation3_spill] sm:$0xff] }
  0xf2   :  { %v2196_v12 = vpop.eup %2195  ;;  %2209 = vpow2.f32 %v499_v62 }
  0xf3   :  { %v2198_v58 = vpop.eup %2197  ;;  %v501_v59 = vmul.f32 1.442695, %v387_v6  ;;  %v503_v28 = vmul.f32 1.442695, %v388_v7  ;;  %v655_v34 = vsel %vm144_vm0, %v2196_v12, 0.0 }
  0xf4   :  { %653 = vadd.xlane.f32.xlu1 %v652_v42  ;;  %656 = vadd.xlane.f32.xlu0 %v655_v34  ;;  %v3157_v26 = vpop.xlane.xlu0 %302  ;;  %v3159_v51 = vpop.xlane.xlu1 %305  ;;  %v658_v62 = vsel %vm144_vm0, %v2198_v58, 0.0 }
  0xf5   :  { %5254 = vst [vmem:[#allocation51_spill] sm:$0xff] %v3157_v26  ;;  %5255 = vst [vmem:[#allocation52_spill] sm:$0xff] %v3159_v51  ;;  %2211 = vpow2.f32 %v501_v59  ;;  %v389_v18 = vsub.f32 %v5256_v22, %v3157_v26  ;;  %v390_v50 = vsub.f32 %v5257_v23, %v3159_v51  ;;  %v5260_v22 = vld [vmem:[#allocation4_spill] sm:$0xff]  ;;  %v5261_v23 = vld [vmem:[#allocation5_spill] sm:$0xff] }
  0xf6   :  { %v2200_v43 = vpop.eup %2199  ;;  %2213 = vpow2.f32 %v503_v28 }
  0xf7   :  { %v2202_v6 = vpop.eup %2201  ;;  %v505_v7 = vmul.f32 1.442695, %v389_v18  ;;  %v507_v12 = vmul.f32 1.442695, %v390_v50  ;;  %v661_v42 = vsel %vm144_vm0, %v2200_v43, 0.0 }
  0xf8   :  { %659 = vadd.xlane.f32.xlu1 %v658_v62  ;;  %662 = vadd.xlane.f32.xlu0 %v661_v42  ;;  %v3167_v34 = vpop.xlane.xlu0 %308  ;;  %v3169_v59 = vpop.xlane.xlu1 %311  ;;  %v664_v28 = vsel %vm144_vm0, %v2202_v6, 0.0 }
  0xf9   :  { %5258 = vst [vmem:[#allocation2_spill] sm:$0xff] %v3167_v34  ;;  %5259 = vst [vmem:[#allocation3_spill] sm:$0xff] %v3169_v59  ;;  %2215 = vpow2.f32 %v505_v7  ;;  %v391_v26 = vsub.f32 %v5260_v22, %v3167_v34  ;;  %v392_v58 = vsub.f32 %v5261_v23, %v3169_v59  ;;  %v5264_v22 = vld [vmem:[#allocation6_spill] sm:$0xff]  ;;  %v5265_v23 = vld [vmem:[#allocation7_spill] sm:$0xff] }
  0xfa   :  { %v2204_v51 = vpop.eup %2203  ;;  %2217 = vpow2.f32 %v507_v12 }
  0xfb   :  { %v2206_v18 = vpop.eup %2205  ;;  %v509_v50 = vmul.f32 1.442695, %v391_v26  ;;  %v511_v43 = vmul.f32 1.442695, %v392_v58  ;;  %v667_v62 = vsel %vm144_vm0, %v2204_v51, 0.0 }
  0xfc   :  { %665 = vadd.xlane.f32.xlu1 %v664_v28  ;;  %668 = vadd.xlane.f32.xlu0 %v667_v62  ;;  %v3177_v42 = vpop.xlane.xlu0 %314  ;;  %v3179_v7 = vpop.xlane.xlu1 %317  ;;  %v670_v12 = vsel %vm144_vm0, %v2206_v18, 0.0 }
  0xfd   :  { %5262 = vst [vmem:[#allocation4_spill] sm:$0xff] %v3177_v42  ;;  %5263 = vst [vmem:[#allocation5_spill] sm:$0xff] %v3179_v7  ;;  %2219 = vpow2.f32 %v509_v50  ;;  %v393_v34 = vsub.f32 %v5264_v22, %v3177_v42  ;;  %v394_v6 = vsub.f32 %v5265_v23, %v3179_v7  ;;  %v5268_v22 = vld [vmem:[#allocation8_spill] sm:$0xff]  ;;  %v5269_v23 = vld [vmem:[#allocation9_spill] sm:$0xff] }
  0xfe   :  { %v2208_v59 = vpop.eup %2207  ;;  %2221 = vpow2.f32 %v511_v43 }
  0xff   :  { %v2210_v26 = vpop.eup %2209  ;;  %v513_v58 = vmul.f32 1.442695, %v393_v34  ;;  %v515_v51 = vmul.f32 1.442695, %v394_v6  ;;  %v673_v28 = vsel %vm144_vm0, %v2208_v59, 0.0 }
 0x100   :  { %671 = vadd.xlane.f32.xlu1 %v670_v12  ;;  %674 = vadd.xlane.f32.xlu0 %v673_v28  ;;  %v3187_v62 = vpop.xlane.xlu0 %320  ;;  %v3189_v50 = vpop.xlane.xlu1 %323  ;;  %v676_v43 = vsel %vm144_vm0, %v2210_v26, 0.0 }
 0x101   :  { %5266 = vst [vmem:[#allocation6_spill] sm:$0xff] %v3187_v62  ;;  %5267 = vst [vmem:[#allocation7_spill] sm:$0xff] %v3189_v50  ;;  %2223 = vpow2.f32 %v513_v58  ;;  %v395_v42 = vsub.f32 %v5268_v22, %v3187_v62  ;;  %v396_v18 = vsub.f32 %v5269_v23, %v3189_v50  ;;  %v5272_v22 = vld [vmem:[#allocation10_spill] sm:$0xff]  ;;  %v5273_v23 = vld [vmem:[#allocation11_spill] sm:$0xff] }
 0x102   :  { %v2212_v7 = vpop.eup %2211  ;;  %2225 = vpow2.f32 %v515_v51 }
 0x103   :  { %v2214_v34 = vpop.eup %2213  ;;  %v517_v6 = vmul.f32 1.442695, %v395_v42  ;;  %v519_v59 = vmul.f32 1.442695, %v396_v18  ;;  %v679_v12 = vsel %vm144_vm0, %v2212_v7, 0.0 }
 0x104   :  { %677 = vadd.xlane.f32.xlu1 %v676_v43  ;;  %680 = vadd.xlane.f32.xlu0 %v679_v12  ;;  %v3197_v28 = vpop.xlane.xlu0 %326  ;;  %v3199_v58 = vpop.xlane.xlu1 %329  ;;  %v682_v51 = vsel %vm144_vm0, %v2214_v34, 0.0 }
 0x105   :  { %5270 = vst [vmem:[#allocation8_spill] sm:$0xff] %v3197_v28  ;;  %5271 = vst [vmem:[#allocation9_spill] sm:$0xff] %v3199_v58  ;;  %2227 = vpow2.f32 %v517_v6  ;;  %v397_v62 = vsub.f32 %v5272_v22, %v3197_v28  ;;  %v398_v26 = vsub.f32 %v5273_v23, %v3199_v58  ;;  %v5276_v22 = vld [vmem:[#allocation12_spill] sm:$0xff]  ;;  %v5277_v23 = vld [vmem:[#allocation13_spill] sm:$0xff] }
 0x106   :  { %v2216_v50 = vpop.eup %2215  ;;  %2229 = vpow2.f32 %v519_v59 }
 0x107   :  { %v2218_v42 = vpop.eup %2217  ;;  %v521_v18 = vmul.f32 1.442695, %v397_v62  ;;  %v523_v7 = vmul.f32 1.442695, %v398_v26  ;;  %v685_v43 = vsel %vm144_vm0, %v2216_v50, 0.0 }
 0x108   :  { %683 = vadd.xlane.f32.xlu1 %v682_v51  ;;  %686 = vadd.xlane.f32.xlu0 %v685_v43  ;;  %v3207_v12 = vpop.xlane.xlu0 %332  ;;  %v3209_v6 = vpop.xlane.xlu1 %335  ;;  %v688_v59 = vsel %vm144_vm0, %v2218_v42, 0.0 }
 0x109   :  { %5274 = vst [vmem:[#allocation10_spill] sm:$0xff] %v3207_v12  ;;  %5275 = vst [vmem:[#allocation11_spill] sm:$0xff] %v3209_v6  ;;  %2231 = vpow2.f32 %v521_v18  ;;  %v399_v28 = vsub.f32 %v5276_v22, %v3207_v12  ;;  %v400_v34 = vsub.f32 %v5277_v23, %v3209_v6 }
 0x10a   :  { %v2220_v58 = vpop.eup %2219  ;;  %2233 = vpow2.f32 %v523_v7 }
 0x10b   :  { %v2222_v62 = vpop.eup %2221  ;;  %v525_v26 = vmul.f32 1.442695, %v399_v28  ;;  %v527_v50 = vmul.f32 1.442695, %v400_v34  ;;  %v691_v51 = vsel %vm144_vm0, %v2220_v58, 0.0 }
 0x10c   :  { %689 = vadd.xlane.f32.xlu1 %v688_v59  ;;  %692 = vadd.xlane.f32.xlu0 %v691_v51  ;;  %v694_v18 = vsel %vm144_vm0, %v2222_v62, 0.0 }
 0x10d   :  { %2235 = vpow2.f32 %v525_v26 }
 0x10e   :  { %v2224_v43 = vpop.eup %2223  ;;  %2237 = vpow2.f32 %v527_v50 }
 0x10f   :  { %v2226_v22 = vpop.eup %2225  ;;  %v697_v12 = vsel %vm144_vm0, %v2224_v43, 0.0 }
 0x110   :  { %695 = vadd.xlane.f32.xlu1 %v694_v18  ;;  %698 = vadd.xlane.f32.xlu0 %v697_v12  ;;  %v700_v42 = vsel %vm144_vm0, %v2226_v22, 0.0 }
 0x112   :  { %v2228_v7 = vpop.eup %2227 }
 0x113   :  { %v2230_v23 = vpop.eup %2229  ;;  %v703_v28 = vsel %vm144_vm0, %v2228_v7, 0.0  ;;  %v81_v7 = vld [vmem:[%s5112_s1 + $0x8] sm:$0xff] }
 0x114   :  { %701 = vadd.xlane.f32.xlu1 %v700_v42  ;;  %704 = vadd.xlane.f32.xlu0 %v703_v28  ;;  %v706_v58 = vsel %vm144_vm0, %v2230_v23, 0.0  ;;  %v80_v23 = vld [vmem:[%s5112_s1] sm:$0xff] }
 0x116   :  { %v2232_v34 = vpop.eup %2231 }
 0x117   :  { %v2234_v59 = vpop.eup %2233  ;;  %v709_v62 = vsel %vm144_vm0, %v2232_v34, 0.0  ;;  %v82_v34 = vld [vmem:[%s5112_s1 + $0x10] sm:$0xff] }
 0x118   :  { %707 = vadd.xlane.f32.xlu1 %v706_v58  ;;  %710 = vadd.xlane.f32.xlu0 %v709_v62  ;;  %v712_v26 = vsel %vm144_vm0, %v2234_v59, 0.0  ;;  %v89_v59 = vld [vmem:[%s5112_s1 + $0x48] sm:$0xff] }
 0x11a   :  { %v2236_v50 = vpop.eup %2235 }
 0x11b   :  { %v2238_v12 = vpop.eup %2237  ;;  %v715_v51 = vsel %vm144_vm0, %v2236_v50, 0.0  ;;  %v83_v50 = vld [vmem:[%s5112_s1 + $0x18] sm:$0xff] }
 0x11c   :  { %713 = vadd.xlane.f32.xlu1 %v712_v26  ;;  %716 = vadd.xlane.f32.xlu0 %v715_v51  ;;  %v718_v18 = vsel %vm144_vm0, %v2238_v12, 0.0  ;;  %v91_v12 = vld [vmem:[%s5112_s1 + $0x58] sm:$0xff] }
 0x120   :  { %719 = vadd.xlane.f32.xlu1 %v718_v18 }
 0x129   :  { %v3226_v43 = vpop.xlane.xlu0 %530 }
 0x12a   :  { %2239 = vlog2.f32 %v3226_v43 }
 0x12d   :  { %v3228_v22 = vpop.xlane.xlu1 %533  ;;  %v3230_v42 = vpop.xlane.xlu0 %536 }
 0x12e   :  { %2241 = vlog2.f32 %v3228_v22 }
 0x12f   :  { %2243 = vlog2.f32 %v3230_v42 }
 0x131   :  { %919 = vperm.xlu1 %2110, %v81_v7   ;;  %v3238_v28 = vpop.xlane.xlu1 %539  ;;  %v3240_v58 = vpop.xlane.xlu0 %542  ;;  %v84_v7 = vld [vmem:[%s5112_s1 + $0x20] sm:$0xff] }
 0x132   :  { %916 = vperm.xlu0 %2109, %v80_v23   ;;  %v93_v23 = vld [vmem:[%s5112_s1 + $0x68] sm:$0xff]  ;;  %2245 = vlog2.f32 %v3238_v28  ;;  %v2411_v28 = vld [vmem:[%s5111_s0 + $0x160] sm:$0xff] }
 0x133   :  { %2247 = vlog2.f32 %v3240_v58 }
 0x135   :  { %922 = vperm.xlu1 %2110, %v82_v34   ;;  %v3248_v62 = vpop.xlane.xlu1 %545  ;;  %v3250_v26 = vpop.xlane.xlu0 %548 }
 0x136   :  { %943 = vperm.xlu0 %2109, %v89_v59   ;;  %2249 = vlog2.f32 %v3248_v62 }
 0x137   :  { %2251 = vlog2.f32 %v3250_v26 }
 0x139   :  { %925 = vperm.xlu1 %2110, %v83_v50   ;;  %v3258_v51 = vpop.xlane.xlu1 %551  ;;  %v3260_v18 = vpop.xlane.xlu0 %554  ;;  %v85_v50 = vld [vmem:[%s5112_s1 + $0x28] sm:$0xff] }
 0x13a   :  { %949 = vperm.xlu0 %2109, %v91_v12   ;;  %v95_v12 = vld [vmem:[%s5112_s1 + $0x78] sm:$0xff]  ;;  %2253 = vlog2.f32 %v3258_v51 }
 0x13b   :  { %2255 = vlog2.f32 %v3260_v18 }
 0x13d   :  { %928 = vperm.xlu1 %2110, %v84_v7   ;;  %v3268_v34 = vpop.xlane.xlu1 %557  ;;  %v3270_v59 = vpop.xlane.xlu0 %560  ;;  %v86_v7 = vld [vmem:[%s5112_s1 + $0x30] sm:$0xff] }
 0x13e   :  { %955 = vperm.xlu0 %2109, %v93_v23   ;;  %v97_v23 = vld [vmem:[%s5112_s1 + $0x88] sm:$0xff]  ;;  %2257 = vlog2.f32 %v3268_v34 }
 0x13f   :  { %2259 = vlog2.f32 %v3270_v59  ;;  %v2413_v59 = vld [vmem:[%s5111_s0 + $0x170] sm:$0xff] }
 0x141   :  { %931 = vperm.xlu1 %2110, %v85_v50   ;;  %v3278_v6 = vpop.xlane.xlu1 %563  ;;  %v3280_v35 = vpop.xlane.xlu0 %566  ;;  %v87_v50 = vld [vmem:[%s5112_s1 + $0x38] sm:$0xff] }
 0x142   :  { %961 = vperm.xlu0 %2109, %v95_v12   ;;  %v99_v12 = vld [vmem:[%s5112_s1 + $0x98] sm:$0xff]  ;;  %2261 = vlog2.f32 %v3278_v6 }
 0x143   :  { %2263 = vlog2.f32 %v3280_v35 }
 0x145   :  { %934 = vperm.xlu1 %2110, %v86_v7   ;;  %v3288_v10 = vpop.xlane.xlu1 %569  ;;  %v3290_v27 = vpop.xlane.xlu0 %572  ;;  %v88_v7 = vld [vmem:[%s5112_s1 + $0x40] sm:$0xff] }
 0x146   :  { %967 = vperm.xlu0 %2109, %v97_v23   ;;  %v101_v23 = vld [vmem:[%s5112_s1 + $0xa8] sm:$0xff]  ;;  %2265 = vlog2.f32 %v3288_v10 }
 0x147   :  { %2267 = vlog2.f32 %v3290_v27  ;;  %v2414_v27 = vld [vmem:[%s5111_s0 + $0x178] sm:$0xff] }
 0x149   :  { %937 = vperm.xlu1 %2110, %v87_v50   ;;  %v3298_v3 = vpop.xlane.xlu1 %575  ;;  %v3300_v19 = vpop.xlane.xlu0 %578  ;;  %v90_v50 = vld [vmem:[%s5112_s1 + $0x50] sm:$0xff] }
 0x14a   :  { %973 = vperm.xlu0 %2109, %v99_v12   ;;  %v103_v12 = vld [vmem:[%s5112_s1 + $0xb8] sm:$0xff]  ;;  %2269 = vlog2.f32 %v3298_v3 }
 0x14d   :  { %940 = vperm.xlu1 %2110, %v88_v7   ;;  %v3308_v60 = vpop.xlane.xlu1 %581  ;;  %v3310_v11 = vpop.xlane.xlu0 %584  ;;  %v92_v7 = vld [vmem:[%s5112_s1 + $0x60] sm:$0xff] }
 0x14e   :  { %979 = vperm.xlu0 %2109, %v101_v23   ;;  %v105_v23 = vld [vmem:[%s5112_s1 + $0xc8] sm:$0xff] }
 0x151   :  { %946 = vperm.xlu1 %2110, %v90_v50   ;;  %v3318_v56 = vpop.xlane.xlu1 %587  ;;  %v3320_v4 = vpop.xlane.xlu0 %590  ;;  %v94_v50 = vld [vmem:[%s5112_s1 + $0x70] sm:$0xff] }
 0x152   :  { %985 = vperm.xlu0 %2109, %v103_v12   ;;  %v107_v12 = vld [vmem:[%s5112_s1 + $0xd8] sm:$0xff] }
 0x155   :  { %952 = vperm.xlu1 %2110, %v92_v7   ;;  %v3328_v52 = vpop.xlane.xlu1 %593  ;;  %v3330_v61 = vpop.xlane.xlu0 %596  ;;  %v96_v7 = vld [vmem:[%s5112_s1 + $0x80] sm:$0xff] }
 0x156   :  { %991 = vperm.xlu0 %2109, %v105_v23   ;;  %v109_v23 = vld [vmem:[%s5112_s1 + $0xe8] sm:$0xff] }
 0x159   :  { %958 = vperm.xlu1 %2110, %v94_v50   ;;  %v3338_v48 = vpop.xlane.xlu1 %599  ;;  %v3340_v57 = vpop.xlane.xlu0 %602  ;;  %v98_v50 = vld [vmem:[%s5112_s1 + $0x90] sm:$0xff] }
 0x15a   :  { %997 = vperm.xlu0 %2109, %v107_v12  }
 0x15d   :  { %964 = vperm.xlu1 %2110, %v96_v7   ;;  %v3348_v44 = vpop.xlane.xlu1 %605  ;;  %v3350_v53 = vpop.xlane.xlu0 %608 }
 0x15e   :  { %5278 = vst [vmem:[#allocation12_spill] sm:$0xff] %v3350_v53  ;;  %1003 = vperm.xlu0 %2109, %v109_v23   ;;  %v102_v23 = vld [vmem:[%s5112_s1 + $0xb0] sm:$0xff] }
 0x161   :  { %970 = vperm.xlu1 %2110, %v98_v50   ;;  %v3355_v12 = vpop.xlane.xlu1 %611  ;;  %v3357_v40 = vpop.xlane.xlu0 %614 }
 0x162   :  { %5279 = vst [vmem:[#allocation13_spill] sm:$0xff] %v3355_v12  ;;  %5280 = vst [vmem:[#allocation53_spill] sm:$0xff] %v3357_v40 }
 0x165   :  { %976 = vperm.xlu1 %2110, %v100_v49   ;;  %v3362_v7 = vpop.xlane.xlu1 %617  ;;  %v3364_v37 = vpop.xlane.xlu0 %620 }
 0x166   :  { %5281 = vst [vmem:[#allocation54_spill] sm:$0xff] %v3362_v7  ;;  %5282 = vst [vmem:[#allocation55_spill] sm:$0xff] %v3364_v37 }
 0x169   :  { %982 = vperm.xlu1 %2110, %v102_v23   ;;  %v3369_v45 = vpop.xlane.xlu1 %623  ;;  %v3371_v50 = vpop.xlane.xlu0 %626 }
 0x16a   :  { %5283 = vst [vmem:[#allocation56_spill] sm:$0xff] %v3369_v45  ;;  %5284 = vst [vmem:[#allocation57_spill] sm:$0xff] %v3371_v50  ;;  %v108_v50 = vld [vmem:[%s5112_s1 + $0xe0] sm:$0xff] }
 0x16d   :  { %988 = vperm.xlu1 %2110, %v104_v32   ;;  %v3376_v41 = vpop.xlane.xlu1 %629  ;;  %v3378_v49 = vpop.xlane.xlu0 %632 }
 0x16e   :  { %5285 = vst [vmem:[#allocation58_spill] sm:$0xff] %v3376_v41  ;;  %5286 = vst [vmem:[#allocation59_spill] sm:$0xff] %v3378_v49 }
 0x171   :  { %994 = vperm.xlu1 %2110, %v106_v29   ;;  %v3383_v24 = vpop.xlane.xlu1 %635  ;;  %v3385_v23 = vpop.xlane.xlu0 %638 }
 0x172   :  { %5287 = vst [vmem:[#allocation60_spill] sm:$0xff] %v3383_v24  ;;  %5288 = vst [vmem:[#allocation61_spill] sm:$0xff] %v3385_v23 }
 0x175   :  { %1000 = vperm.xlu1 %2110, %v108_v50   ;;  %v3390_v45 = vpop.xlane.xlu1 %641  ;;  %v3392_v32 = vpop.xlane.xlu0 %644 }
 0x176   :  { %5289 = vst [vmem:[#allocation62_spill] sm:$0xff] %v3390_v45  ;;  %5290 = vst [vmem:[#allocation63_spill] sm:$0xff] %v3392_v32 }
 0x179   :  { %v3394_v41 = vpop.xlane.xlu1 %647  ;;  %v3396_v49 = vpop.xlane.xlu0 %650 }
 0x17a   :  { %5291 = vst [vmem:[#allocation64_spill] sm:$0xff] %v3394_v41  ;;  %5292 = vst [vmem:[#allocation65_spill] sm:$0xff] %v3396_v49 }
 0x17d   :  { %v3398_v1 = vpop.xlane.xlu1 %653  ;;  %v3400_v29 = vpop.xlane.xlu0 %656 }
 0x17e   :  { %5293 = vst [vmem:[#allocation66_spill] sm:$0xff] %v3398_v1  ;;  %5294 = vst [vmem:[#allocation67_spill] sm:$0xff] %v3400_v29 }
 0x181   :  { %v3402_v24 = vpop.xlane.xlu1 %659  ;;  %v3404_v23 = vpop.xlane.xlu0 %662 }
 0x182   :  { %5295 = vst [vmem:[#allocation68_spill] sm:$0xff] %v3402_v24  ;;  %5296 = vst [vmem:[#allocation69_spill] sm:$0xff] %v3404_v23 }
 0x185   :  { %v3406_v33 = vpop.xlane.xlu1 %665  ;;  %v3408_v20 = vpop.xlane.xlu0 %668 }
 0x186   :  { %5297 = vst [vmem:[#allocation70_spill] sm:$0xff] %v3406_v33  ;;  %5298 = vst [vmem:[#allocation71_spill] sm:$0xff] %v3408_v20 }
 0x189   :  { %v3410_v50 = vpop.xlane.xlu1 %671  ;;  %v3412_v45 = vpop.xlane.xlu0 %674 }
 0x18a   :  { %5299 = vst [vmem:[#allocation72_spill] sm:$0xff] %v3410_v50  ;;  %5300 = vst [vmem:[#allocation73_spill] sm:$0xff] %v3412_v45 }
 0x18d   :  { %v3414_v32 = vpop.xlane.xlu1 %677  ;;  %v3416_v41 = vpop.xlane.xlu0 %680 }
 0x18e   :  { %5301 = vst [vmem:[#allocation74_spill] sm:$0xff] %v3414_v32  ;;  %5302 = vst [vmem:[#allocation75_spill] sm:$0xff] %v3416_v41 }
 0x191   :  { %v3418_v49 = vpop.xlane.xlu1 %683  ;;  %v3420_v1 = vpop.xlane.xlu0 %686 }
 0x192   :  { %5303 = vst [vmem:[#allocation76_spill] sm:$0xff] %v3418_v49  ;;  %5304 = vst [vmem:[#allocation77_spill] sm:$0xff] %v3420_v1  ;;  %v913_v49 = vlaneseq }
 0x195   :  { %v3422_v29 = vpop.xlane.xlu1 %689  ;;  %v3424_v24 = vpop.xlane.xlu0 %692 }
 0x196   :  { %5305 = vst [vmem:[#allocation78_spill] sm:$0xff] %v3422_v29  ;;  %5306 = vst [vmem:[#allocation79_spill] sm:$0xff] %v3424_v24  ;;  %v3444_v24 = vand.u32 127, %v913_v49  ;;  %v2368_v49 = vld [vmem:[%s5111_s0] sm:$0xff] }
 0x199   :  { %v3426_v23 = vpop.xlane.xlu1 %695  ;;  %v3428_v33 = vpop.xlane.xlu0 %698 }
 0x19a   :  { %5307 = vst [vmem:[#allocation80_spill] sm:$0xff] %v3426_v23  ;;  %5308 = vst [vmem:[#allocation81_spill] sm:$0xff] %v3428_v33 }
 0x19d   :  { %v3430_v20 = vpop.xlane.xlu1 %701  ;;  %v3432_v50 = vpop.xlane.xlu0 %704 }
 0x19e   :  { %5309 = vst [vmem:[#allocation82_spill] sm:$0xff] %v3430_v20  ;;  %5310 = vst [vmem:[#allocation83_spill] sm:$0xff] %v3432_v50 }
 0x1a1   :  { %v3434_v45 = vpop.xlane.xlu1 %707  ;;  %v3436_v32 = vpop.xlane.xlu0 %710 }
 0x1a2   :  { %5311 = vst [vmem:[#allocation84_spill] sm:$0xff] %v3434_v45  ;;  %5312 = vst [vmem:[#allocation85_spill] sm:$0xff] %v3436_v32  ;;  %v3451_v45 = vld [vmem:[%s5113_s2] ss:$0 sm:$0xff] }
 0x1a5   :  { %v3438_v41 = vpop.xlane.xlu1 %713  ;;  %v3440_v1 = vpop.xlane.xlu0 %716 }
 0x1a6   :  { %5313 = vst [vmem:[#allocation86_spill] sm:$0xff] %v3438_v41  ;;  %5314 = vst [vmem:[#allocation87_spill] sm:$0xff] %v3440_v1  ;;  %v2367_v41 = vld [vmem:[%s5111_s0 + $0x8] sm:$0xff] }
 0x1a9   :  { %v3442_v29 = vpop.xlane.xlu1 %719 }
 0x1aa   :  { %5315 = vst [vmem:[#allocation88_spill] sm:$0xff] %v3442_v29 }
 0x1ad   :  { %v920_v23 = vpop.permute.xlu1 %919  ;;  %v917_v46 = vpop.permute.xlu0 %916 }
 0x1ae   :  { %vm1108_vm1 = vcmp.eq.s32.totalorder %v3444_v24, %v920_v23  ;;  %vm1107_vm2 = vcmp.eq.s32.totalorder %v3444_v24, %v917_v46 }
 0x1af   :  { %v1172_v1 = vsel %vm1108_vm1, %v2367_v41, 0.0  ;;  %v1171_v29 = vsel %vm1107_vm2, %v2368_v49, 0.0  ;;  %v1499_v50 = vsel %vm1108_vm1, %v3451_v45, 0.0  ;;  %v2369_v41 = vld [vmem:[%s5111_s0 + $0x10] sm:$0xff]  ;;  %v1498_v33 = vsel %vm1107_vm2, %v3451_v45, 0.0 }
 0x1b0   :  { %v1238_v32 = vsel %vm144_vm0, %v1172_v1, 0.0  ;;  %v1235_v23 = vsel %vm144_vm0, %v1171_v29, 0.0  ;;  %v1565_v49 = vsel %vm144_vm0, %v1499_v50, 0.0 }
 0x1b1   :  { %1239 = vadd.xlane.f32.xlu1 %v1238_v32  ;;  %v923_v46 = vpop.permute.xlu1 %922  ;;  %1236 = vadd.xlane.f32.xlu0 %v1235_v23  ;;  %v1562_v23 = vsel %vm144_vm0, %v1498_v33, 0.0 }
 0x1b2   :  { %vm1109_vm3 = vcmp.eq.s32.totalorder %v3444_v24, %v923_v46 }
 0x1b3   :  { %v1173_v20 = vsel %vm1109_vm3, %v2369_v41, 0.0  ;;  %v1500_v32 = vsel %vm1109_vm3, %v3451_v45, 0.0 }
 0x1b4   :  { %v1241_v1 = vsel %vm144_vm0, %v1173_v20, 0.0  ;;  %v1568_v46 = vsel %vm144_vm0, %v1500_v32, 0.0  ;;  %v2370_v20 = vld [vmem:[%s5111_s0 + $0x18] sm:$0xff]  ;;  %v2371_v32 = vld [vmem:[%s5111_s0 + $0x20] sm:$0xff] }
 0x1b5   :  { %1566 = vadd.xlane.f32.xlu1 %v1565_v49  ;;  %v926_v29 = vpop.permute.xlu1 %925  ;;  %1242 = vadd.xlane.f32.xlu0 %v1241_v1 }
 0x1b6   :  { %vm1110_vm4 = vcmp.eq.s32.totalorder %v3444_v24, %v926_v29 }
 0x1b7   :  { %v1501_v41 = vsel %vm1110_vm4, %v3451_v45, 0.0  ;;  %v1174_v50 = vsel %vm1110_vm4, %v2370_v20, 0.0 }
 0x1b8   :  { %v1571_v49 = vsel %vm144_vm0, %v1501_v41, 0.0  ;;  %v1244_v1 = vsel %vm144_vm0, %v1174_v50, 0.0  ;;  %v2372_v50 = vld [vmem:[%s5111_s0 + $0x28] sm:$0xff] }
 0x1b9   :  { %1569 = vadd.xlane.f32.xlu1 %v1568_v46  ;;  %v929_v8 = vpop.permute.xlu1 %928  ;;  %1563 = vadd.xlane.f32.xlu0 %v1562_v23 }
 0x1ba   :  { %vm1111_vm5 = vcmp.eq.s32.totalorder %v3444_v24, %v929_v8 }
 0x1bb   :  { %v1502_v29 = vsel %vm1111_vm5, %v3451_v45, 0.0  ;;  %v1175_v23 = vsel %vm1111_vm5, %v2371_v32, 0.0 }
 0x1bc   :  { %v1574_v46 = vsel %vm144_vm0, %v1502_v29, 0.0  ;;  %v1247_v8 = vsel %vm144_vm0, %v1175_v23, 0.0  ;;  %v2373_v23 = vld [vmem:[%s5111_s0 + $0x30] sm:$0xff] }
 0x1bd   :  { %1572 = vadd.xlane.f32.xlu1 %v1571_v49  ;;  %v932_v33 = vpop.permute.xlu1 %931  ;;  %1245 = vadd.xlane.f32.xlu0 %v1244_v1 }
 0x1be   :  { %vm1112_vm6 = vcmp.eq.s32.totalorder %v3444_v24, %v932_v33 }
 0x1bf   :  { %v1503_v20 = vsel %vm1112_vm6, %v3451_v45, 0.0  ;;  %v1176_v49 = vsel %vm1112_vm6, %v2372_v50, 0.0 }
 0x1c0   :  { %v1577_v1 = vsel %vm144_vm0, %v1503_v20, 0.0  ;;  %v1250_v33 = vsel %vm144_vm0, %v1176_v49, 0.0  ;;  %v2374_v49 = vld [vmem:[%s5111_s0 + $0x38] sm:$0xff] }
 0x1c1   :  { %1575 = vadd.xlane.f32.xlu1 %v1574_v46  ;;  %v935_v41 = vpop.permute.xlu1 %934  ;;  %1248 = vadd.xlane.f32.xlu0 %v1247_v8 }
 0x1c2   :  { %vm1113_vm7 = vcmp.eq.s32.totalorder %v3444_v24, %v935_v41 }
 0x1c3   :  { %v1504_v32 = vsel %vm1113_vm7, %v3451_v45, 0.0  ;;  %v1177_v46 = vsel %vm1113_vm7, %v2373_v23, 0.0  ;;  %v944_v23 = vpop.permute.xlu0 %943 }
 0x1c4   :  { %v1580_v8 = vsel %vm144_vm0, %v1504_v32, 0.0  ;;  %v1253_v41 = vsel %vm144_vm0, %v1177_v46, 0.0  ;;  %v2375_v46 = vld [vmem:[%s5111_s0 + $0x40] sm:$0xff]  ;;  %vm1116_vm10 = vcmp.eq.s32.totalorder %v3444_v24, %v944_v23 }
 0x1c5   :  { %1578 = vadd.xlane.f32.xlu1 %v1577_v1  ;;  %v938_v29 = vpop.permute.xlu1 %937  ;;  %1251 = vadd.xlane.f32.xlu0 %v1250_v33 }
 0x1c6   :  { %vm1114_vm8 = vcmp.eq.s32.totalorder %v3444_v24, %v938_v29 }
 0x1c7   :  { %v1505_v50 = vsel %vm1114_vm8, %v3451_v45, 0.0  ;;  %v1178_v1 = vsel %vm1114_vm8, %v2374_v49, 0.0 }
 0x1c8   :  { %v1583_v33 = vsel %vm144_vm0, %v1505_v50, 0.0  ;;  %v1256_v29 = vsel %vm144_vm0, %v1178_v1, 0.0  ;;  %v1507_v50 = vsel %vm1116_vm10, %v3451_v45, 0.0  ;;  %v2376_v1 = vld [vmem:[%s5111_s0 + $0x48] sm:$0xff] }
 0x1c9   :  { %1581 = vadd.xlane.f32.xlu1 %v1580_v8  ;;  %v941_v20 = vpop.permute.xlu1 %940  ;;  %1254 = vadd.xlane.f32.xlu0 %v1253_v41 }
 0x1ca   :  { %vm1115_vm9 = vcmp.eq.s32.totalorder %v3444_v24, %v941_v20 }
 0x1cb   :  { %v1506_v32 = vsel %vm1115_vm9, %v3451_v45, 0.0  ;;  %v1179_v8 = vsel %vm1115_vm9, %v2375_v46, 0.0  ;;  %v1589_v46 = vsel %vm144_vm0, %v1507_v50, 0.0 }
 0x1cc   :  { %v1586_v49 = vsel %vm144_vm0, %v1506_v32, 0.0  ;;  %v1259_v20 = vsel %vm144_vm0, %v1179_v8, 0.0  ;;  %v2377_v8 = vld [vmem:[%s5111_s0 + $0x50] sm:$0xff] }
 0x1cd   :  { %1584 = vadd.xlane.f32.xlu1 %v1583_v33  ;;  %1257 = vadd.xlane.f32.xlu0 %v1256_v29  ;;  %v947_v41 = vpop.permute.xlu1 %946  ;;  %v1180_v33 = vsel %vm1116_vm10, %v2376_v1, 0.0  ;;  %v950_v29 = vpop.permute.xlu0 %949 }
 0x1ce   :  { %vm1117_vm11 = vcmp.eq.s32.totalorder %v3444_v24, %v947_v41  ;;  %v1262_v23 = vsel %vm144_vm0, %v1180_v33, 0.0  ;;  %vm1118_vm12 = vcmp.eq.s32.totalorder %v3444_v24, %v950_v29  ;;  %v2378_v33 = vld [vmem:[%s5111_s0 + $0x58] sm:$0xff] }
 0x1cf   :  { %v1508_v32 = vsel %vm1117_vm11, %v3451_v45, 0.0  ;;  %v1509_v50 = vsel %vm1118_vm12, %v3451_v45, 0.0 }
 0x1d0   :  { %v1592_v1 = vsel %vm144_vm0, %v1508_v32, 0.0 }
 0x1d1   :  { %1587 = vadd.xlane.f32.xlu1 %v1586_v49  ;;  %1260 = vadd.xlane.f32.xlu0 %v1259_v20  ;;  %v1181_v49 = vsel %vm1117_vm11, %v2377_v8, 0.0  ;;  %v953_v20 = vpop.permute.xlu1 %952  ;;  %v956_v37 = vpop.permute.xlu0 %955 }
 0x1d2   :  { %v1265_v41 = vsel %vm144_vm0, %v1181_v49, 0.0  ;;  %vm1119_vm13 = vcmp.eq.s32.totalorder %v3444_v24, %v953_v20  ;;  %v2379_v49 = vld [vmem:[%s5111_s0 + $0x60] sm:$0xff]  ;;  %vm1120_vm14 = vcmp.eq.s32.totalorder %v3444_v24, %v956_v37 }
 0x1d3   :  { %v1510_v32 = vsel %vm1119_vm13, %v3451_v45, 0.0 }
 0x1d5   :  { %1590 = vadd.xlane.f32.xlu1 %v1589_v46  ;;  %1263 = vadd.xlane.f32.xlu0 %v1262_v23  ;;  %v1182_v46 = vsel %vm1118_vm12, %v2378_v33, 0.0  ;;  %v1595_v23 = vsel %vm144_vm0, %v1509_v50, 0.0  ;;  %v959_v8 = vpop.permute.xlu1 %958  ;;  %v1598_v33 = vsel %vm144_vm0, %v1510_v32, 0.0  ;;  %v1511_v50 = vsel %vm1120_vm14, %v3451_v45, 0.0 }
 0x1d6   :  { %v1268_v29 = vsel %vm144_vm0, %v1182_v46, 0.0  ;;  %v2380_v46 = vld [vmem:[%s5111_s0 + $0x68] sm:$0xff]  ;;  %vm1121_vm15 = vcmp.eq.s32.totalorder %v3444_v24, %v959_v8 }
 0x1d7   :  { %v1512_v32 = vsel %vm1121_vm15, %v3451_v45, 0.0 }
 0x1d8   :  { %v1604_v8 = vsel %vm144_vm0, %v1512_v32, 0.0 }
 0x1d9   :  { %1593 = vadd.xlane.f32.xlu1 %v1592_v1  ;;  %1266 = vadd.xlane.f32.xlu0 %v1265_v41  ;;  %v1183_v1 = vsel %vm1119_vm13, %v2379_v49, 0.0  ;;  %v962_v41 = vpop.permute.xlu0 %961  ;;  %v1601_v49 = vsel %vm144_vm0, %v1511_v50, 0.0  ;;  %v2382_v50 = vld [vmem:[%s5111_s0 + $0x80] sm:$0xff] }
 0x1da   :  { %v1271_v20 = vsel %vm144_vm0, %v1183_v1, 0.0  ;;  %v2381_v1 = vld [vmem:[%s5111_s0 + $0x70] sm:$0xff]  ;;  %vm1122_vm1 = vcmp.eq.s32.totalorder %v3444_v24, %v962_v41 }
 0x1dd   :  { %1596 = vadd.xlane.f32.xlu1 %v1595_v23  ;;  %1269 = vadd.xlane.f32.xlu0 %v1268_v29  ;;  %v1184_v23 = vsel %vm1120_vm14, %v2380_v46, 0.0  ;;  %v965_v29 = vpop.permute.xlu1 %964  ;;  %v968_v36 = vpop.permute.xlu0 %967 }
 0x1de   :  { %v1274_v37 = vsel %vm144_vm0, %v1184_v23, 0.0  ;;  %vm1123_vm2 = vcmp.eq.s32.totalorder %v3444_v24, %v965_v29  ;;  %v2383_v23 = vld [vmem:[%s5111_s0 + $0x78] sm:$0xff]  ;;  %vm1124_vm3 = vcmp.eq.s32.totalorder %v3444_v24, %v968_v36  ;;  %v2386_v29 = vld [vmem:[%s5111_s0 + $0x90] sm:$0xff] }
 0x1df   :  { %v1187_v46 = vsel %vm1123_vm2, %v2382_v50, 0.0  ;;  %v1514_v41 = vsel %vm1123_vm2, %v3451_v45, 0.0 }
 0x1e0   :  { %v1283_v32 = vsel %vm144_vm0, %v1187_v46, 0.0 }
 0x1e1   :  { %1599 = vadd.xlane.f32.xlu1 %v1598_v33  ;;  %1272 = vadd.xlane.f32.xlu0 %v1271_v20  ;;  %v1185_v33 = vsel %vm1121_vm15, %v2381_v1, 0.0 }
 0x1e2   :  { %v1277_v20 = vsel %vm144_vm0, %v1185_v33, 0.0  ;;  %v971_v33 = vpop.permute.xlu1 %970 }
 0x1e3   :  { %vm1125_vm5 = vcmp.eq.s32.totalorder %v3444_v24, %v971_v33 }
 0x1e5   :  { %1602 = vadd.xlane.f32.xlu1 %v1601_v49  ;;  %1275 = vadd.xlane.f32.xlu0 %v1274_v37  ;;  %v1186_v49 = vsel %vm1122_vm1, %v2383_v23, 0.0  ;;  %v974_v37 = vpop.permute.xlu0 %973 }
 0x1e6   :  { %v1280_v1 = vsel %vm144_vm0, %v1186_v49, 0.0  ;;  %vm1126_vm4 = vcmp.eq.s32.totalorder %v3444_v24, %v974_v37  ;;  %v2385_v49 = vld [vmem:[%s5111_s0 + $0x98] sm:$0xff] }
 0x1e9   :  { %1605 = vadd.xlane.f32.xlu1 %v1604_v8  ;;  %1278 = vadd.xlane.f32.xlu0 %v1277_v20  ;;  %v1513_v8 = vsel %vm1122_vm1, %v3451_v45, 0.0  ;;  %v2384_v20 = vld [vmem:[%s5111_s0 + $0x88] sm:$0xff] }
 0x1ea   :  { %v1188_v50 = vsel %vm1124_vm3, %v2384_v20, 0.0  ;;  %v1607_v46 = vsel %vm144_vm0, %v1513_v8, 0.0  ;;  %v1610_v8 = vsel %vm144_vm0, %v1514_v41, 0.0 }
 0x1eb   :  { %v1286_v23 = vsel %vm144_vm0, %v1188_v50, 0.0  ;;  %v1189_v50 = vsel %vm1125_vm5, %v2386_v29, 0.0 }
 0x1ec   :  { %v1289_v41 = vsel %vm144_vm0, %v1189_v50, 0.0  ;;  %v1516_v50 = vsel %vm1125_vm5, %v3451_v45, 0.0 }
 0x1ed   :  { %1284 = vadd.xlane.f32.xlu1 %v1283_v32  ;;  %1281 = vadd.xlane.f32.xlu0 %v1280_v1  ;;  %v1190_v32 = vsel %vm1126_vm4, %v2385_v49, 0.0  ;;  %v977_v1 = vpop.permute.xlu1 %976 }
 0x1ee   :  { %v1292_v20 = vsel %vm144_vm0, %v1190_v32, 0.0  ;;  %vm1127_vm6 = vcmp.eq.s32.totalorder %v3444_v24, %v977_v1  ;;  %v1515_v32 = vsel %vm1124_vm3, %v3451_v45, 0.0 }
 0x1f1   :  { %1608 = vadd.xlane.f32.xlu1 %v1607_v46  ;;  %1287 = vadd.xlane.f32.xlu0 %v1286_v23  ;;  %v1517_v46 = vsel %vm1126_vm4, %v3451_v45, 0.0  ;;  %v980_v23 = vpop.permute.xlu0 %979  ;;  %v983_v37 = vpop.permute.xlu1 %982 }
 0x1f2   :  { %v1619_v49 = vsel %vm144_vm0, %v1517_v46, 0.0  ;;  %vm1128_vm7 = vcmp.eq.s32.totalorder %v3444_v24, %v980_v23  ;;  %vm1129_vm8 = vcmp.eq.s32.totalorder %v3444_v24, %v983_v37 }
 0x1f3   :  { %v1519_v36 = vsel %vm1128_vm7, %v3451_v45, 0.0 }
 0x1f5   :  { %1611 = vadd.xlane.f32.xlu1 %v1610_v8  ;;  %1293 = vadd.xlane.f32.xlu0 %v1292_v20  ;;  %v1518_v8 = vsel %vm1127_vm6, %v3451_v45, 0.0  ;;  %v1613_v20 = vsel %vm144_vm0, %v1515_v32, 0.0  ;;  %v986_v46 = vpop.permute.xlu0 %985  ;;  %v2387_v32 = vld [vmem:[%s5111_s0 + $0xa0] sm:$0xff] }
 0x1f6   :  { %v1622_v29 = vsel %vm144_vm0, %v1518_v8, 0.0  ;;  %v1191_v33 = vsel %vm1127_vm6, %v2387_v32, 0.0  ;;  %v1520_v8 = vsel %vm1129_vm8, %v3451_v45, 0.0  ;;  %vm1130_vm9 = vcmp.eq.s32.totalorder %v3444_v24, %v986_v46 }
 0x1f9   :  { %1290 = vadd.xlane.f32.xlu1 %v1289_v41  ;;  %1620 = vadd.xlane.f32.xlu0 %v1619_v49  ;;  %v1616_v41 = vsel %vm144_vm0, %v1516_v50, 0.0  ;;  %v1625_v49 = vsel %vm144_vm0, %v1519_v36, 0.0  ;;  %v1628_v50 = vsel %vm144_vm0, %v1520_v8, 0.0  ;;  %v2388_v36 = vld [vmem:[%s5111_s0 + $0xa8] sm:$0xff]  ;;  %v2389_v8 = vld [vmem:[%s5111_s0 + $0xb0] sm:$0xff] }
 0x1fa   :  { %v1192_v1 = vsel %vm1128_vm7, %v2388_v36, 0.0  ;;  %v1193_v23 = vsel %vm1129_vm8, %v2389_v8, 0.0 }
 0x1fb   :  { %v1298_v32 = vsel %vm144_vm0, %v1192_v1, 0.0  ;;  %v1301_v36 = vsel %vm144_vm0, %v1193_v23, 0.0 }
 0x1fd   :  { %1614 = vadd.xlane.f32.xlu1 %v1613_v20  ;;  %1623 = vadd.xlane.f32.xlu0 %v1622_v29  ;;  %v989_v20 = vpop.permute.xlu1 %988  ;;  %v1295_v29 = vsel %vm144_vm0, %v1191_v33, 0.0 }
 0x1fe   :  { %vm1131_vm10 = vcmp.eq.s32.totalorder %v3444_v24, %v989_v20 }
 0x201   :  { %1617 = vadd.xlane.f32.xlu1 %v1616_v41  ;;  %1626 = vadd.xlane.f32.xlu0 %v1625_v49  ;;  %v1521_v41 = vsel %vm1130_vm9, %v3451_v45, 0.0  ;;  %v992_v49 = vpop.permute.xlu0 %991 }
 0x202   :  { %v1631_v33 = vsel %vm144_vm0, %v1521_v41, 0.0  ;;  %vm1132_vm11 = vcmp.eq.s32.totalorder %v3444_v24, %v992_v49  ;;  %v2390_v41 = vld [vmem:[%s5111_s0 + $0xb8] sm:$0xff] }
 0x203   :  { %v1194_v37 = vsel %vm1130_vm9, %v2390_v41, 0.0 }
 0x204   :  { %v1304_v8 = vsel %vm144_vm0, %v1194_v37, 0.0 }
 0x205   :  { %1296 = vadd.xlane.f32.xlu1 %v1295_v29  ;;  %1629 = vadd.xlane.f32.xlu0 %v1628_v50  ;;  %v1522_v29 = vsel %vm1131_vm10, %v3451_v45, 0.0  ;;  %v995_v50 = vpop.permute.xlu1 %994 }
 0x206   :  { %v1634_v1 = vsel %vm144_vm0, %v1522_v29, 0.0  ;;  %vm1133_vm12 = vcmp.eq.s32.totalorder %v3444_v24, %v995_v50  ;;  %v2391_v29 = vld [vmem:[%s5111_s0 + $0xc0] sm:$0xff] }
 0x207   :  { %v1195_v46 = vsel %vm1131_vm10, %v2391_v29, 0.0 }
 0x208   :  { %v1307_v41 = vsel %vm144_vm0, %v1195_v46, 0.0  ;;  %v2393_v46 = vld [vmem:[%s5111_s0 + $0xd0] sm:$0xff] }
 0x209   :  { %1299 = vadd.xlane.f32.xlu1 %v1298_v32  ;;  %1632 = vadd.xlane.f32.xlu0 %v1631_v33  ;;  %v1523_v32 = vsel %vm1132_vm11, %v3451_v45, 0.0  ;;  %v998_v33 = vpop.permute.xlu0 %997  ;;  %v1197_v49 = vsel %vm1133_vm12, %v2393_v46, 0.0  ;;  %v111_v46 = vld [vmem:[%s5112_s1 + $0xf8] sm:$0xff] }
 0x20a   :  { %v1637_v23 = vsel %vm144_vm0, %v1523_v32, 0.0  ;;  %vm1134_vm13 = vcmp.eq.s32.totalorder %v3444_v24, %v998_v33  ;;  %v2392_v32 = vld [vmem:[%s5111_s0 + $0xc8] sm:$0xff]  ;;  %v110_v33 = vld [vmem:[%s5112_s1 + $0xf0] sm:$0xff] }
 0x20b   :  { %v1196_v20 = vsel %vm1132_vm11, %v2392_v32, 0.0  ;;  %v2394_v32 = vld [vmem:[%s5111_s0 + $0xd8] sm:$0xff] }
 0x20d   :  { %1302 = vadd.xlane.f32.xlu1 %v1301_v36  ;;  %1635 = vadd.xlane.f32.xlu0 %v1634_v1  ;;  %v1524_v36 = vsel %vm1133_vm12, %v3451_v45, 0.0  ;;  %v1001_v1 = vpop.permute.xlu1 %1000 }
 0x20e   :  { %v1640_v37 = vsel %vm144_vm0, %v1524_v36, 0.0  ;;  %vm1135_vm14 = vcmp.eq.s32.totalorder %v3444_v24, %v1001_v1  ;;  %v112_v1 = vld [vmem:[%s5112_s1 + $0x100] sm:$0xff] }
 0x20f   :  { %v1526_v36 = vsel %vm1135_vm14, %v3451_v45, 0.0 }
 0x211   :  { %1305 = vadd.xlane.f32.xlu1 %v1304_v8  ;;  %1638 = vadd.xlane.f32.xlu0 %v1637_v23  ;;  %v1525_v8 = vsel %vm1134_vm13, %v3451_v45, 0.0  ;;  %v1310_v23 = vsel %vm144_vm0, %v1196_v20, 0.0  ;;  %v1198_v20 = vsel %vm1134_vm13, %v2394_v32, 0.0 }
 0x212   :  { %v1643_v29 = vsel %vm144_vm0, %v1525_v8, 0.0  ;;  %v1316_v50 = vsel %vm144_vm0, %v1198_v20, 0.0  ;;  %v2395_v8 = vld [vmem:[%s5111_s0 + $0xe0] sm:$0xff]  ;;  %v114_v20 = vld [vmem:[%s5112_s1 + $0x110] sm:$0xff] }
 0x215   :  { %1308 = vadd.xlane.f32.xlu1 %v1307_v41  ;;  %1641 = vadd.xlane.f32.xlu0 %v1640_v37  ;;  %v1313_v41 = vsel %vm144_vm0, %v1197_v49, 0.0  ;;  %v1646_v37 = vsel %vm144_vm0, %v1526_v36, 0.0  ;;  %v113_v49 = vld [vmem:[%s5112_s1 + $0x108] sm:$0xff]  ;;  %v3719_v36 = vpop.permute.xlu0 %1003 }
 0x216   :  { %vm1136_vm15 = vcmp.eq.s32.totalorder %v3444_v24, %v3719_v36  ;;  %v2396_v36 = vld [vmem:[%s5111_s0 + $0xe8] sm:$0xff] }
 0x219   :  { %1311 = vadd.xlane.f32.xlu1 %v1310_v23  ;;  %1644 = vadd.xlane.f32.xlu0 %v1643_v29  ;;  %v1199_v23 = vsel %vm1135_vm14, %v2395_v8, 0.0 }
 0x21a   :  { %v1319_v29 = vsel %vm144_vm0, %v1199_v23, 0.0 }
 0x21d   :  { %1314 = vadd.xlane.f32.xlu1 %v1313_v41  ;;  %1647 = vadd.xlane.f32.xlu0 %v1646_v37  ;;  %v115_v41 = vld [vmem:[%s5112_s1 + $0x118] sm:$0xff] }
 0x221   :  { %1317 = vadd.xlane.f32.xlu1 %v1316_v50  ;;  %v117_v50 = vld [vmem:[%s5112_s1 + $0x128] sm:$0xff] }
 0x225   :  { %1320 = vadd.xlane.f32.xlu1 %v1319_v29  ;;  %v116_v29 = vld [vmem:[%s5112_s1 + $0x120] sm:$0xff] }
 0x233   :  { %1009 = vperm.xlu0 %2109, %v111_v46   ;;  %v119_v46 = vld [vmem:[%s5112_s1 + $0x138] sm:$0xff] }
 0x236   :  { %1006 = vperm.xlu1 %2110, %v110_v33  }
 0x237   :  { %1015 = vperm.xlu0 %2109, %v113_v49  }
 0x23a   :  { %v3727_v37 = vpop.xlane.xlu1 %1239  ;;  %1012 = vperm.xlu1 %2110, %v112_v1   ;;  %v3729_v32 = vpop.xlane.xlu0 %1236  ;;  %v118_v1 = vld [vmem:[%s5112_s1 + $0x130] sm:$0xff] }
 0x23b   :  { %1021 = vperm.xlu0 %2109, %v115_v41   ;;  %v121_v41 = vld [vmem:[%s5112_s1 + $0x148] sm:$0xff] }
 0x23e   :  { %v3737_v8 = vpop.xlane.xlu1 %1566  ;;  %1018 = vperm.xlu1 %2110, %v114_v20   ;;  %v3739_v23 = vpop.xlane.xlu0 %1242 }
 0x23f   :  { %5316 = vst [vmem:[#allocation89_spill] sm:$0xff] %v3739_v23  ;;  %1027 = vperm.xlu0 %2109, %v117_v50  }
 0x242   :  { %v3747_v33 = vpop.xlane.xlu1 %1569  ;;  %1024 = vperm.xlu1 %2110, %v116_v29   ;;  %v3749_v49 = vpop.xlane.xlu0 %1563  ;;  %v120_v29 = vld [vmem:[%s5112_s1 + $0x140] sm:$0xff] }
 0x243   :  { %5317 = vst [vmem:[#allocation90_spill] sm:$0xff] %v3747_v33  ;;  %5318 = vst [vmem:[#allocation91_spill] sm:$0xff] %v3749_v49  ;;  %1033 = vperm.xlu0 %2109, %v119_v46   ;;  %v123_v46 = vld [vmem:[%s5112_s1 + $0x158] sm:$0xff] }
 0x246   :  { %v3757_v20 = vpop.xlane.xlu1 %1572  ;;  %1030 = vperm.xlu1 %2110, %v118_v1   ;;  %v3759_v50 = vpop.xlane.xlu0 %1245  ;;  %v122_v1 = vld [vmem:[%s5112_s1 + $0x150] sm:$0xff] }
 0x247   :  { %5319 = vst [vmem:[#allocation92_spill] sm:$0xff] %v3757_v20  ;;  %5320 = vst [vmem:[#allocation93_spill] sm:$0xff] %v3759_v50  ;;  %1039 = vperm.xlu0 %2109, %v121_v41   ;;  %v125_v41 = vld [vmem:[%s5112_s1 + $0x168] sm:$0xff] }
 0x24a   :  { %v3767_v7 = vpop.xlane.xlu1 %1575  ;;  %1036 = vperm.xlu1 %2110, %v120_v29   ;;  %v3769_v25 = vpop.xlane.xlu0 %1248  ;;  %v124_v29 = vld [vmem:[%s5112_s1 + $0x160] sm:$0xff] }
 0x24b   :  { %5321 = vst [vmem:[#allocation94_spill] sm:$0xff] %v3767_v7  ;;  %5322 = vst [vmem:[#allocation95_spill] sm:$0xff] %v3769_v25  ;;  %1045 = vperm.xlu0 %2109, %v123_v46   ;;  %v127_v46 = vld [vmem:[%s5112_s1 + $0x178] sm:$0xff] }
 0x24e   :  { %v3777_v40 = vpop.xlane.xlu1 %1578  ;;  %1042 = vperm.xlu1 %2110, %v122_v1   ;;  %v3779_v21 = vpop.xlane.xlu0 %1251  ;;  %v126_v1 = vld [vmem:[%s5112_s1 + $0x170] sm:$0xff] }
 0x24f   :  { %5323 = vst [vmem:[#allocation96_spill] sm:$0xff] %v3777_v40  ;;  %5324 = vst [vmem:[#allocation97_spill] sm:$0xff] %v3779_v21  ;;  %1051 = vperm.xlu0 %2109, %v125_v41   ;;  %v129_v41 = vld [vmem:[%s5112_s1 + $0x188] sm:$0xff] }
 0x252   :  { %v3787_v7 = vpop.xlane.xlu1 %1581  ;;  %1048 = vperm.xlu1 %2110, %v124_v29   ;;  %v3789_v12 = vpop.xlane.xlu0 %1254  ;;  %v128_v29 = vld [vmem:[%s5112_s1 + $0x180] sm:$0xff] }
 0x253   :  { %5325 = vst [vmem:[#allocation98_spill] sm:$0xff] %v3787_v7  ;;  %5326 = vst [vmem:[#allocation99_spill] sm:$0xff] %v3789_v12  ;;  %1057 = vperm.xlu0 %2109, %v127_v46   ;;  %v131_v46 = vld [vmem:[%s5112_s1 + $0x198] sm:$0xff] }
 0x256   :  { %v3797_v40 = vpop.xlane.xlu1 %1584  ;;  %1054 = vperm.xlu1 %2110, %v126_v1   ;;  %v3799_v21 = vpop.xlane.xlu0 %1257  ;;  %v130_v1 = vld [vmem:[%s5112_s1 + $0x190] sm:$0xff] }
 0x257   :  { %5327 = vst [vmem:[#allocation100_spill] sm:$0xff] %v3797_v40  ;;  %5328 = vst [vmem:[#allocation101_spill] sm:$0xff] %v3799_v21  ;;  %1063 = vperm.xlu0 %2109, %v129_v41   ;;  %v133_v41 = vld [vmem:[%s5112_s1 + $0x1a8] sm:$0xff] }
 0x25a   :  { %v3807_v7 = vpop.xlane.xlu1 %1587  ;;  %1060 = vperm.xlu1 %2110, %v128_v29   ;;  %v3809_v12 = vpop.xlane.xlu0 %1260  ;;  %v132_v29 = vld [vmem:[%s5112_s1 + $0x1a0] sm:$0xff] }
 0x25b   :  { %5329 = vst [vmem:[#allocation102_spill] sm:$0xff] %v3807_v7  ;;  %5330 = vst [vmem:[#allocation103_spill] sm:$0xff] %v3809_v12  ;;  %1069 = vperm.xlu0 %2109, %v131_v46   ;;  %v135_v46 = vld [vmem:[%s5112_s1 + $0x1b8] sm:$0xff] }
 0x25e   :  { %v3817_v40 = vpop.xlane.xlu1 %1590  ;;  %1066 = vperm.xlu1 %2110, %v130_v1   ;;  %v3819_v21 = vpop.xlane.xlu0 %1263  ;;  %v134_v1 = vld [vmem:[%s5112_s1 + $0x1b0] sm:$0xff] }
 0x25f   :  { %5331 = vst [vmem:[#allocation104_spill] sm:$0xff] %v3817_v40  ;;  %5332 = vst [vmem:[#allocation105_spill] sm:$0xff] %v3819_v21  ;;  %1075 = vperm.xlu0 %2109, %v133_v41   ;;  %v137_v41 = vld [vmem:[%s5112_s1 + $0x1c8] sm:$0xff] }
 0x262   :  { %v3827_v7 = vpop.xlane.xlu1 %1593  ;;  %1072 = vperm.xlu1 %2110, %v132_v29   ;;  %v3829_v12 = vpop.xlane.xlu0 %1266  ;;  %v136_v29 = vld [vmem:[%s5112_s1 + $0x1c0] sm:$0xff] }
 0x263   :  { %5333 = vst [vmem:[#allocation106_spill] sm:$0xff] %v3827_v7  ;;  %5334 = vst [vmem:[#allocation107_spill] sm:$0xff] %v3829_v12  ;;  %1081 = vperm.xlu0 %2109, %v135_v46   ;;  %v139_v46 = vld [vmem:[%s5112_s1 + $0x1d8] sm:$0xff] }
 0x266   :  { %v3837_v40 = vpop.xlane.xlu1 %1596  ;;  %1078 = vperm.xlu1 %2110, %v134_v1   ;;  %v3839_v21 = vpop.xlane.xlu0 %1269  ;;  %v138_v1 = vld [vmem:[%s5112_s1 + $0x1d0] sm:$0xff] }
 0x267   :  { %5335 = vst [vmem:[#allocation108_spill] sm:$0xff] %v3837_v40  ;;  %5336 = vst [vmem:[#allocation109_spill] sm:$0xff] %v3839_v21  ;;  %1087 = vperm.xlu0 %2109, %v137_v41   ;;  %v141_v41 = vld [vmem:[%s5112_s1 + $0x1e8] sm:$0xff] }
 0x26a   :  { %v3847_v7 = vpop.xlane.xlu1 %1599  ;;  %1084 = vperm.xlu1 %2110, %v136_v29   ;;  %v3849_v12 = vpop.xlane.xlu0 %1272  ;;  %v140_v29 = vld [vmem:[%s5112_s1 + $0x1e0] sm:$0xff] }
 0x26b   :  { %5337 = vst [vmem:[#allocation110_spill] sm:$0xff] %v3847_v7  ;;  %5338 = vst [vmem:[#allocation111_spill] sm:$0xff] %v3849_v12  ;;  %1093 = vperm.xlu0 %2109, %v139_v46   ;;  %v143_v46 = vld [vmem:[%s5112_s1 + $0x1f8] sm:$0xff] }
 0x26e   :  { %v3857_v40 = vpop.xlane.xlu1 %1602  ;;  %1090 = vperm.xlu1 %2110, %v138_v1   ;;  %v3859_v21 = vpop.xlane.xlu0 %1275  ;;  %v142_v1 = vld [vmem:[%s5112_s1 + $0x1f0] sm:$0xff] }
 0x26f   :  { %5339 = vst [vmem:[#allocation112_spill] sm:$0xff] %v3857_v40  ;;  %5340 = vst [vmem:[#allocation113_spill] sm:$0xff] %v3859_v21  ;;  %1099 = vperm.xlu0 %2109, %v141_v41  }
 0x272   :  { %v3867_v7 = vpop.xlane.xlu1 %1605  ;;  %1096 = vperm.xlu1 %2110, %v140_v29   ;;  %v3869_v12 = vpop.xlane.xlu0 %1278 }
 0x273   :  { %5341 = vst [vmem:[#allocation114_spill] sm:$0xff] %v3867_v7  ;;  %5342 = vst [vmem:[#allocation115_spill] sm:$0xff] %v3869_v12  ;;  %1105 = vperm.xlu0 %2109, %v143_v46  }
 0x276   :  { %v3874_v40 = vpop.xlane.xlu1 %1284  ;;  %1102 = vperm.xlu1 %2110, %v142_v1   ;;  %v3876_v41 = vpop.xlane.xlu0 %1281 }
 0x277   :  { %5343 = vst [vmem:[#allocation116_spill] sm:$0xff] %v3874_v40  ;;  %5344 = vst [vmem:[#allocation117_spill] sm:$0xff] %v3876_v41 }
 0x27a   :  { %v3878_v21 = vpop.xlane.xlu1 %1608  ;;  %v3880_v20 = vpop.xlane.xlu0 %1287 }
 0x27b   :  { %5345 = vst [vmem:[#allocation118_spill] sm:$0xff] %v3878_v21  ;;  %5346 = vst [vmem:[#allocation119_spill] sm:$0xff] %v3880_v20 }
 0x27e   :  { %v3882_v33 = vpop.xlane.xlu1 %1611  ;;  %v3884_v7 = vpop.xlane.xlu0 %1293 }
 0x27f   :  { %5347 = vst [vmem:[#allocation120_spill] sm:$0xff] %v3882_v33  ;;  %5348 = vst [vmem:[#allocation121_spill] sm:$0xff] %v3884_v7  ;;  %v1527_v7 = vsel %vm1136_vm15, %v3451_v45, 0.0 }
 0x282   :  { %v3886_v29 = vpop.xlane.xlu1 %1290  ;;  %v3888_v46 = vpop.xlane.xlu0 %1620 }
 0x283   :  { %5349 = vst [vmem:[#allocation122_spill] sm:$0xff] %v3886_v29  ;;  %5350 = vst [vmem:[#allocation123_spill] sm:$0xff] %v3888_v46  ;;  %v1649_v29 = vsel %vm144_vm0, %v1527_v7, 0.0 }
 0x286   :  { %v3890_v12 = vpop.xlane.xlu1 %1614  ;;  %v3892_v25 = vpop.xlane.xlu0 %1623 }
 0x287   :  { %5351 = vst [vmem:[#allocation124_spill] sm:$0xff] %v3890_v12  ;;  %5352 = vst [vmem:[#allocation125_spill] sm:$0xff] %v3892_v25 }
 0x28a   :  { %v3894_v40 = vpop.xlane.xlu1 %1617  ;;  %v3896_v1 = vpop.xlane.xlu0 %1626 }
 0x28b   :  { %5353 = vst [vmem:[#allocation126_spill] sm:$0xff] %v3894_v40  ;;  %5354 = vst [vmem:[#allocation127_spill] sm:$0xff] %v3896_v1  ;;  %v1200_v1 = vsel %vm1136_vm15, %v2396_v36, 0.0 }
 0x28e   :  { %v3900_v20 = vpop.xlane.xlu1 %1296  ;;  %v3902_v33 = vpop.xlane.xlu0 %1629 }
 0x28f   :  { %5355 = vst [vmem:[#allocation128_spill] sm:$0xff] %v3900_v20  ;;  %5356 = vst [vmem:[#allocation129_spill] sm:$0xff] %v3902_v33  ;;  %v1322_v33 = vsel %vm144_vm0, %v1200_v1, 0.0 }
 0x292   :  { %v3906_v46 = vpop.xlane.xlu1 %1299  ;;  %1650 = vadd.xlane.f32.xlu0 %v1649_v29  ;;  %v3908_v12 = vpop.xlane.xlu0 %1632 }
 0x293   :  { %5357 = vst [vmem:[#allocation130_spill] sm:$0xff] %v3906_v46  ;;  %5358 = vst [vmem:[#allocation131_spill] sm:$0xff] %v3908_v12 }
 0x296   :  { %v3910_v25 = vpop.xlane.xlu1 %1302  ;;  %v3912_v40 = vpop.xlane.xlu0 %1635 }
 0x297   :  { %5359 = vst [vmem:[#allocation132_spill] sm:$0xff] %v3910_v25  ;;  %5360 = vst [vmem:[#allocation133_spill] sm:$0xff] %v3912_v40 }
 0x29a   :  { %v3918_v20 = vpop.xlane.xlu1 %1305  ;;  %1323 = vadd.xlane.f32.xlu1 %v1322_v33  ;;  %v3920_v7 = vpop.xlane.xlu0 %1638 }
 0x29b   :  { %5361 = vst [vmem:[#allocation134_spill] sm:$0xff] %v3918_v20  ;;  %5362 = vst [vmem:[#allocation135_spill] sm:$0xff] %v3920_v7 }
 0x29e   :  { %v3922_v46 = vpop.xlane.xlu1 %1308  ;;  %v3924_v29 = vpop.xlane.xlu0 %1641 }
 0x29f   :  { %5363 = vst [vmem:[#allocation136_spill] sm:$0xff] %v3922_v46  ;;  %5364 = vst [vmem:[#allocation137_spill] sm:$0xff] %v3924_v29 }
 0x2a2   :  { %v3926_v12 = vpop.xlane.xlu1 %1311  ;;  %v3928_v25 = vpop.xlane.xlu0 %1644 }
 0x2a3   :  { %5365 = vst [vmem:[#allocation138_spill] sm:$0xff] %v3926_v12  ;;  %5366 = vst [vmem:[#allocation139_spill] sm:$0xff] %v3928_v25  ;;  %v2397_v25 = vld [vmem:[%s5111_s0 + $0xf0] sm:$0xff] }
 0x2a6   :  { %v3930_v40 = vpop.xlane.xlu1 %1314  ;;  %v3932_v21 = vpop.xlane.xlu0 %1647 }
 0x2a7   :  { %5367 = vst [vmem:[#allocation140_spill] sm:$0xff] %v3930_v40  ;;  %5368 = vst [vmem:[#allocation141_spill] sm:$0xff] %v3932_v21 }
 0x2aa   :  { %v3934_v36 = vpop.xlane.xlu1 %1317 }
 0x2ab   :  { %5369 = vst [vmem:[#allocation142_spill] sm:$0xff] %v3934_v36 }
 0x2ae   :  { %v3936_v1 = vpop.xlane.xlu1 %1320  ;;  %v1010_v20 = vpop.permute.xlu0 %1009 }
 0x2af   :  { %5370 = vst [vmem:[#allocation143_spill] sm:$0xff] %v3936_v1  ;;  %vm1138_vm1 = vcmp.eq.s32.totalorder %v3444_v24, %v1010_v20  ;;  %v2398_v1 = vld [vmem:[%s5111_s0 + $0xf8] sm:$0xff] }
 0x2b0   :  { %v1202_v36 = vsel %vm1138_vm1, %v2398_v1, 0.0 }
 0x2b1   :  { %v1328_v12 = vsel %vm144_vm0, %v1202_v36, 0.0  ;;  %v2400_v36 = vld [vmem:[%s5111_s0 + $0x100] sm:$0xff] }
 0x2b2   :  { %v1007_v33 = vpop.permute.xlu1 %1006  ;;  %v3938_v41 = vpop.permute.xlu0 %1015 }
 0x2b3   :  { %vm1137_vm2 = vcmp.eq.s32.totalorder %v3444_v24, %v1007_v33  ;;  %vm1140_vm7 = vcmp.eq.s32.totalorder %v3444_v24, %v3938_v41 }
 0x2b4   :  { %v1201_v29 = vsel %vm1137_vm2, %v2397_v25, 0.0  ;;  %v2399_v25 = vld [vmem:[%s5111_s0 + $0x118] sm:$0xff] }
 0x2b5   :  { %v1325_v21 = vsel %vm144_vm0, %v1201_v29, 0.0 }
 0x2b6   :  { %v1013_v7 = vpop.permute.xlu1 %1012  ;;  %1326 = vadd.xlane.f32.xlu1 %v1325_v21  ;;  %v3953_v40 = vpop.permute.xlu0 %1021  ;;  %v1528_v21 = vsel %vm1137_vm2, %v3451_v45, 0.0 }
 0x2b7   :  { %vm1142_vm3 = vcmp.eq.s32.totalorder %v3444_v24, %v3953_v40  ;;  %vm1139_vm4 = vcmp.eq.s32.totalorder %v3444_v24, %v1013_v7  ;;  %v1652_v23 = vsel %vm144_vm0, %v1528_v21, 0.0  ;;  %v2402_v21 = vld [vmem:[%s5111_s0 + $0x128] sm:$0xff] }
 0x2b8   :  { %v1206_v29 = vsel %vm1142_vm3, %v2399_v25, 0.0 }
 0x2b9   :  { %v1340_v46 = vsel %vm144_vm0, %v1206_v29, 0.0  ;;  %v1529_v29 = vsel %vm1138_vm1, %v3451_v45, 0.0 }
 0x2ba   :  { %v3965_v1 = vpop.permute.xlu1 %1018  ;;  %1329 = vadd.xlane.f32.xlu1 %v1328_v12  ;;  %1341 = vadd.xlane.f32.xlu0 %v1340_v46  ;;  %v3971_v30 = vpop.permute.xlu0 %1027  ;;  %v1203_v12 = vsel %vm1139_vm4, %v2400_v36, 0.0  ;;  %v2401_v46 = vld [vmem:[%s5111_s0 + $0x120] sm:$0xff] }
 0x2bb   :  { %vm1144_vm5 = vcmp.eq.s32.totalorder %v3444_v24, %v3971_v30  ;;  %v1331_v33 = vsel %vm144_vm0, %v1203_v12, 0.0  ;;  %v1655_v12 = vsel %vm144_vm0, %v1529_v29, 0.0  ;;  %vm1141_vm10 = vcmp.eq.s32.totalorder %v3444_v24, %v3965_v1 }
 0x2bc   :  { %v1208_v36 = vsel %vm1144_vm5, %v2402_v21, 0.0  ;;  %v1532_v49 = vsel %vm1141_vm10, %v3451_v45, 0.0  ;;  %v1535_v26 = vsel %vm1144_vm5, %v3451_v45, 0.0 }
 0x2bd   :  { %v1673_v30 = vsel %vm144_vm0, %v1535_v26, 0.0 }
 0x2be   :  { %v3974_v53 = vpop.permute.xlu1 %1024  ;;  %1653 = vadd.xlane.f32.xlu1 %v1652_v23  ;;  %v4008_v20 = vpop.permute.xlu0 %1033 }
 0x2bf   :  { %vm1143_vm6 = vcmp.eq.s32.totalorder %v3444_v24, %v3974_v53  ;;  %vm1146_vm9 = vcmp.eq.s32.totalorder %v3444_v24, %v4008_v20 }
 0x2c0   :  { %v1207_v23 = vsel %vm1143_vm6, %v2401_v46, 0.0  ;;  %v1346_v46 = vsel %vm144_vm0, %v1208_v36, 0.0  ;;  %v1534_v42 = vsel %vm1143_vm6, %v3451_v45, 0.0 }
 0x2c1   :  { %v1343_v25 = vsel %vm144_vm0, %v1207_v23, 0.0  ;;  %v2403_v23 = vld [vmem:[%s5111_s0 + $0x108] sm:$0xff]  ;;  %v1670_v53 = vsel %vm144_vm0, %v1534_v42, 0.0 }
 0x2c2   :  { %v4002_v16 = vpop.permute.xlu1 %1030  ;;  %1332 = vadd.xlane.f32.xlu1 %v1331_v33  ;;  %1344 = vadd.xlane.f32.xlu0 %v1343_v25  ;;  %v1204_v33 = vsel %vm1140_vm7, %v2403_v23, 0.0  ;;  %v2404_v25 = vld [vmem:[%s5111_s0 + $0x130] sm:$0xff]  ;;  %v1530_v23 = vsel %vm1139_vm4, %v3451_v45, 0.0 }
 0x2c3   :  { %vm1145_vm8 = vcmp.eq.s32.totalorder %v3444_v24, %v4002_v16  ;;  %v1334_v36 = vsel %vm144_vm0, %v1204_v33, 0.0  ;;  %v4043_v33 = vpop.permute.xlu0 %1039  ;;  %v1537_v16 = vsel %vm1146_vm9, %v3451_v45, 0.0 }
 0x2c4   :  { %v1209_v29 = vsel %vm1145_vm8, %v2404_v25, 0.0  ;;  %v1658_v25 = vsel %vm144_vm0, %v1530_v23, 0.0  ;;  %vm1148_vm12 = vcmp.eq.s32.totalorder %v3444_v24, %v4043_v33  ;;  %v1536_v35 = vsel %vm1145_vm8, %v3451_v45, 0.0 }
 0x2c5   :  { %v1349_v50 = vsel %vm144_vm0, %v1209_v29, 0.0 }
 0x2c6   :  { %1656 = vadd.xlane.f32.xlu1 %v1655_v12  ;;  %1347 = vadd.xlane.f32.xlu0 %v1346_v46  ;;  %v4026_v21 = vpop.permute.xlu1 %1036  ;;  %v2405_v12 = vld [vmem:[%s5111_s0 + $0x138] sm:$0xff] }
 0x2c7   :  { %v1210_v46 = vsel %vm1146_vm9, %v2405_v12, 0.0  ;;  %vm1147_vm11 = vcmp.eq.s32.totalorder %v3444_v24, %v4026_v21  ;;  %vm1818_vm9 = vcmask 7168  }
 0x2c8   :  { %v1352_v29 = vsel %vm144_vm0, %v1210_v46, 0.0 }
 0x2ca   :  { %1335 = vadd.xlane.f32.xlu1 %v1334_v36  ;;  %1350 = vadd.xlane.f32.xlu0 %v1349_v50  ;;  %v2406_v50 = vld [vmem:[%s5111_s0 + $0x110] sm:$0xff]  ;;  %v2407_v36 = vld [vmem:[%s5111_s0 + $0x140] sm:$0xff]  ;;  %v4061_v46 = vpop.permute.xlu1 %1042 }
 0x2cb   :  { %v1205_v7 = vsel %vm1141_vm10, %v2406_v50, 0.0  ;;  %v1211_v12 = vsel %vm1147_vm11, %v2407_v36, 0.0  ;;  %v2408_v50 = vld [vmem:[%s5111_s0 + $0x148] sm:$0xff]  ;;  %vm1149_vm13 = vcmp.eq.s32.totalorder %v3444_v24, %v4061_v46 }
 0x2cc   :  { %v1337_v23 = vsel %vm144_vm0, %v1205_v7, 0.0  ;;  %v1212_v36 = vsel %vm1148_vm12, %v2408_v50, 0.0  ;;  %v4077_v7 = vpop.permute.xlu0 %1045  ;;  %v1664_v50 = vsel %vm144_vm0, %v1532_v49, 0.0 }
 0x2cd   :  { %v1358_v41 = vsel %vm144_vm0, %v1212_v36, 0.0  ;;  %vm1150_vm14 = vcmp.eq.s32.totalorder %v3444_v24, %v4077_v7  ;;  %v1533_v36 = vsel %vm1142_vm3, %v3451_v45, 0.0 }
 0x2ce   :  { %1659 = vadd.xlane.f32.xlu1 %v1658_v25  ;;  %1353 = vadd.xlane.f32.xlu0 %v1352_v29  ;;  %v1355_v25 = vsel %vm144_vm0, %v1211_v12, 0.0  ;;  %v1531_v29 = vsel %vm1140_vm7, %v3451_v45, 0.0  ;;  %v1667_v40 = vsel %vm144_vm0, %v1533_v36, 0.0 }
 0x2cf   :  { %v1661_v12 = vsel %vm144_vm0, %v1531_v29, 0.0  ;;  %v4093_v29 = vpop.permute.xlu1 %1048 }
 0x2d0   :  { %vm1151_vm15 = vcmp.eq.s32.totalorder %v3444_v24, %v4093_v29  ;;  %v4113_v43 = vpop.permute.xlu0 %1051 }
 0x2d1   :  { %v1215_v58 = vsel %vm1151_vm15, %v2411_v28, 0.0  ;;  %vm1152_vm1 = vcmp.eq.s32.totalorder %v3444_v24, %v4113_v43 }
 0x2d2   :  { %1338 = vadd.xlane.f32.xlu1 %v1337_v23  ;;  %1356 = vadd.xlane.f32.xlu0 %v1355_v25  ;;  %v2409_v23 = vld [vmem:[%s5111_s0 + $0x150] sm:$0xff]  ;;  %v1367_v49 = vsel %vm144_vm0, %v1215_v58, 0.0  ;;  %v1679_v58 = vsel %vm144_vm0, %v1537_v16, 0.0 }
 0x2d3   :  { %v1213_v25 = vsel %vm1149_vm13, %v2409_v23, 0.0  ;;  %v4133_v62 = vpop.permute.xlu1 %1054  ;;  %v2412_v23 = vld [vmem:[%s5111_s0 + $0x168] sm:$0xff] }
 0x2d4   :  { %v1361_v1 = vsel %vm144_vm0, %v1213_v25, 0.0  ;;  %v1216_v51 = vsel %vm1152_vm1, %v2412_v23, 0.0  ;;  %vm1153_vm2 = vcmp.eq.s32.totalorder %v3444_v24, %v4133_v62  ;;  %v4153_v18 = vpop.permute.xlu0 %1057  ;;  %v2240_v25 = vpop.eup %2239  ;;  %2271 = vlog2.f32 %v3300_v19  ;;  %v2415_v19 = vld [vmem:[%s5111_s0 + $0x180] sm:$0xff]  ;;  %v5383_v62 = vld [vmem:[#allocation13_spill] sm:$0xff] }
 0x2d5   :  { %v1370_v34 = vsel %vm144_vm0, %v1216_v51, 0.0  ;;  %v2242_v6 = vpop.eup %2241  ;;  %vm1154_vm3 = vcmp.eq.s32.totalorder %v3444_v24, %v4153_v18  ;;  %v722_v20 = vmul.f32 0.6931472, %v2240_v25  ;;  %2273 = vlog2.f32 %v3308_v60  ;;  %v4204_v60 = vld [vmem:[%s5113_s2] ss:$0 sm:$0xff] }
 0x2d6   :  { %1662 = vadd.xlane.f32.xlu1 %v1661_v12  ;;  %1359 = vadd.xlane.f32.xlu0 %v1358_v41  ;;  %v2410_v12 = vld [vmem:[%s5111_s0 + $0x158] sm:$0xff]  ;;  %v2244_v10 = vpop.eup %2243  ;;  %v1218_v3 = vsel %vm1154_vm3, %v2414_v27, 0.0  ;;  %v724_v26 = vmul.f32 0.6931472, %v2242_v6  ;;  %v1538_v51 = vsel %vm1147_vm11, %v4204_v60, 0.0  ;;  %2275 = vlog2.f32 %v3310_v11 }
 0x2d7   :  { %v1214_v41 = vsel %vm1150_vm14, %v2410_v12, 0.0  ;;  %v2246_v36 = vpop.eup %2245  ;;  %v1676_v12 = vsel %vm144_vm0, %v1536_v35, 0.0  ;;  %v1682_v21 = vsel %vm144_vm0, %v1538_v51, 0.0  ;;  %2277 = vlog2.f32 %v3318_v56 }
 0x2d8   :  { %v1364_v22 = vsel %vm144_vm0, %v1214_v41, 0.0  ;;  %v4190_v28 = vpop.permute.xlu0 %1063  ;;  %v728_v25 = vmul.f32 0.6931472, %v2246_v36  ;;  %v4221_v11 = vadd.f32 %v724_v26, %v2914_v39  ;;  %v1540_v56 = vsel %vm1149_vm13, %v4204_v60, 0.0 }
 0x2d9   :  { %vm1156_vm5 = vcmp.eq.s32.totalorder %v3444_v24, %v4190_v28 }
 0x2da   :  { %1665 = vadd.xlane.f32.xlu1 %v1664_v50  ;;  %1362 = vadd.xlane.f32.xlu0 %v1361_v1  ;;  %v1217_v50 = vsel %vm1153_vm2, %v2413_v59, 0.0  ;;  %v4173_v1 = vpop.permute.xlu1 %1060 }
 0x2db   :  { %v1373_v41 = vsel %vm144_vm0, %v1217_v50, 0.0  ;;  %vm1155_vm4 = vcmp.eq.s32.totalorder %v3444_v24, %v4173_v1 }
 0x2dc   :  { %v1219_v23 = vsel %vm1155_vm4, %v2415_v19, 0.0 }
 0x2dd   :  { %v1379_v27 = vsel %vm144_vm0, %v1219_v23, 0.0 }
 0x2de   :  { %1668 = vadd.xlane.f32.xlu1 %v1667_v40  ;;  %1365 = vadd.xlane.f32.xlu0 %v1364_v22  ;;  %v2248_v40 = vpop.eup %2247  ;;  %v4213_v6 = vpop.permute.xlu1 %1066  ;;  %2279 = vlog2.f32 %v3320_v4 }
 0x2df   :  { %v2250_v22 = vpop.eup %2249  ;;  %v730_v50 = vmul.f32 0.6931472, %v2248_v40  ;;  %v1539_v40 = vsel %vm1148_vm12, %v4204_v60, 0.0  ;;  %vm1157_vm6 = vcmp.eq.s32.totalorder %v3444_v24, %v4213_v6  ;;  %2281 = vlog2.f32 %v3328_v52 }
 0x2e0   :  { %v2252_v42 = vpop.eup %2251  ;;  %v732_v35 = vmul.f32 0.6931472, %v2250_v22  ;;  %2283 = vlog2.f32 %v3330_v61 }
 0x2e1   :  { %v2254_v45 = vpop.eup %2253  ;;  %v734_v36 = vmul.f32 0.6931472, %v2252_v42  ;;  %v4243_v26 = vadd.f32 %v730_v50, %v2922_v0  ;;  %v2418_v0 = vld [vmem:[%s5111_s0 + $0x190] sm:$0xff]  ;;  %2285 = vlog2.f32 %v3338_v48  ;;  %v1428_v48 = vsub.f32 %v4221_v11, %v3727_v37 }
 0x2e2   :  { %1671 = vadd.xlane.f32.xlu1 %v1670_v53  ;;  %1368 = vadd.xlane.f32.xlu0 %v1367_v49  ;;  %v1376_v53 = vsel %vm144_vm0, %v1218_v3, 0.0  ;;  %v2256_v49 = vpop.eup %2255  ;;  %v2417_v3 = vld [vmem:[%s5111_s0 + $0x188] sm:$0xff]  ;;  %v736_v42 = vmul.f32 0.6931472, %v2254_v45  ;;  %v4246_v19 = vadd.f32 %v732_v35, %v2924_v14  ;;  %v4248_v45 = vpop.permute.xlu0 %1069  ;;  %v1221_v14 = vsel %vm1157_vm6, %v2418_v0, 0.0  ;;  %v5376_v0 = vld [vmem:[#allocation12_spill] sm:$0xff] }
 0x2e3   :  { %v1220_v22 = vsel %vm1156_vm5, %v2417_v3, 0.0  ;;  %vm1158_vm7 = vcmp.eq.s32.totalorder %v3444_v24, %v4248_v45  ;;  %2287 = vlog2.f32 %v3340_v57  ;;  %v1542_v57 = vsel %vm1151_vm15, %v4204_v60, 0.0 }
 0x2e6   :  { %1674 = vadd.xlane.f32.xlu1 %v1673_v30  ;;  %1371 = vadd.xlane.f32.xlu0 %v1370_v34  ;;  %v2258_v30 = vpop.eup %2257  ;;  %v726_v34 = vmul.f32 0.6931472, %v2244_v10  ;;  %2289 = vlog2.f32 %v3348_v44 }
 0x2e7   :  { %v2260_v59 = vpop.eup %2259  ;;  %v740_v23 = vmul.f32 0.6931472, %v2258_v30  ;;  %2291 = vlog2.f32 %v5376_v0 }
 0x2e8   :  { %v4234_v39 = vadd.f32 %v726_v34, %v2908_v15  ;;  %v742_v51 = vmul.f32 0.6931472, %v2260_v59  ;;  %v1382_v34 = vsel %vm144_vm0, %v1220_v22, 0.0  ;;  %v4267_v59 = vadd.f32 %v736_v42, %v2932_v5 }
 0x2e9   :  { %v4277_v46 = vadd.f32 %v740_v23, %v2940_v9  ;;  %v1688_v5 = vsel %vm144_vm0, %v1540_v56, 0.0  ;;  %v2419_v9 = vld [vmem:[%s5111_s0 + $0x198] sm:$0xff]  ;;  %v1543_v56 = vsel %vm1152_vm1, %v4204_v60, 0.0 }
 0x2ea   :  { %1677 = vadd.xlane.f32.xlu1 %v1676_v12  ;;  %1374 = vadd.xlane.f32.xlu0 %v1373_v41  ;;  %v2262_v12 = vpop.eup %2261  ;;  %v5371_v41 = vld [vmem:[#allocation14_spill] sm:$0xff]  ;;  %v4280_v4 = vadd.f32 %v742_v51, %v2947_v2  ;;  %v1222_v2 = vsel %vm1158_vm7, %v2419_v9, 0.0  ;;  %2293 = vlog2.f32 %v5383_v62 }
 0x2eb   :  { %v4216_v16 = vadd.f32 %v722_v20, %v5371_v41  ;;  %v2264_v10 = vpop.eup %2263  ;;  %v5372_v41 = vld [vmem:[#allocation15_spill] sm:$0xff] }
 0x2ec   :  { %v2266_v20 = vpop.eup %2265  ;;  %v746_v30 = vmul.f32 0.6931472, %v2264_v10  ;;  %v1385_v10 = vsel %vm144_vm0, %v1221_v14, 0.0  ;;  %v1958_v14 = vsel %vm1818_vm9, %v3737_v8, 0.0 }
 0x2ed   :  { %v2268_v33 = vpop.eup %2267  ;;  %v748_v35 = vmul.f32 0.6931472, %v2266_v20 }
 0x2ee   :  { %1680 = vadd.xlane.f32.xlu1 %v1679_v58  ;;  %1377 = vadd.xlane.f32.xlu0 %v1376_v53  ;;  %v4237_v58 = vadd.f32 %v728_v25, %v2916_v47  ;;  %v738_v53 = vmul.f32 0.6931472, %v2256_v49  ;;  %v2270_v15 = vpop.eup %2269  ;;  %v1685_v47 = vsel %vm144_vm0, %v1539_v40, 0.0  ;;  %v744_v25 = vmul.f32 0.6931472, %v2262_v12 }
 0x2ef   :  { %v4253_v49 = vadd.f32 %v734_v36, %v5372_v41  ;;  %v2272_v50 = vpop.eup %2271  ;;  %v750_v12 = vmul.f32 0.6931472, %v2268_v33  ;;  %v4274_v36 = vpop.permute.xlu1 %1072  ;;  %v4306_v7 = vadd.f32 %v748_v35, %v2959_v55  ;;  %v1427_v55 = vsub.f32 %v4216_v16, %v3729_v32  ;;  %v5373_v16 = vld [vmem:[#allocation91_spill] sm:$0xff] }
 0x2f0   :  { %v2274_v40 = vpop.eup %2273  ;;  %v4286_v3 = vadd.f32 %v744_v25, %v2949_v31  ;;  %v754_v22 = vmul.f32 0.6931472, %v2272_v50  ;;  %v4300_v31 = vadd.f32 %v746_v30, %v2957_v13  ;;  %vm1159_vm8 = vcmp.eq.s32.totalorder %v3444_v24, %v4274_v36  ;;  %v4314_v33 = vpop.permute.xlu0 %1075  ;;  %v5377_v50 = vld [vmem:[#allocation89_spill] sm:$0xff] }
 0x2f1   :  { %v2276_v52 = vpop.eup %2275  ;;  %v4309_v20 = vadd.f32 %v750_v12, %v2967_v54  ;;  %v756_v61 = vmul.f32 0.6931472, %v2274_v40  ;;  %v2420_v54 = vld [vmem:[%s5111_s0 + $0x1a0] sm:$0xff]  ;;  %vm1160_vm10 = vcmp.eq.s32.totalorder %v3444_v24, %v4314_v33  ;;  %v1755_v32 = vmul.f32 %v3737_v8, %v1428_v48  ;;  %v5378_v8 = vld [vmem:[#allocation17_spill] sm:$0xff] }
 0x2f2   :  { %1683 = vadd.xlane.f32.xlu1 %v1682_v21  ;;  %1380 = vadd.xlane.f32.xlu0 %v1379_v27  ;;  %v752_v21 = vmul.f32 0.6931472, %v2270_v15  ;;  %v4272_v27 = vadd.f32 %v738_v53, %v2938_v63  ;;  %v1541_v63 = vsel %vm1150_vm14, %v4204_v60, 0.0  ;;  %v1388_v53 = vsel %vm144_vm0, %v1222_v2, 0.0  ;;  %v2278_v29 = vpop.eup %2277 }
 0x2f3   :  { %v1691_v13 = vsel %vm144_vm0, %v1541_v63, 0.0  ;;  %v758_v15 = vmul.f32 0.6931472, %v2276_v52  ;;  %v4334_v37 = vadd.f32 %v754_v22, %v2977_v17  ;;  %v1754_v11 = vmul.f32 %v5373_v16, %v1427_v55  ;;  %v4343_v51 = vpop.permute.xlu1 %1078  ;;  %v5375_v17 = vld [vmem:[#allocation16_spill] sm:$0xff]  ;;  %v2280_v43 = vpop.eup %2279  ;;  %v5379_v63 = vld [vmem:[#allocation95_spill] sm:$0xff]  ;;  %v5380_v22 = vld [vmem:[#allocation90_spill] sm:$0xff] }
 0x2f4   :  { %v4312_v42 = vadd.f32 %v752_v21, %v2969_v38  ;;  %v1223_v38 = vsel %vm1159_vm8, %v2420_v54, 0.0  ;;  %v1957_v23 = vsel %vm1818_vm9, %v5373_v16, 0.0  ;;  %v4348_v25 = vadd.f32 %v756_v61, %v5375_v17  ;;  %v4376_v2 = vpop.permute.xlu0 %1081  ;;  %v5381_v52 = vld [vmem:[#allocation92_spill] sm:$0xff]  ;;  %v5382_v55 = vld [vmem:[#allocation97_spill] sm:$0xff] }
 0x2f5   :  { %v1694_v41 = vsel %vm144_vm0, %v1542_v57, 0.0  ;;  %v1391_v44 = vsel %vm144_vm0, %v1223_v38, 0.0  ;;  %v1429_v35 = vsub.f32 %v4234_v39, %v5377_v50  ;;  %v1959_v12 = vadd.f32 %v1958_v14, %v1957_v23  ;;  %v2422_v38 = vld [vmem:[%s5111_s0 + $0x1b0] sm:$0xff] }
 0x2f6   :  { %1686 = vadd.xlane.f32.xlu1 %v1685_v47  ;;  %1383 = vadd.xlane.f32.xlu0 %v1382_v34  ;;  %v5374_v47 = vld [vmem:[#allocation93_spill] sm:$0xff]  ;;  %v4368_v21 = vadd.f32 %v758_v15, %v5378_v8  ;;  %vm1161_vm11 = vcmp.eq.s32.totalorder %v3444_v24, %v4343_v51  ;;  %v1819_v40 = vsel %vm1818_vm9, %v1754_v11, 0.0  ;;  %v1431_v9 = vsub.f32 %v4243_v26, %v5379_v63  ;;  %v2282_v15 = vpop.eup %2281  ;;  %v5387_v63 = vld [vmem:[#allocation18_spill] sm:$0xff] }
 0x2f7   :  { %v1430_v34 = vsub.f32 %v4237_v58, %v5374_v47  ;;  %v2421_v58 = vld [vmem:[%s5111_s0 + $0x1a8] sm:$0xff]  ;;  %v1756_v39 = vmul.f32 %v5380_v22, %v1429_v35  ;;  %v1960_v48 = vsel %vm1818_vm9, %v5380_v22, 0.0  ;;  %v1432_v54 = vsub.f32 %v4246_v19, %v5382_v55  ;;  %v2284_v19 = vpop.eup %2283  ;;  %v5386_v35 = vld [vmem:[#allocation96_spill] sm:$0xff]  ;;  %v2423_v8 = vld [vmem:[%s5111_s0 + $0x1b8] sm:$0xff] }
 0x2f8   :  { %v1224_v30 = vsel %vm1160_vm10, %v2421_v58, 0.0  ;;  %v1544_v26 = vsel %vm1153_vm2, %v4204_v60, 0.0  ;;  %v1225_v57 = vsel %vm1161_vm11, %v2422_v38, 0.0  ;;  %v1961_v11 = vadd.f32 %v1960_v48, %v1959_v12  ;;  %v5390_v38 = vld [vmem:[#allocation53_spill] sm:$0xff]  ;;  %v5416_v51 = vld [vmem:[#allocation122_spill] sm:$0xff] }
 0x2f9   :  { %v1757_v61 = vmul.f32 %v5381_v52, %v1430_v34  ;;  %vm1162_vm12 = vcmp.eq.s32.totalorder %v3444_v24, %v4376_v2  ;;  %v1962_v23 = vsel %vm1818_vm9, %v5381_v52, 0.0  ;;  %v5385_v34 = vld [vmem:[#allocation99_spill] sm:$0xff]  ;;  %v1822_v0 = vsel %vm1818_vm9, %v1756_v39, 0.0  ;;  %v5388_v39 = vld [vmem:[#allocation98_spill] sm:$0xff]  ;;  %v5419_v2 = vld [vmem:[#allocation121_spill] sm:$0xff] }
 0x2fa   :  { %1689 = vadd.xlane.f32.xlu1 %v1688_v5  ;;  %1386 = vadd.xlane.f32.xlu0 %v1385_v10  ;;  %v760_v5 = vmul.f32 0.6931472, %v2278_v29  ;;  %v1820_v10 = vsel %vm1818_vm9, %v1755_v32, 0.0  ;;  %v762_v32 = vmul.f32 0.6931472, %v2280_v43  ;;  %v5384_v29 = vld [vmem:[#allocation94_spill] sm:$0xff]  ;;  %v1433_v17 = vsub.f32 %v4253_v49, %v5385_v34 }
 0x2fb   :  { %v1821_v16 = vadd.f32 %v1820_v10, %v1819_v40  ;;  %v1758_v47 = vmul.f32 %v5384_v29, %v1431_v9  ;;  %v1824_v14 = vsel %vm1818_vm9, %v1757_v61, 0.0  ;;  %v1397_v58 = vsel %vm144_vm0, %v1225_v57, 0.0  ;;  %v5389_v61 = vld [vmem:[#allocation101_spill] sm:$0xff] }
 0x2fc   :  { %v1964_v50 = vsel %vm1818_vm9, %v5384_v29, 0.0  ;;  %v1759_v12 = vmul.f32 %v5386_v35, %v1432_v54  ;;  %v1545_v49 = vsel %vm1154_vm3, %v4204_v60, 0.0  ;;  %v1226_v43 = vsel %vm1162_vm12, %v2423_v8, 0.0 }
 0x2fd   :  { %v1823_v10 = vadd.f32 %v1822_v0, %v1821_v16  ;;  %v1963_v40 = vadd.f32 %v1962_v23, %v1961_v11  ;;  %v4428_v9 = vadd.f32 %v760_v5, %v5387_v63  ;;  %v1826_v18 = vsel %vm1818_vm9, %v1758_v47, 0.0  ;;  %v5391_v47 = vld [vmem:[#allocation19_spill] sm:$0xff]  ;;  %v5392_v0 = vld [vmem:[#allocation100_spill] sm:$0xff] }
 0x2fe   :  { %1692 = vadd.xlane.f32.xlu1 %v1691_v13  ;;  %1389 = vadd.xlane.f32.xlu0 %v1388_v53  ;;  %v1697_v13 = vsel %vm144_vm0, %v1543_v56, 0.0  ;;  %v1394_v53 = vsel %vm144_vm0, %v1224_v30, 0.0  ;;  %v1700_v56 = vsel %vm144_vm0, %v1544_v26, 0.0  ;;  %v1966_v22 = vsel %vm1818_vm9, %v5386_v35, 0.0 }
 0x2ff   :  { %v1760_v52 = vmul.f32 %v5388_v39, %v1433_v17  ;;  %v1825_v55 = vadd.f32 %v1824_v14, %v1823_v10  ;;  %v1965_v5 = vadd.f32 %v1964_v50, %v1963_v40  ;;  %v1703_v54 = vsel %vm144_vm0, %v1545_v49, 0.0  ;;  %v2425_v40 = vld [vmem:[%s5111_s0 + $0x1c8] sm:$0xff] }
 0x300   :  { %v1400_v26 = vsel %vm144_vm0, %v1226_v43, 0.0  ;;  %2295 = vlog2.f32 %v5390_v38  ;;  %v1828_v57 = vsel %vm1818_vm9, %v1759_v12, 0.0  ;;  %v1546_v16 = vsel %vm1155_vm4, %v4204_v60, 0.0  ;;  %v5394_v12 = vld [vmem:[#allocation105_spill] sm:$0xff] }
 0x301   :  { %v1827_v23 = vadd.f32 %v1826_v18, %v1825_v55  ;;  %v1967_v29 = vadd.f32 %v1966_v22, %v1965_v5  ;;  %v4459_v34 = vadd.f32 %v762_v32, %v5391_v47  ;;  %v1968_v1 = vsel %vm1818_vm9, %v5388_v39, 0.0  ;;  %v5395_v22 = vld [vmem:[#allocation102_spill] sm:$0xff] }
 0x302   :  { %1695 = vadd.xlane.f32.xlu1 %v1694_v41  ;;  %1392 = vadd.xlane.f32.xlu0 %v1391_v44  ;;  %v4404_v41 = vpop.permute.xlu1 %1084  ;;  %v4406_v44 = vpop.eup %2285  ;;  %v1830_v17 = vsel %vm1818_vm9, %v1760_v52, 0.0  ;;  %v1436_v32 = vsub.f32 %v4277_v46, %v5394_v12  ;;  %v1706_v49 = vsel %vm144_vm0, %v1546_v16, 0.0  ;;  %v4475_v43 = vmul.f32 0.6931472, %v2282_v15  ;;  %v5399_v47 = vld [vmem:[#allocation54_spill] sm:$0xff] }
 0x303   :  { %v4412_v30 = vpop.eup %2287  ;;  %vm1163_vm13 = vcmp.eq.s32.totalorder %v3444_v24, %v4404_v41  ;;  %v1829_v35 = vadd.f32 %v1828_v57, %v1827_v23  ;;  %v1970_v10 = vsel %vm1818_vm9, %v5392_v0, 0.0  ;;  %v4489_v15 = vmul.f32 0.6931472, %v2284_v19  ;;  %v2426_v23 = vld [vmem:[%s5111_s0 + $0x1d0] sm:$0xff]  ;;  %v5425_v41 = vld [vmem:[#allocation22_spill] sm:$0xff] }
 0x304   :  { %v4440_v48 = vpop.eup %2289  ;;  %v1969_v63 = vadd.f32 %v1968_v1, %v1967_v29  ;;  %v1972_v39 = vsel %vm1818_vm9, %v5395_v22, 0.0  ;;  %2297 = vlog2.f32 %v5399_v47 }
 0x305   :  { %v4456_v62 = vpop.eup %2291  ;;  %v1831_v18 = vadd.f32 %v1830_v17, %v1829_v35 }
 0x306   :  { %1698 = vadd.xlane.f32.xlu1 %v1697_v13  ;;  %1395 = vadd.xlane.f32.xlu0 %v1394_v53  ;;  %v1434_v13 = vsub.f32 %v4267_v59, %v5389_v61  ;;  %v4438_v53 = vpop.permute.xlu0 %1087  ;;  %v2424_v59 = vld [vmem:[%s5111_s0 + $0x1c0] sm:$0xff]  ;;  %v4469_v50 = vpop.permute.xlu1 %1090  ;;  %v5396_v61 = vld [vmem:[#allocation107_spill] sm:$0xff]  ;;  %v1971_v19 = vadd.f32 %v1970_v10, %v1969_v63  ;;  %v5402_v10 = vld [vmem:[#allocation108_spill] sm:$0xff] }
 0x307   :  { %v1227_v11 = vsel %vm1163_vm13, %v2424_v59, 0.0  ;;  %vm1164_vm14 = vcmp.eq.s32.totalorder %v3444_v24, %v4438_v53  ;;  %vm1165_vm15 = vcmp.eq.s32.totalorder %v3444_v24, %v4469_v50  ;;  %v4501_v5 = vpop.eup %2293  ;;  %v5398_v59 = vld [vmem:[#allocation109_spill] sm:$0xff] }
 0x308   :  { %v1761_v14 = vmul.f32 %v5392_v0, %v1434_v13  ;;  %v1403_v8 = vsel %vm144_vm0, %v1227_v11, 0.0  ;;  %v1228_v46 = vsel %vm1164_vm14, %v2425_v40, 0.0  ;;  %v1437_v13 = vsub.f32 %v4280_v4, %v5396_v61  ;;  %v5404_v61 = vld [vmem:[#allocation110_spill] sm:$0xff] }
 0x309   :  { %v1406_v57 = vsel %vm144_vm0, %v1228_v46, 0.0  ;;  %v1438_v11 = vsub.f32 %v4286_v3, %v5398_v59  ;;  %v1548_v4 = vsel %vm1157_vm6, %v4204_v60, 0.0  ;;  %v1229_v29 = vsel %vm1165_vm15, %v2426_v23, 0.0  ;;  %v5400_v3 = vld [vmem:[#allocation106_spill] sm:$0xff] }
 0x30a   :  { %1701 = vadd.xlane.f32.xlu1 %v1700_v56  ;;  %1398 = vadd.xlane.f32.xlu0 %v1397_v58  ;;  %v5393_v56 = vld [vmem:[#allocation103_spill] sm:$0xff]  ;;  %v1832_v28 = vsel %vm1818_vm9, %v1761_v14, 0.0  ;;  %v4499_v55 = vpop.permute.xlu0 %1093  ;;  %v1973_v17 = vadd.f32 %v1972_v39, %v1971_v19  ;;  %v1976_v0 = vsel %vm1818_vm9, %v5400_v3, 0.0  ;;  %v1764_v14 = vmul.f32 %v5400_v3, %v1437_v13  ;;  %v4529_v35 = vpop.permute.xlu1 %1096  ;;  %v5403_v39 = vld [vmem:[#allocation113_spill] sm:$0xff]  ;;  %v5407_v3 = vld [vmem:[#allocation114_spill] sm:$0xff] }
 0x30b   :  { %v1435_v58 = vsub.f32 %v4272_v27, %v5393_v56  ;;  %v1547_v27 = vsel %vm1156_vm5, %v4204_v60, 0.0  ;;  %v1833_v1 = vadd.f32 %v1832_v28, %v1831_v18  ;;  %vm1166_vm1 = vcmp.eq.s32.totalorder %v3444_v24, %v4499_v55  ;;  %v5401_v56 = vld [vmem:[#allocation111_spill] sm:$0xff] }
 0x30c   :  { %v1709_v38 = vsel %vm144_vm0, %v1547_v27, 0.0  ;;  %v1978_v27 = vsel %vm1818_vm9, %v5402_v10, 0.0  ;;  %v1765_v40 = vmul.f32 %v5402_v10, %v1438_v11  ;;  %v1549_v46 = vsel %vm1158_vm7, %v4204_v60, 0.0 }
 0x30d   :  { %v1762_v52 = vmul.f32 %v5395_v22, %v1435_v58  ;;  %v1439_v58 = vsub.f32 %v4300_v31, %v5401_v56  ;;  %v2427_v31 = vld [vmem:[%s5111_s0 + $0x1d8] sm:$0xff]  ;;  %v4547_v18 = vpop.eup %2295  ;;  %vm1167_vm2 = vcmp.eq.s32.totalorder %v3444_v24, %v4529_v35  ;;  %v1838_v45 = vsel %vm1818_vm9, %v1764_v14, 0.0  ;;  %v5408_v56 = vld [vmem:[#allocation20_spill] sm:$0xff] }
 0x30e   :  { %1704 = vadd.xlane.f32.xlu1 %v1703_v54  ;;  %1401 = vadd.xlane.f32.xlu0 %v1400_v26  ;;  %v5397_v54 = vld [vmem:[#allocation104_spill] sm:$0xff]  ;;  %v1230_v63 = vsel %vm1166_vm1, %v2427_v31, 0.0  ;;  %v1980_v13 = vsel %vm1818_vm9, %v5404_v61, 0.0  ;;  %v1715_v59 = vsel %vm144_vm0, %v1549_v46, 0.0  ;;  %v1840_v11 = vsel %vm1818_vm9, %v1765_v40, 0.0  ;;  %v5410_v46 = vld [vmem:[#allocation118_spill] sm:$0xff] }
 0x30f   :  { %v1763_v26 = vmul.f32 %v5397_v54, %v1436_v32  ;;  %v1974_v16 = vsel %vm1818_vm9, %v5397_v54, 0.0  ;;  %v1834_v6 = vsel %vm1818_vm9, %v1762_v52, 0.0  ;;  %v1440_v52 = vsub.f32 %v4306_v7, %v5403_v39  ;;  %v5405_v54 = vld [vmem:[#allocation115_spill] sm:$0xff] }
 0x310   :  { %v1975_v12 = vadd.f32 %v1974_v16, %v1973_v17  ;;  %v1835_v28 = vadd.f32 %v1834_v6, %v1833_v1  ;;  %v1766_v19 = vmul.f32 %v5404_v61, %v1439_v58  ;;  %v1412_v7 = vsel %vm144_vm0, %v1230_v63, 0.0  ;;  %v2429_v63 = vld [vmem:[%s5111_s0 + $0x1e8] sm:$0xff] }
 0x311   :  { %v1836_v32 = vsel %vm1818_vm9, %v1763_v26, 0.0  ;;  %v1441_v26 = vsub.f32 %v4309_v20, %v5405_v54  ;;  %v2428_v20 = vld [vmem:[%s5111_s0 + $0x1e0] sm:$0xff]  ;;  %v4585_v58 = vadd.f32 %v4475_v43, %v5408_v56  ;;  %v1986_v31 = vsel %vm1818_vm9, %v5410_v46, 0.0 }
 0x312   :  { %1707 = vadd.xlane.f32.xlu1 %v1706_v49  ;;  %1404 = vadd.xlane.f32.xlu0 %v1403_v8  ;;  %v1712_v49 = vsel %vm144_vm0, %v1548_v4, 0.0  ;;  %v1409_v8 = vsel %vm144_vm0, %v1229_v29, 0.0  ;;  %v1977_v22 = vadd.f32 %v1976_v0, %v1975_v12  ;;  %v5406_v4 = vld [vmem:[#allocation112_spill] sm:$0xff]  ;;  %v1550_v29 = vsel %vm1159_vm8, %v4204_v60, 0.0  ;;  %v4587_v12 = vpop.permute.xlu1 %1102 }
 0x313   :  { %v1982_v23 = vsel %vm1818_vm9, %v5406_v4, 0.0  ;;  %v1231_v47 = vsel %vm1167_vm2, %v2428_v20, 0.0  ;;  %v1767_v6 = vmul.f32 %v5406_v4, %v1440_v52  ;;  %v1842_v36 = vsel %vm1818_vm9, %v1766_v19, 0.0  ;;  %v4608_v52 = vpop.eup %2297  ;;  %v5412_v19 = vld [vmem:[#allocation120_spill] sm:$0xff] }
 0x314   :  { %v1979_v16 = vadd.f32 %v1978_v27, %v1977_v22  ;;  %v1984_v0 = vsel %vm1818_vm9, %v5407_v3, 0.0  ;;  %v1768_v14 = vmul.f32 %v5407_v3, %v1441_v26  ;;  %v1415_v10 = vsel %vm144_vm0, %v1231_v47, 0.0  ;;  %v5409_v27 = vld [vmem:[#allocation117_spill] sm:$0xff]  ;;  %v2430_v20 = vld [vmem:[%s5111_s0 + $0x1f0] sm:$0xff]  ;;  %v5415_v47 = vld [vmem:[#allocation55_spill] sm:$0xff] }
 0x315   :  { %v1442_v40 = vsub.f32 %v4312_v42, %v5409_v27  ;;  %v1551_v43 = vsel %vm1160_vm10, %v4204_v60, 0.0  ;;  %v1844_v42 = vsel %vm1818_vm9, %v1767_v6, 0.0  ;;  %vm1169_vm4 = vcmp.eq.s32.totalorder %v3444_v24, %v4587_v12 }
 0x316   :  { %1710 = vadd.xlane.f32.xlu1 %v1709_v38  ;;  %1407 = vadd.xlane.f32.xlu0 %v1406_v57  ;;  %v4559_v38 = vpop.permute.xlu0 %1099  ;;  %v1837_v57 = vadd.f32 %v1836_v32, %v1835_v28  ;;  %v1981_v17 = vadd.f32 %v1980_v13, %v1979_v16  ;;  %v1846_v33 = vsel %vm1818_vm9, %v1768_v14, 0.0  ;;  %v1988_v54 = vsel %vm1818_vm9, %v5412_v19, 0.0  ;;  %v5413_v16 = vld [vmem:[#allocation119_spill] sm:$0xff] }
 0x317   :  { %vm1168_vm3 = vcmp.eq.s32.totalorder %v3444_v24, %v4559_v38  ;;  %v1769_v13 = vmul.f32 %v5410_v46, %v1442_v40  ;;  %2299 = vlog2.f32 %v5415_v47  ;;  %v2431_v40 = vld [vmem:[%s5111_s0 + $0x1f8] sm:$0xff]  ;;  %v778_v53 = vmul.f32 0.6931472, %v4547_v18 }
 0x318   :  { %v1839_v1 = vadd.f32 %v1838_v45, %v1837_v57  ;;  %v1232_v28 = vsel %vm1168_vm3, %v2429_v63, 0.0  ;;  %v5411_v45 = vld [vmem:[#allocation116_spill] sm:$0xff] }
 0x319   :  { %v1443_v61 = vsub.f32 %v4334_v37, %v5411_v45  ;;  %v1552_v37 = vsel %vm1161_vm11, %v4204_v60, 0.0  ;;  %v1848_v6 = vsel %vm1818_vm9, %v1769_v13, 0.0  ;;  %v5420_v45 = vld [vmem:[#allocation128_spill] sm:$0xff] }
 0x31a   :  { %1713 = vadd.xlane.f32.xlu1 %v1712_v49  ;;  %1410 = vadd.xlane.f32.xlu0 %v1409_v8  ;;  %v1841_v32 = vadd.f32 %v1840_v11, %v1839_v1  ;;  %v1983_v49 = vadd.f32 %v1982_v23, %v1981_v17  ;;  %v1718_v8 = vsel %vm144_vm0, %v1550_v29, 0.0  ;;  %v1106_v26 = vpop.permute.xlu0 %1105  ;;  %v1418_v11 = vsel %vm144_vm0, %v1232_v28, 0.0  ;;  %v5414_v23 = vld [vmem:[#allocation124_spill] sm:$0xff]  ;;  %v5418_v28 = vld [vmem:[#allocation21_spill] sm:$0xff] }
 0x31b   :  { %v1770_v4 = vmul.f32 %v5412_v19, %v1443_v61  ;;  %v1990_v29 = vsel %vm1818_vm9, %v5414_v23, 0.0  ;;  %vm1170_vm5 = vcmp.eq.s32.totalorder %v3444_v24, %v1106_v26  ;;  %v1447_v61 = vsub.f32 %v4459_v34, %v5420_v45  ;;  %v5421_v19 = vld [vmem:[#allocation123_spill] sm:$0xff] }
 0x31c   :  { %v1843_v22 = vadd.f32 %v1842_v36, %v1841_v32  ;;  %v1985_v39 = vadd.f32 %v1984_v0, %v1983_v49  ;;  %v1445_v36 = vsub.f32 %v4368_v21, %v5416_v51  ;;  %v5417_v0 = vld [vmem:[#allocation126_spill] sm:$0xff]  ;;  %v1724_v49 = vsel %vm144_vm0, %v1552_v37, 0.0  ;;  %v5424_v37 = vld [vmem:[#allocation132_spill] sm:$0xff] }
 0x31d   :  { %v1992_v14 = vsel %vm1818_vm9, %v5417_v0, 0.0  ;;  %v1553_v21 = vsel %vm1162_vm12, %v4204_v60, 0.0  ;;  %v1234_v46 = vsel %vm1170_vm5, %v2431_v40, 0.0  ;;  %v1561_v34 = vsel %vm1170_vm5, %v4204_v60, 0.0 }
 0x31e   :  { %1716 = vadd.xlane.f32.xlu1 %v1715_v59  ;;  %1413 = vadd.xlane.f32.xlu0 %v1412_v7  ;;  %v1987_v57 = vadd.f32 %v1986_v31, %v1985_v39  ;;  %v1444_v59 = vsub.f32 %v4348_v25, %v5413_v16  ;;  %v1721_v7 = vsel %vm144_vm0, %v1551_v43, 0.0  ;;  %v1233_v25 = vsel %vm1169_vm4, %v2430_v20, 0.0  ;;  %v5422_v16 = vld [vmem:[#allocation130_spill] sm:$0xff] }
 0x31f   :  { %v1845_v1 = vadd.f32 %v1844_v42, %v1843_v22  ;;  %v1772_v27 = vmul.f32 %v5417_v0, %v1445_v36  ;;  %v768_v31 = vmul.f32 0.6931472, %v4406_v44  ;;  %v871_v22 = vadd.f32 %v4489_v15, %v5418_v28  ;;  %v5428_v36 = vld [vmem:[#allocation134_spill] sm:$0xff] }
 0x320   :  { %v1989_v17 = vadd.f32 %v1988_v54, %v1987_v57  ;;  %v1771_v3 = vmul.f32 %v5414_v23, %v1444_v59  ;;  %v770_v42 = vmul.f32 0.6931472, %v4412_v30  ;;  %v1446_v39 = vsub.f32 %v4428_v9, %v5419_v2  ;;  %v5433_v2 = vld [vmem:[#allocation131_spill] sm:$0xff] }
 0x321   :  { %v1847_v56 = vadd.f32 %v1846_v33, %v1845_v1  ;;  %v1994_v54 = vsel %vm1818_vm9, %v5421_v19, 0.0  ;;  %v1727_v44 = vsel %vm144_vm0, %v1553_v21, 0.0  ;;  %v1424_v57 = vsel %vm144_vm0, %v1234_v46, 0.0  ;;  %v5426_v1 = vld [vmem:[#allocation23_spill] sm:$0xff]  ;;  %v5431_v46 = vld [vmem:[#allocation129_spill] sm:$0xff] }
 0x322   :  { %1719 = vadd.xlane.f32.xlu1 %v1718_v8  ;;  %1416 = vadd.xlane.f32.xlu0 %v1415_v10  ;;  %v1991_v32 = vadd.f32 %v1990_v29, %v1989_v17  ;;  %v1421_v8 = vsel %vm144_vm0, %v1233_v25, 0.0  ;;  %v1850_v10 = vsel %vm1818_vm9, %v1770_v4, 0.0  ;;  %v1852_v33 = vsel %vm1818_vm9, %v1771_v3, 0.0 }
 0x323   :  { %v1849_v43 = vadd.f32 %v1848_v6, %v1847_v56  ;;  %v1854_v15 = vsel %vm1818_vm9, %v1772_v27, 0.0  ;;  %v1448_v30 = vsub.f32 %v4585_v58, %v5422_v16  ;;  %v1554_v9 = vsel %vm1163_vm13, %v4204_v60, 0.0  ;;  %v5423_v58 = vld [vmem:[#allocation125_spill] sm:$0xff] }
 0x324   :  { %v1993_v63 = vadd.f32 %v1992_v14, %v1991_v32  ;;  %v772_v59 = vmul.f32 0.6931472, %v4440_v48  ;;  %v1773_v23 = vmul.f32 %v5421_v19, %v1446_v39  ;;  %v1774_v29 = vmul.f32 %v5423_v58, %v1447_v61  ;;  %v5429_v32 = vld [vmem:[#allocation24_spill] sm:$0xff]  ;;  %v2300_v27 = vpop.eup %2299 }
 0x325   :  { %v1851_v13 = vadd.f32 %v1850_v10, %v1849_v43  ;;  %v1449_v20 = vsub.f32 %v871_v22, %v5424_v37  ;;  %v872_v25 = vadd.f32 %v768_v31, %v5425_v41  ;;  %v873_v26 = vadd.f32 %v770_v42, %v5426_v1  ;;  %v5432_v43 = vld [vmem:[#allocation136_spill] sm:$0xff]  ;;  %v5441_v37 = vld [vmem:[#allocation142_spill] sm:$0xff] }
 0x326   :  { %1722 = vadd.xlane.f32.xlu1 %v1721_v7  ;;  %1419 = vadd.xlane.f32.xlu0 %v1418_v11  ;;  %v774_v7 = vmul.f32 0.6931472, %v4456_v62  ;;  %v1995_v4 = vadd.f32 %v1994_v54, %v1993_v63  ;;  %v1730_v17 = vsel %vm144_vm0, %v1554_v9, 0.0  ;;  %v1751_v6 = vsel %vm144_vm0, %v1561_v34, 0.0  ;;  %v5427_v62 = vld [vmem:[#allocation127_spill] sm:$0xff]  ;;  %v5436_v54 = vld [vmem:[#allocation26_spill] sm:$0xff] }
 0x327   :  { %v1853_v11 = vadd.f32 %v1852_v33, %v1851_v13  ;;  %v1996_v48 = vsel %vm1818_vm9, %v5423_v58, 0.0  ;;  %v1775_v51 = vmul.f32 %v5427_v62, %v1448_v30  ;;  %v1450_v3 = vsub.f32 %v872_v25, %v5428_v36  ;;  %v5434_v33 = vld [vmem:[#allocation138_spill] sm:$0xff]  ;;  %v5435_v13 = vld [vmem:[#allocation56_spill] sm:$0xff]  ;;  %v5440_v58 = vld [vmem:[#allocation135_spill] sm:$0xff] }
 0x328   :  { %v1555_v0 = vsel %vm1164_vm14, %v4204_v60, 0.0  ;;  %v776_v14 = vmul.f32 0.6931472, %v4501_v5  ;;  %v1997_v56 = vadd.f32 %v1996_v48, %v1995_v4  ;;  %v1856_v21 = vsel %vm1818_vm9, %v1773_v23, 0.0  ;;  %v5438_v30 = vld [vmem:[#allocation140_spill] sm:$0xff] }
 0x329   :  { %v1855_v47 = vadd.f32 %v1854_v15, %v1853_v11  ;;  %v1858_v40 = vsel %vm1818_vm9, %v1774_v29, 0.0  ;;  %v1776_v31 = vmul.f32 %v5431_v46, %v1449_v20  ;;  %v1451_v63 = vsub.f32 %v873_v26, %v5432_v43  ;;  %v5437_v15 = vld [vmem:[#allocation133_spill] sm:$0xff] }
 0x32a   :  { %1725 = vadd.xlane.f32.xlu1 %v1724_v49  ;;  %1422 = vadd.xlane.f32.xlu0 %v1421_v8  ;;  %v874_v49 = vadd.f32 %v772_v59, %v5429_v32  ;;  %v5430_v8 = vld [vmem:[#allocation25_spill] sm:$0xff]  ;;  %v1998_v5 = vsel %vm1818_vm9, %v5427_v62, 0.0  ;;  %v1733_v22 = vsel %vm144_vm0, %v1555_v0, 0.0  ;;  %v1860_v42 = vsel %vm1818_vm9, %v1775_v51, 0.0  ;;  %v5444_v62 = vld [vmem:[#allocation28_spill] sm:$0xff] }
 0x32b   :  { %v875_v10 = vadd.f32 %v774_v7, %v5430_v8  ;;  %v1857_v28 = vadd.f32 %v1856_v21, %v1855_v47  ;;  %v1777_v39 = vmul.f32 %v5433_v2, %v1450_v3  ;;  %v1556_v61 = vsel %vm1165_vm15, %v4204_v60, 0.0  ;;  %v5439_v7 = vld [vmem:[#allocation27_spill] sm:$0xff]  ;;  %v1324_v47 = vpop.xlane.xlu1 %1323  ;;  %v5442_v26 = vld [vmem:[#allocation137_spill] sm:$0xff] }
 0x32c   :  { %v1452_v45 = vsub.f32 %v874_v49, %v5434_v33  ;;  %2301 = vlog2.f32 %v5435_v13  ;;  %v1999_v18 = vadd.f32 %v1998_v5, %v1997_v56  ;;  %v1778_v16 = vmul.f32 %v5437_v15, %v1451_v63  ;;  %v5446_v8 = vld [vmem:[#allocation57_spill] sm:$0xff]  ;;  %v1651_v5 = vpop.xlane.xlu0 %1650 }
 0x32d   :  { %v1859_v19 = vadd.f32 %v1858_v40, %v1857_v28  ;;  %v1453_v9 = vsub.f32 %v875_v10, %v5438_v30  ;;  %v780_v34 = vmul.f32 0.6931472, %v4608_v52  ;;  %v2000_v59 = vsel %vm1818_vm9, %v5431_v46, 0.0  ;;  %v5447_v43 = vld [vmem:[#allocation141_spill] sm:$0xff] }
 0x32e   :  { %1728 = vadd.xlane.f32.xlu1 %v1727_v44  ;;  %1425 = vadd.xlane.f32.xlu0 %v1424_v57  ;;  %v876_v44 = vadd.f32 %v776_v14, %v5436_v54  ;;  %v1862_v57 = vsel %vm1818_vm9, %v1776_v31, 0.0  ;;  %v877_v11 = vadd.f32 %v778_v53, %v5439_v7  ;;  %v1736_v4 = vsel %vm144_vm0, %v1556_v61, 0.0  ;;  %v5445_v14 = vld [vmem:[#allocation139_spill] sm:$0xff] }
 0x32f   :  { %v1861_v50 = vadd.f32 %v1860_v42, %v1859_v19  ;;  %v1864_v23 = vsel %vm1818_vm9, %v1777_v39, 0.0  ;;  %v1779_v29 = vmul.f32 %v5440_v58, %v1452_v45  ;;  %v1557_v41 = vsel %vm1166_vm1, %v4204_v60, 0.0  ;;  %v5448_v19 = vld [vmem:[#allocation29_spill] sm:$0xff] }
 0x330   :  { %v1454_v20 = vsub.f32 %v876_v44, %v5441_v37  ;;  %v2001_v52 = vadd.f32 %v2000_v59, %v1999_v18  ;;  %v1866_v1 = vsel %vm1818_vm9, %v1778_v16, 0.0  ;;  %v878_v51 = vadd.f32 %v780_v34, %v5444_v62 }
 0x331   :  { %v1863_v25 = vadd.f32 %v1862_v57, %v1861_v50  ;;  %v2002_v36 = vsel %vm1818_vm9, %v5433_v2, 0.0  ;;  %v1739_v0 = vsel %vm144_vm0, %v1557_v41, 0.0  ;;  %v1868_v55 = vsel %vm1818_vm9, %v1779_v29, 0.0 }
 0x332   :  { %1731 = vadd.xlane.f32.xlu1 %v1730_v17  ;;  %1752 = vadd.xlane.f32.xlu0 %v1751_v6  ;;  %v1780_v17 = vmul.f32 %v5442_v26, %v1453_v9  ;;  %v5443_v6 = vld [vmem:[#allocation143_spill] sm:$0xff]  ;;  %v1781_v56 = vmul.f32 %v5445_v14, %v1454_v20  ;;  %v1558_v32 = vsel %vm1167_vm2, %v4204_v60, 0.0  ;;  %v1456_v49 = vsub.f32 %v878_v51, %v1324_v47 }
 0x333   :  { %v1455_v48 = vsub.f32 %v877_v11, %v5443_v6  ;;  %v1865_v3 = vadd.f32 %v1864_v23, %v1863_v25  ;;  %2303 = vlog2.f32 %v5446_v8  ;;  %v2003_v10 = vadd.f32 %v2002_v36, %v2001_v52  ;;  %v5449_v11 = vld [vmem:[#allocation58_spill] sm:$0xff] }
 0x334   :  { %v2004_v46 = vsel %vm1818_vm9, %v5437_v15, 0.0  ;;  %v1870_v31 = vsel %vm1818_vm9, %v1780_v17, 0.0  ;;  %v782_v53 = vmul.f32 0.6931472, %v2300_v27  ;;  %v1742_v35 = vsel %vm144_vm0, %v1558_v32, 0.0 }
 0x335   :  { %v1867_v21 = vadd.f32 %v1866_v1, %v1865_v3  ;;  %v1782_v63 = vmul.f32 %v5447_v43, %v1455_v48  ;;  %v1872_v42 = vsel %vm1818_vm9, %v1781_v56, 0.0  ;;  %v1559_v2 = vsel %vm1168_vm3, %v4204_v60, 0.0  ;;  %v5450_v1 = vld [vmem:[#allocation30_spill] sm:$0xff] }
 0x336   :  { %1734 = vadd.xlane.f32.xlu1 %v1733_v22  ;;  %v2006_v22 = vsel %vm1818_vm9, %v5440_v58, 0.0  ;;  %v1783_v39 = vmul.f32 %v1651_v5, %v1456_v49  ;;  %v2005_v33 = vadd.f32 %v2004_v46, %v2003_v10  ;;  %v2008_v13 = vsel %vm1818_vm9, %v5442_v26, 0.0  ;;  %v5451_v10 = vld [vmem:[#allocation31_spill] sm:$0xff] }
 0x337   :  { %v1869_v28 = vadd.f32 %v1868_v55, %v1867_v21  ;;  %v1874_v18 = vsel %vm1818_vm9, %v1782_v63, 0.0  ;;  %v879_v54 = vadd.f32 %v782_v53, %v5448_v19  ;;  %v1745_v15 = vsel %vm144_vm0, %v1559_v2, 0.0 }
 0x338   :  { %v2007_v44 = vadd.f32 %v2006_v22, %v2005_v33  ;;  %v2010_v38 = vsel %vm1818_vm9, %v5445_v14, 0.0  ;;  %v1560_v16 = vsel %vm1169_vm4, %v4204_v60, 0.0  ;;  %v1876_v30 = vsel %vm1818_vm9, %v1783_v39, 0.0  ;;  %v5452_v39 = vld [vmem:[#allocation32_spill] sm:$0xff] }
 0x339   :  { %v1871_v45 = vadd.f32 %v1870_v31, %v1869_v28  ;;  %v2302_v27 = vpop.eup %2301  ;;  %2305 = vlog2.f32 %v5449_v11  ;;  %v1748_v24 = vsel %vm144_vm0, %v1560_v16, 0.0  ;;  %v2014_v60 = vsel %vm1818_vm9, %v1651_v5, 0.0 }
 0x33a   :  { %1737 = vadd.xlane.f32.xlu1 %v1736_v4  ;;  %v2009_v34 = vadd.f32 %v2008_v13, %v2007_v44  ;;  %v2012_v4 = vsel %vm1818_vm9, %v5447_v43, 0.0  ;;  %v784_v23 = vmul.f32 0.6931472, %v2302_v27 }
 0x33b   :  { %v1873_v57 = vadd.f32 %v1872_v42, %v1871_v45 }
 0x33c   :  { %v2011_v29 = vadd.f32 %v2010_v38, %v2009_v34  ;;  %v880_v26 = vadd.f32 %v784_v23, %v5450_v1 }
 0x33d   :  { %v1875_v59 = vadd.f32 %v1874_v18, %v1873_v57 }
 0x33e   :  { %1740 = vadd.xlane.f32.xlu1 %v1739_v0  ;;  %v2013_v20 = vadd.f32 %v2012_v4, %v2011_v29  ;;  %v5454_v29 = vld [vmem:[#allocation60_spill] sm:$0xff] }
 0x33f   :  { %v1327_v40 = vpop.xlane.xlu1 %1326  ;;  %v1877_v37 = vadd.f32 %v1876_v30, %v1875_v59 }
 0x340   :  { %v1457_v9 = vsub.f32 %v879_v54, %v1327_v40  ;;  %v2304_v47 = vpop.eup %2303  ;;  %v2015_v6 = vadd.f32 %v2014_v60, %v2013_v20  ;;  %v5457_v20 = vld [vmem:[#allocation63_spill] sm:$0xff] }
 0x341   :  { %v786_v3 = vmul.f32 0.6931472, %v2304_v47 }
 0x342   :  { %1743 = vadd.xlane.f32.xlu1 %v1742_v35 }
 0x343   :  { %v1330_v61 = vpop.xlane.xlu1 %1329  ;;  %v4767_v50 = vpop.xlane.xlu0 %1341  ;;  %v881_v21 = vadd.f32 %v786_v3, %v5451_v10  ;;  %v5465_v10 = vld [vmem:[#allocation71_spill] sm:$0xff] }
 0x344   :  { %v1458_v48 = vsub.f32 %v880_v26, %v1330_v61  ;;  %v5460_v26 = vld [vmem:[#allocation66_spill] sm:$0xff] }
 0x346   :  { %1746 = vadd.xlane.f32.xlu1 %v1745_v15  ;;  %v2306_v40 = vpop.eup %2305 }
 0x347   :  { %v1654_v7 = vpop.xlane.xlu1 %1653  ;;  %v788_v63 = vmul.f32 0.6931472, %v2306_v40 }
 0x348   :  { %v1784_v58 = vmul.f32 %v1654_v7, %v1457_v9  ;;  %v2016_v17 = vsel %vm1818_vm9, %v1654_v7, 0.0 }
 0x349   :  { %v2017_v62 = vadd.f32 %v2016_v17, %v2015_v6  ;;  %v882_v33 = vadd.f32 %v788_v63, %v5452_v39  ;;  %v5461_v17 = vld [vmem:[#allocation67_spill] sm:$0xff]  ;;  %v5462_v6 = vld [vmem:[#allocation68_spill] sm:$0xff] }
 0x34a   :  { %v1878_v12 = vsel %vm1818_vm9, %v1784_v58, 0.0  ;;  %1749 = vadd.xlane.f32.xlu1 %v1748_v24  ;;  %v5453_v58 = vld [vmem:[#allocation59_spill] sm:$0xff] }
 0x34b   :  { %v1879_v41 = vadd.f32 %v1878_v12, %v1877_v37  ;;  %v1333_v52 = vpop.xlane.xlu1 %1332  ;;  %v4775_v25 = vpop.xlane.xlu0 %1344  ;;  %2307 = vlog2.f32 %v5453_v58  ;;  %v5455_v37 = vld [vmem:[#allocation61_spill] sm:$0xff]  ;;  %v5456_v12 = vld [vmem:[#allocation62_spill] sm:$0xff] }
 0x34c   :  { %v1459_v46 = vsub.f32 %v881_v21, %v1333_v52  ;;  %2309 = vlog2.f32 %v5454_v29  ;;  %v5459_v52 = vld [vmem:[#allocation65_spill] sm:$0xff] }
 0x34d   :  { %2311 = vlog2.f32 %v5455_v37 }
 0x34e   :  { %2313 = vlog2.f32 %v5456_v12  ;;  %v5468_v12 = vld [vmem:[#allocation33_spill] sm:$0xff] }
 0x34f   :  { %v1657_v51 = vpop.xlane.xlu1 %1656  ;;  %v4779_v36 = vpop.xlane.xlu0 %1347  ;;  %2315 = vlog2.f32 %v5457_v20 }
 0x350   :  { %v1785_v0 = vmul.f32 %v1657_v51, %v1458_v48  ;;  %v2018_v55 = vsel %vm1818_vm9, %v1657_v51, 0.0  ;;  %v5463_v51 = vld [vmem:[#allocation69_spill] sm:$0xff] }
 0x351   :  { %v2019_v14 = vadd.f32 %v2018_v55, %v2017_v62  ;;  %v5464_v55 = vld [vmem:[#allocation70_spill] sm:$0xff] }
 0x352   :  { %v1880_v56 = vsel %vm1818_vm9, %v1785_v0, 0.0 }
 0x353   :  { %v1881_v32 = vadd.f32 %v1880_v56, %v1879_v41  ;;  %v1336_v49 = vpop.xlane.xlu1 %1335  ;;  %v4783_v8 = vpop.xlane.xlu0 %1350  ;;  %v5458_v41 = vld [vmem:[#allocation64_spill] sm:$0xff] }
 0x354   :  { %v1460_v45 = vsub.f32 %v882_v33, %v1336_v49  ;;  %2317 = vlog2.f32 %v5458_v41 }
 0x355   :  { %2319 = vlog2.f32 %v5459_v52 }
 0x356   :  { %2321 = vlog2.f32 %v5460_v26 }
 0x357   :  { %v1660_v31 = vpop.xlane.xlu1 %1659  ;;  %v4786_v43 = vpop.xlane.xlu0 %1353  ;;  %2323 = vlog2.f32 %v5461_v17 }
 0x358   :  { %v1786_v53 = vmul.f32 %v1660_v31, %v1459_v46  ;;  %v2020_v28 = vsel %vm1818_vm9, %v1660_v31, 0.0  ;;  %2325 = vlog2.f32 %v5462_v6  ;;  %v2308_v3 = vpop.eup %2307 }
 0x359   :  { %v4789_v5 = vadd.f32 %v2020_v28, %v2019_v14  ;;  %2327 = vlog2.f32 %v5463_v51  ;;  %v2310_v0 = vpop.eup %2309  ;;  %v5470_v51 = vld [vmem:[#allocation34_spill] sm:$0xff] }
 0x35a   :  { %v1882_v35 = vsel %vm1818_vm9, %v1786_v53, 0.0  ;;  %2329 = vlog2.f32 %v5464_v55  ;;  %v790_v53 = vmul.f32 0.6931472, %v2308_v3  ;;  %v792_v39 = vmul.f32 0.6931472, %v2310_v0  ;;  %v5471_v0 = vld [vmem:[#allocation35_spill] sm:$0xff] }
 0x35b   :  { %v1883_v22 = vadd.f32 %v1882_v35, %v1881_v32  ;;  %v4792_v42 = vpop.xlane.xlu1 %1338  ;;  %v4794_v2 = vpop.xlane.xlu0 %1356  ;;  %2331 = vlog2.f32 %v5465_v10  ;;  %v5466_v35 = vld [vmem:[#allocation72_spill] sm:$0xff] }
 0x35c   :  { %v2312_v32 = vpop.eup %2311  ;;  %2333 = vlog2.f32 %v5466_v35  ;;  %v883_v20 = vadd.f32 %v790_v53, %v5468_v12  ;;  %v884_v3 = vadd.f32 %v792_v39, %v5470_v51 }
 0x35d   :  { %v2314_v49 = vpop.eup %2313  ;;  %v794_v33 = vmul.f32 0.6931472, %v2312_v32  ;;  %v5472_v32 = vld [vmem:[#allocation36_spill] sm:$0xff] }
 0x35e   :  { %v2316_v21 = vpop.eup %2315  ;;  %v1461_v10 = vsub.f32 %v883_v20, %v4792_v42  ;;  %v1462_v12 = vsub.f32 %v884_v3, %v4767_v50  ;;  %v5477_v42 = vld [vmem:[#allocation75_spill] sm:$0xff]  ;;  %v5478_v20 = vld [vmem:[#allocation40_spill] sm:$0xff] }
 0x35f   :  { %v4797_v61 = vpop.xlane.xlu1 %1662  ;;  %v4799_v27 = vpop.xlane.xlu0 %1359  ;;  %v885_v55 = vadd.f32 %v794_v33, %v5471_v0 }
 0x360   :  { %v1787_v13 = vmul.f32 %v4797_v61, %v1460_v45  ;;  %v796_v45 = vmul.f32 0.6931472, %v2314_v49  ;;  %v2022_v33 = vsel %vm1818_vm9, %v4797_v61, 0.0 }
 0x361   :  { %v2318_v40 = vpop.eup %2317  ;;  %v1463_v50 = vsub.f32 %v885_v55, %v4775_v25  ;;  %v2023_v3 = vadd.f32 %v2022_v33, %v4789_v5 }
 0x362   :  { %v1884_v18 = vsel %vm1818_vm9, %v1787_v13, 0.0  ;;  %v2320_v63 = vpop.eup %2319  ;;  %v5467_v13 = vld [vmem:[#allocation73_spill] sm:$0xff]  ;;  %v800_v58 = vmul.f32 0.6931472, %v2318_v40  ;;  %v886_v49 = vadd.f32 %v796_v45, %v5472_v32  ;;  %v5480_v32 = vld [vmem:[#allocation76_spill] sm:$0xff] }
 0x363   :  { %v4803_v19 = vadd.f32 %v1884_v18, %v1883_v22  ;;  %v4805_v54 = vpop.xlane.xlu1 %1665  ;;  %v4807_v44 = vpop.xlane.xlu0 %1362  ;;  %2335 = vlog2.f32 %v5467_v13  ;;  %v798_v18 = vmul.f32 0.6931472, %v2316_v21  ;;  %v802_v41 = vmul.f32 0.6931472, %v2320_v63  ;;  %v5473_v21 = vld [vmem:[#allocation74_spill] sm:$0xff]  ;;  %v5474_v40 = vld [vmem:[#allocation37_spill] sm:$0xff] }
 0x364   :  { %v2322_v28 = vpop.eup %2321  ;;  %2337 = vlog2.f32 %v5473_v21  ;;  %v5475_v13 = vld [vmem:[#allocation38_spill] sm:$0xff]  ;;  %v1788_v45 = vmul.f32 %v4805_v54, %v1461_v10 }
 0x365   :  { %v2324_v22 = vpop.eup %2323  ;;  %v804_v52 = vmul.f32 0.6931472, %v2322_v28  ;;  %v887_v35 = vadd.f32 %v798_v18, %v5474_v40  ;;  %v888_v53 = vadd.f32 %v800_v58, %v5475_v13  ;;  %2339 = vlog2.f32 %v5477_v42  ;;  %v5479_v18 = vld [vmem:[#allocation41_spill] sm:$0xff]  ;;  %v5483_v13 = vld [vmem:[#allocation78_spill] sm:$0xff] }
 0x366   :  { %v2326_v37 = vpop.eup %2325  ;;  %v806_v26 = vmul.f32 0.6931472, %v2324_v22  ;;  %2341 = vlog2.f32 %v5480_v32  ;;  %v1464_v40 = vsub.f32 %v886_v49, %v4779_v36  ;;  %v1886_v25 = vsel %vm1818_vm9, %v1788_v45, 0.0  ;;  %v5486_v32 = vld [vmem:[#allocation44_spill] sm:$0xff] }
 0x367   :  { %v4809_v57 = vpop.xlane.xlu1 %1668  ;;  %v4811_v15 = vpop.xlane.xlu0 %1365  ;;  %v808_v63 = vmul.f32 0.6931472, %v2326_v37  ;;  %v4889_v51 = vadd.f32 %v804_v52, %v5478_v20  ;;  %v5482_v52 = vld [vmem:[#allocation42_spill] sm:$0xff]  ;;  %v1465_v42 = vsub.f32 %v887_v35, %v4783_v8  ;;  %v1887_v45 = vadd.f32 %v1886_v25, %v4803_v19 }
 0x368   :  { %v2328_v6 = vpop.eup %2327  ;;  %v4892_v58 = vadd.f32 %v806_v26, %v5479_v18  ;;  %v1789_v61 = vmul.f32 %v4809_v57, %v1462_v12  ;;  %v5484_v12 = vld [vmem:[#allocation43_spill] sm:$0xff]  ;;  %v1466_v8 = vsub.f32 %v888_v53, %v4786_v43 }
 0x369   :  { %v2330_v22 = vpop.eup %2329  ;;  %v810_v37 = vmul.f32 0.6931472, %v2328_v6  ;;  %v4902_v10 = vadd.f32 %v808_v63, %v5482_v52 }
 0x36a   :  { %v2332_v0 = vpop.eup %2331  ;;  %v812_v26 = vmul.f32 0.6931472, %v2330_v22  ;;  %v1888_v20 = vsel %vm1818_vm9, %v1789_v61, 0.0 }
 0x36b   :  { %v4813_v38 = vpop.xlane.xlu1 %1671  ;;  %v4815_v16 = vpop.xlane.xlu0 %1368  ;;  %v4915_v63 = vadd.f32 %v810_v37, %v5484_v12  ;;  %v814_v22 = vmul.f32 0.6931472, %v2332_v0  ;;  %v1889_v61 = vadd.f32 %v1888_v20, %v1887_v45  ;;  %v1469_v45 = vsub.f32 %v4892_v58, %v4807_v44 }
 0x36c   :  { %v1790_v55 = vmul.f32 %v4813_v38, %v1463_v50  ;;  %v2334_v33 = vpop.eup %2333  ;;  %v2028_v36 = vsel %vm1818_vm9, %v4813_v38, 0.0  ;;  %v4925_v50 = vadd.f32 %v812_v26, %v5486_v32  ;;  %v1470_v44 = vsub.f32 %v4902_v10, %v4811_v15 }
 0x36d   :  { %v816_v52 = vmul.f32 0.6931472, %v2334_v33  ;;  %v5489_v33 = vld [vmem:[#allocation81_spill] sm:$0xff] }
 0x36e   :  { %v1890_v35 = vsel %vm1818_vm9, %v1790_v55, 0.0 }
 0x36f   :  { %v4817_v30 = vpop.xlane.xlu1 %1674  ;;  %v4819_v9 = vpop.xlane.xlu0 %1371 }
 0x370   :  { %v1791_v49 = vmul.f32 %v4817_v30, %v1464_v40  ;;  %v2336_v0 = vpop.eup %2335  ;;  %v2030_v38 = vsel %vm1818_vm9, %v4817_v30, 0.0  ;;  %v5488_v30 = vld [vmem:[#allocation80_spill] sm:$0xff] }
 0x371   :  { %v2338_v12 = vpop.eup %2337 }
 0x372   :  { %v1892_v25 = vsel %vm1818_vm9, %v1791_v49, 0.0 }
 0x373   :  { %v4821_v34 = vpop.xlane.xlu1 %1677  ;;  %v4823_v59 = vpop.xlane.xlu0 %1374 }
 0x374   :  { %v2032_v43 = vsel %vm1818_vm9, %v4821_v34, 0.0 }
 0x377   :  { %v4825_v7 = vpop.xlane.xlu1 %1680  ;;  %v4827_v11 = vpop.xlane.xlu0 %1377 }
 0x378   :  { %v1793_v53 = vmul.f32 %v4825_v7, %v1466_v8  ;;  %v5491_v8 = vld [vmem:[#allocation47_spill] sm:$0xff] }
 0x37b   :  { %v4829_v4 = vpop.xlane.xlu1 %1683  ;;  %v4831_v23 = vpop.xlane.xlu0 %1380 }
 0x37f   :  { %v4836_v24 = vpop.xlane.xlu1 %1686  ;;  %v4838_v60 = vpop.xlane.xlu0 %1383 }
 0x383   :  { %v4844_v47 = vpop.xlane.xlu1 %1689  ;;  %v4846_v1 = vpop.xlane.xlu0 %1386 }
 0x384   :  { %v2040_v15 = vsel %vm1818_vm9, %v4844_v47, 0.0 }
 0x387   :  { %v4851_v48 = vpop.xlane.xlu1 %1692  ;;  %v4853_v62 = vpop.xlane.xlu0 %1389 }
 0x388   :  { %v1797_v10 = vmul.f32 %v4851_v48, %v1470_v44  ;;  %v5497_v44 = vld [vmem:[#allocation85_spill] sm:$0xff] }
 0x38b   :  { %v4857_v14 = vpop.xlane.xlu1 %1695  ;;  %v4859_v56 = vpop.xlane.xlu0 %1392 }
 0x38f   :  { %v4862_v46 = vpop.xlane.xlu1 %1698  ;;  %v4864_v31 = vpop.xlane.xlu0 %1395 }
 0x393   :  { %v4868_v29 = vpop.xlane.xlu1 %1701  ;;  %v4871_v17 = vpop.xlane.xlu0 %1398 }
 0x394   :  { %5469 = vst [vmem:[#allocation14_spill] sm:$0xff] %v4871_v17  ;;  %v5476_v17 = vld [vmem:[#allocation39_spill] sm:$0xff] }
 0x395   :  { %v889_v39 = vadd.f32 %v802_v41, %v5476_v17  ;;  %v2024_v41 = vsel %vm1818_vm9, %v4805_v54, 0.0  ;;  %v5481_v17 = vld [vmem:[#allocation77_spill] sm:$0xff]  ;;  %v2026_v54 = vsel %vm1818_vm9, %v4809_v57, 0.0  ;;  %v5485_v57 = vld [vmem:[#allocation79_spill] sm:$0xff] }
 0x396   :  { %2343 = vlog2.f32 %v5481_v17  ;;  %v2025_v5 = vadd.f32 %v2024_v41, %v2023_v3  ;;  %v1792_v41 = vmul.f32 %v4821_v34, %v1465_v42  ;;  %v5487_v3 = vld [vmem:[#allocation45_spill] sm:$0xff] }
 0x397   :  { %v4880_v28 = vpop.xlane.xlu1 %1704  ;;  %v4904_v21 = vpop.xlane.xlu0 %1401  ;;  %2345 = vlog2.f32 %v5483_v13  ;;  %v4935_v19 = vadd.f32 %v814_v22, %v5487_v3  ;;  %v1467_v40 = vsub.f32 %v889_v39, %v4794_v2  ;;  %v818_v13 = vmul.f32 0.6931472, %v2336_v0 }
 0x398   :  { %2347 = vlog2.f32 %v5485_v57  ;;  %v2027_v18 = vadd.f32 %v2026_v54, %v2025_v5  ;;  %v1891_v54 = vadd.f32 %v1890_v35, %v1889_v61  ;;  %v1468_v22 = vsub.f32 %v4889_v51, %v4799_v27  ;;  %v2340_v57 = vpop.eup %2339 }
 0x399   :  { %2349 = vlog2.f32 %v5488_v30  ;;  %v1894_v2 = vsel %vm1818_vm9, %v1792_v41, 0.0  ;;  %v2034_v39 = vsel %vm1818_vm9, %v4825_v7, 0.0  ;;  %v1794_v34 = vmul.f32 %v4829_v4, %v1467_v40 }
 0x39a   :  { %v2029_v17 = vadd.f32 %v2028_v36, %v2027_v18  ;;  %2351 = vlog2.f32 %v5489_v33  ;;  %v1893_v42 = vadd.f32 %v1892_v25, %v1891_v54  ;;  %v5490_v36 = vld [vmem:[#allocation46_spill] sm:$0xff]  ;;  %v1896_v27 = vsel %vm1818_vm9, %v1793_v53, 0.0  ;;  %v2342_v18 = vpop.eup %2341 }
 0x39b   :  { %v4906_v6 = vpop.xlane.xlu1 %1707  ;;  %v4937_v26 = vpop.xlane.xlu0 %1404  ;;  %v4955_v49 = vadd.f32 %v816_v52, %v5490_v36  ;;  %v2036_v51 = vsel %vm1818_vm9, %v4829_v4, 0.0  ;;  %v1795_v7 = vmul.f32 %v4836_v24, %v1468_v22  ;;  %v4964_v35 = vadd.f32 %v818_v13, %v5491_v8  ;;  %v5492_v52 = vld [vmem:[#allocation82_spill] sm:$0xff] }
 0x39c   :  { %v2031_v55 = vadd.f32 %v2030_v38, %v2029_v17  ;;  %v1895_v32 = vadd.f32 %v1894_v2, %v1893_v42  ;;  %v820_v38 = vmul.f32 0.6931472, %v2338_v12  ;;  %v1898_v58 = vsel %vm1818_vm9, %v1794_v34, 0.0  ;;  %v5494_v12 = vld [vmem:[#allocation48_spill] sm:$0xff] }
 0x39d   :  { %v2038_v4 = vsel %vm1818_vm9, %v4836_v24, 0.0  ;;  %v1796_v3 = vmul.f32 %v4844_v47, %v1469_v45  ;;  %2353 = vlog2.f32 %v5492_v52  ;;  %v1471_v30 = vsub.f32 %v4915_v63, %v4815_v16 }
 0x39e   :  { %v2033_v20 = vadd.f32 %v2032_v43, %v2031_v55  ;;  %v1897_v40 = vadd.f32 %v1896_v27, %v1895_v32  ;;  %v822_v43 = vmul.f32 0.6931472, %v2340_v57  ;;  %v1900_v54 = vsel %vm1818_vm9, %v1795_v7, 0.0  ;;  %v5493_v55 = vld [vmem:[#allocation83_spill] sm:$0xff] }
 0x39f   :  { %v4927_v37 = vpop.xlane.xlu1 %1710  ;;  %v4966_v41 = vpop.xlane.xlu0 %1407  ;;  %2355 = vlog2.f32 %v5493_v55  ;;  %v898_v22 = vadd.f32 %v820_v38, %v5494_v12  ;;  %v1472_v34 = vsub.f32 %v4925_v50, %v4819_v9  ;;  %v1902_v16 = vsel %vm1818_vm9, %v1796_v3, 0.0 }
 0x3a0   :  { %v2035_v0 = vadd.f32 %v2034_v39, %v2033_v20  ;;  %v1899_v24 = vadd.f32 %v1898_v58, %v1897_v40  ;;  %v2042_v63 = vsel %vm1818_vm9, %v4851_v48, 0.0  ;;  %v1798_v47 = vmul.f32 %v4857_v14, %v1471_v30  ;;  %v5495_v20 = vld [vmem:[#allocation49_spill] sm:$0xff]  ;;  %v5496_v48 = vld [vmem:[#allocation84_spill] sm:$0xff] }
 0x3a1   :  { %v899_v36 = vadd.f32 %v822_v43, %v5495_v20  ;;  %v824_v57 = vmul.f32 0.6931472, %v2342_v18  ;;  %v1473_v27 = vsub.f32 %v4935_v19, %v4823_v59  ;;  %v2044_v9 = vsel %vm1818_vm9, %v4857_v14, 0.0  ;;  %v5499_v43 = vld [vmem:[#allocation51_spill] sm:$0xff] }
 0x3a2   :  { %v2037_v25 = vadd.f32 %v2036_v51, %v2035_v0  ;;  %v1901_v33 = vadd.f32 %v1900_v54, %v1899_v24  ;;  %v1904_v51 = vsel %vm1818_vm9, %v1797_v10, 0.0  ;;  %v1799_v50 = vmul.f32 %v4862_v46, %v1472_v34 }
 0x3a3   :  { %v4945_v5 = vpop.xlane.xlu1 %1713  ;;  %v2344_v17 = vpop.eup %2343  ;;  %2357 = vlog2.f32 %v5496_v48  ;;  %v1474_v38 = vsub.f32 %v4955_v49, %v4827_v11  ;;  %v1906_v59 = vsel %vm1818_vm9, %v1798_v47, 0.0  ;;  %v2046_v19 = vsel %vm1818_vm9, %v4862_v46, 0.0 }
 0x3a4   :  { %v2346_v53 = vpop.eup %2345  ;;  %v2039_v13 = vadd.f32 %v2038_v4, %v2037_v25  ;;  %v4994_v45 = vpop.xlane.xlu0 %1410  ;;  %v1903_v7 = vadd.f32 %v1902_v16, %v1901_v33  ;;  %v826_v0 = vmul.f32 0.6931472, %v2344_v17  ;;  %v1800_v14 = vmul.f32 %v4868_v29, %v1473_v27  ;;  %v5498_v4 = vld [vmem:[#allocation50_spill] sm:$0xff]  ;;  %v5501_v33 = vld [vmem:[#allocation87_spill] sm:$0xff] }
 0x3a5   :  { %v2348_v39 = vpop.eup %2347  ;;  %2359 = vlog2.f32 %v5497_v44  ;;  %v900_v3 = vadd.f32 %v824_v57, %v5498_v4  ;;  %v1475_v40 = vsub.f32 %v4964_v35, %v4831_v23  ;;  %v1908_v25 = vsel %vm1818_vm9, %v1799_v50, 0.0 }
 0x3a6   :  { %v2041_v42 = vadd.f32 %v2040_v15, %v2039_v13  ;;  %v2350_v18 = vpop.eup %2349  ;;  %v1905_v58 = vadd.f32 %v1904_v51, %v1903_v7  ;;  %v2048_v11 = vsel %vm1818_vm9, %v4868_v29, 0.0  ;;  %v1801_v49 = vmul.f32 %v4880_v28, %v1474_v38  ;;  %v5500_v13 = vld [vmem:[#allocation86_spill] sm:$0xff] }
 0x3a7   :  { %v4968_v61 = vpop.xlane.xlu1 %1716  ;;  %v2352_v17 = vpop.eup %2351  ;;  %v901_v30 = vadd.f32 %v826_v0, %v5499_v43  ;;  %v828_v15 = vmul.f32 0.6931472, %v2346_v53  ;;  %v1476_v24 = vsub.f32 %v898_v22, %v4838_v60  ;;  %v1910_v23 = vsel %vm1818_vm9, %v1800_v14, 0.0  ;;  %v5504_v14 = vld [vmem:[#allocation88_spill] sm:$0xff] }
 0x3a8   :  { %v2043_v32 = vadd.f32 %v2042_v63, %v2041_v42  ;;  %v1907_v46 = vadd.f32 %v1906_v59, %v1905_v58  ;;  %v5020_v10 = vpop.xlane.xlu0 %1413  ;;  %v2050_v35 = vsel %vm1818_vm9, %v4880_v28, 0.0  ;;  %v1802_v29 = vmul.f32 %v4906_v6, %v1475_v40  ;;  %v5502_v28 = vld [vmem:[#allocation52_spill] sm:$0xff] }
 0x3a9   :  { %2361 = vlog2.f32 %v5500_v13  ;;  %v830_v16 = vmul.f32 0.6931472, %v2348_v39  ;;  %v1477_v53 = vsub.f32 %v899_v36, %v4846_v1  ;;  %v1912_v47 = vsel %vm1818_vm9, %v1801_v49, 0.0 }
 0x3aa   :  { %v2045_v52 = vadd.f32 %v2044_v9, %v2043_v32  ;;  %v1909_v12 = vadd.f32 %v1908_v25, %v1907_v46  ;;  %v2354_v63 = vpop.eup %2353  ;;  %v2052_v60 = vsel %vm1818_vm9, %v4906_v6, 0.0  ;;  %v1803_v22 = vmul.f32 %v4927_v37, %v1476_v24  ;;  %v5503_v6 = vld [vmem:[#allocation2_spill] sm:$0xff]  ;;  %v5505_v25 = vld [vmem:[#allocation3_spill] sm:$0xff]  ;;  %v5507_v24 = vld [vmem:[#allocation4_spill] sm:$0xff] }
 0x3ab   :  { %v4985_v2 = vpop.xlane.xlu1 %1719  ;;  %2363 = vlog2.f32 %v5501_v33  ;;  %v902_v42 = vadd.f32 %v828_v15, %v5502_v28  ;;  %v1478_v39 = vsub.f32 %v900_v3, %v4853_v62  ;;  %v1914_v9 = vsel %vm1818_vm9, %v1802_v29, 0.0 }
 0x3ac   :  { %v2047_v54 = vadd.f32 %v2046_v19, %v2045_v52  ;;  %v1911_v20 = vadd.f32 %v1910_v23, %v1909_v12  ;;  %v2356_v51 = vpop.eup %2355  ;;  %v2054_v1 = vsel %vm1818_vm9, %v4927_v37, 0.0  ;;  %v1804_v36 = vmul.f32 %v4945_v5, %v1477_v53  ;;  %v5043_v0 = vpop.xlane.xlu0 %1416 }
 0x3ad   :  { %v903_v50 = vadd.f32 %v830_v16, %v5503_v6  ;;  %v832_v7 = vmul.f32 0.6931472, %v2350_v18  ;;  %v1479_v38 = vsub.f32 %v901_v30, %v4859_v56  ;;  %v1916_v59 = vsel %vm1818_vm9, %v1803_v22, 0.0  ;;  %v5506_v30 = vld [vmem:[#allocation14_spill] sm:$0xff] }
 0x3ae   :  { %v2049_v34 = vadd.f32 %v2048_v11, %v2047_v54  ;;  %v1913_v48 = vadd.f32 %v1912_v47, %v1911_v20  ;;  %v2056_v62 = vsel %vm1818_vm9, %v4945_v5, 0.0  ;;  %v1805_v19 = vmul.f32 %v4968_v61, %v1478_v39 }
 0x3af   :  { %v5003_v8 = vpop.xlane.xlu1 %1722  ;;  %2365 = vlog2.f32 %v5504_v14  ;;  %v834_v44 = vmul.f32 0.6931472, %v2352_v17  ;;  %v1480_v18 = vsub.f32 %v902_v42, %v4864_v31  ;;  %v1918_v52 = vsel %vm1818_vm9, %v1804_v36, 0.0 }
 0x3b0   :  { %v2051_v57 = vadd.f32 %v2050_v35, %v2049_v34  ;;  %v1915_v37 = vadd.f32 %v1914_v9, %v1913_v48  ;;  %v2358_v3 = vpop.eup %2357  ;;  %v2058_v56 = vsel %vm1818_vm9, %v4968_v61, 0.0  ;;  %v1806_v40 = vmul.f32 %v4985_v2, %v1479_v38  ;;  %v5063_v13 = vpop.xlane.xlu0 %1419 }
 0x3b1   :  { %v904_v5 = vadd.f32 %v832_v7, %v5505_v25  ;;  %v836_v49 = vmul.f32 0.6931472, %v2354_v63  ;;  %v1481_v17 = vsub.f32 %v903_v50, %v5506_v30  ;;  %v1920_v54 = vsel %vm1818_vm9, %v1805_v19, 0.0 }
 0x3b2   :  { %v2053_v32 = vadd.f32 %v2052_v60, %v2051_v57  ;;  %v1917_v11 = vadd.f32 %v1916_v59, %v1915_v37  ;;  %v2360_v43 = vpop.eup %2359  ;;  %v2060_v31 = vsel %vm1818_vm9, %v4985_v2, 0.0  ;;  %v1807_v15 = vmul.f32 %v5003_v8, %v1480_v18  ;;  %v5508_v2 = vld [vmem:[#allocation5_spill] sm:$0xff] }
 0x3b3   :  { %v5022_v55 = vpop.xlane.xlu1 %1725  ;;  %v905_v23 = vadd.f32 %v834_v44, %v5507_v24  ;;  %v838_v35 = vmul.f32 0.6931472, %v2356_v51  ;;  %v1482_v34 = vsub.f32 %v904_v5, %v4904_v21  ;;  %v1922_v16 = vsel %vm1818_vm9, %v1806_v40, 0.0  ;;  %v5509_v51 = vld [vmem:[#allocation6_spill] sm:$0xff] }
 0x3b4   :  { %v2055_v58 = vadd.f32 %v2054_v1, %v2053_v32  ;;  %v1919_v61 = vadd.f32 %v1918_v52, %v1917_v11  ;;  %v2062_v63 = vsel %vm1818_vm9, %v5003_v8, 0.0  ;;  %v1808_v53 = vmul.f32 %v5022_v55, %v1481_v17  ;;  %v5510_v32 = vld [vmem:[#allocation7_spill] sm:$0xff]  ;;  %v5512_v17 = vld [vmem:[#allocation9_spill] sm:$0xff] }
 0x3b5   :  { %v906_v47 = vadd.f32 %v836_v49, %v5508_v2  ;;  %v840_v22 = vmul.f32 0.6931472, %v2358_v3  ;;  %v1483_v42 = vsub.f32 %v905_v23, %v4937_v26  ;;  %v1924_v20 = vsel %vm1818_vm9, %v1807_v15, 0.0  ;;  %v5513_v2 = vld [vmem:[#allocation10_spill] sm:$0xff] }
 0x3b6   :  { %v2057_v46 = vadd.f32 %v2056_v62, %v2055_v58  ;;  %v1921_v60 = vadd.f32 %v1920_v54, %v1919_v61  ;;  %v2362_v28 = vpop.eup %2361  ;;  %v2064_v21 = vsel %vm1818_vm9, %v5022_v55, 0.0  ;;  %v907_v39 = vadd.f32 %v838_v35, %v5509_v51  ;;  %v1423_v55 = vpop.xlane.xlu0 %1422  ;;  %v5511_v58 = vld [vmem:[#allocation8_spill] sm:$0xff] }
 0x3b7   :  { %v1729_v27 = vpop.xlane.xlu1 %1728  ;;  %v842_v8 = vmul.f32 0.6931472, %v2360_v43  ;;  %v1484_v50 = vsub.f32 %v906_v47, %v4966_v41  ;;  %v1926_v48 = vsel %vm1818_vm9, %v1808_v53, 0.0  ;;  %v908_v38 = vadd.f32 %v840_v22, %v5510_v32 }
 0x3b8   :  { %v2059_v29 = vadd.f32 %v2058_v56, %v2057_v46  ;;  %v1809_v57 = vmul.f32 %v1729_v27, %v1482_v34  ;;  %v1923_v9 = vadd.f32 %v1922_v16, %v1921_v60  ;;  %v2364_v6 = vpop.eup %2363  ;;  %v2066_v7 = vsel %vm1818_vm9, %v1729_v27, 0.0 }
 0x3b9   :  { %v1485_v19 = vsub.f32 %v907_v39, %v4994_v45  ;;  %v909_v3 = vadd.f32 %v842_v8, %v5511_v58  ;;  %v844_v41 = vmul.f32 0.6931472, %v2362_v28  ;;  %v1486_v40 = vsub.f32 %v908_v38, %v5020_v10  ;;  %v5514_v28 = vld [vmem:[#allocation11_spill] sm:$0xff] }
 0x3ba   :  { %v2061_v33 = vadd.f32 %v2060_v31, %v2059_v29  ;;  %v1925_v59 = vadd.f32 %v1924_v20, %v1923_v9  ;;  %v1928_v14 = vsel %vm1818_vm9, %v1809_v57, 0.0  ;;  %v846_v31 = vmul.f32 0.6931472, %v2364_v6  ;;  %v1426_v15 = vpop.xlane.xlu0 %1425 }
 0x3bb   :  { %v1732_v4 = vpop.xlane.xlu1 %1731  ;;  %v1487_v46 = vsub.f32 %v909_v3, %v5043_v0  ;;  %v910_v54 = vadd.f32 %v844_v41, %v5512_v17 }
 0x3bc   :  { %v2063_v1 = vadd.f32 %v2062_v63, %v2061_v33  ;;  %v1810_v26 = vmul.f32 %v1732_v4, %v1483_v42  ;;  %v2068_v37 = vsel %vm1818_vm9, %v1732_v4, 0.0  ;;  %v1927_v18 = vadd.f32 %v1926_v48, %v1925_v59  ;;  %v2366_v27 = vpop.eup %2365 }
 0x3bd   :  { %v848_v61 = vmul.f32 0.6931472, %v2366_v27  ;;  %v1488_v16 = vsub.f32 %v910_v54, %v5063_v13  ;;  %v911_v47 = vadd.f32 %v846_v31, %v5513_v2 }
 0x3be   :  { %v2065_v62 = vadd.f32 %v2064_v21, %v2063_v1  ;;  %v1930_v25 = vsel %vm1818_vm9, %v1810_v26, 0.0  ;;  %v1929_v45 = vadd.f32 %v1928_v14, %v1927_v18  ;;  %v1753_v51 = vpop.xlane.xlu0 %1752 }
 0x3bf   :  { %v1735_v12 = vpop.xlane.xlu1 %1734  ;;  %v912_v42 = vadd.f32 %v848_v61, %v5514_v28  ;;  %v1489_v13 = vsub.f32 %v911_v47, %v1423_v55  ;;  %v2082_v59 = vsel %vm1818_vm9, %v1753_v51, 0.0 }
 0x3c0   :  { %v1811_v44 = vmul.f32 %v1735_v12, %v1484_v50  ;;  %v2067_v52 = vadd.f32 %v2066_v7, %v2065_v62  ;;  %v2070_v5 = vsel %vm1818_vm9, %v1735_v12, 0.0  ;;  %v1931_v24 = vadd.f32 %v1930_v25, %v1929_v45 }
 0x3c1   :  { %v1490_v8 = vsub.f32 %v912_v42, %v1426_v15 }
 0x3c2   :  { %v2069_v49 = vadd.f32 %v2068_v37, %v2067_v52  ;;  %v1932_v4 = vsel %vm1818_vm9, %v1811_v44, 0.0 }
 0x3c3   :  { %v1738_v36 = vpop.xlane.xlu1 %1737  ;;  %v1933_v34 = vadd.f32 %v1932_v4, %v1931_v24  ;;  %v1817_v48 = vmul.f32 %v1753_v51, %v1490_v8 }
 0x3c4   :  { %v1812_v11 = vmul.f32 %v1738_v36, %v1485_v19  ;;  %v2072_v43 = vsel %vm1818_vm9, %v1738_v36, 0.0  ;;  %v2071_v10 = vadd.f32 %v2070_v5, %v2069_v49 }
 0x3c5   :  { %v1944_v55 = vsel %vm1818_vm9, %v1817_v48, 0.0 }
 0x3c6   :  { %v1934_v35 = vsel %vm1818_vm9, %v1812_v11, 0.0  ;;  %v2073_v0 = vadd.f32 %v2072_v43, %v2071_v10 }
 0x3c7   :  { %v1741_v56 = vpop.xlane.xlu1 %1740  ;;  %v1935_v60 = vadd.f32 %v1934_v35, %v1933_v34 }
 0x3c8   :  { %v1813_v30 = vmul.f32 %v1741_v56, %v1486_v40  ;;  %v2074_v29 = vsel %vm1818_vm9, %v1741_v56, 0.0 }
 0x3c9   :  { %v2075_v22 = vadd.f32 %v2074_v29, %v2073_v0 }
 0x3ca   :  { %v1936_v63 = vsel %vm1818_vm9, %v1813_v30, 0.0 }
 0x3cb   :  { %v1744_v23 = vpop.xlane.xlu1 %1743  ;;  %v1937_v39 = vadd.f32 %v1936_v63, %v1935_v60 }
 0x3cc   :  { %v1814_v12 = vmul.f32 %v1744_v23, %v1487_v46  ;;  %v2076_v53 = vsel %vm1818_vm9, %v1744_v23, 0.0 }
 0x3cd   :  { %v2077_v9 = vadd.f32 %v2076_v53, %v2075_v22 }
 0x3ce   :  { %v1938_v20 = vsel %vm1818_vm9, %v1814_v12, 0.0 }
 0x3cf   :  { %v1747_v33 = vpop.xlane.xlu1 %1746  ;;  %v1939_v36 = vadd.f32 %v1938_v20, %v1937_v39 }
 0x3d0   :  { %v1815_v21 = vmul.f32 %v1747_v33, %v1488_v16  ;;  %v2078_v57 = vsel %vm1818_vm9, %v1747_v33, 0.0 }
 0x3d1   :  { %v2079_v6 = vadd.f32 %v2078_v57, %v2077_v9 }
 0x3d2   :  { %v1940_v1 = vsel %vm1818_vm9, %v1815_v21, 0.0 }
 0x3d3   :  { %v1750_v50 = vpop.xlane.xlu1 %1749  ;;  %v1941_v32 = vadd.f32 %v1940_v1, %v1939_v36 }
 0x3d4   :  { %v1816_v7 = vmul.f32 %v1750_v50, %v1489_v13  ;;  %v2080_v26 = vsel %vm1818_vm9, %v1750_v50, 0.0 }
 0x3d5   :  { %v2081_v38 = vadd.f32 %v2080_v26, %v2079_v6 }
 0x3d6   :  { %v1942_v62 = vsel %vm1818_vm9, %v1816_v7, 0.0 }
 0x3d7   :  { %v1943_v19 = vadd.f32 %v1942_v62, %v1941_v32  ;;  %v2083_v14 = vadd.f32 %v2082_v59, %v2081_v38 }
 0x3d9   :  { %2084 = vadd.xlane.f32.xlu0 %v2083_v14  ;;  %v1945_v37 = vadd.f32 %v1944_v55, %v1943_v19 }
 0x3db   :  { %1946 = vadd.xlane.f32.xlu1 %v1945_v37 }
 0x462   :  { %v2085_v44 = vpop.xlane.xlu0 %2084 }
 0x463   :  { %v2086_v58 = vrot.slane %v2085_v44, 4 }
 0x464   :  { %v1947_v3 = vpop.xlane.xlu1 %1946 }
 0x465   :  { %v2087_v41 = vadd.f32 %v2086_v58, %v2085_v44  ;;  %v1948_v18 = vrot.slane %v1947_v3, 4 }
 0x467   :  { %v2088_v52 = vrot.slane %v2087_v41, 2  ;;  %v1949_v56 = vadd.f32 %v1948_v18, %v1947_v3 }
 0x469   :  { %v2089_v27 = vadd.f32 %v2088_v52, %v2087_v41  ;;  %v1950_v40 = vrot.slane %v1949_v56, 2 }
 0x46b   :  { %v1951_v25 = vadd.f32 %v1950_v40, %v1949_v56  ;;  %v2090_v5 = vrot.slane %v2089_v27, 1 }
 0x46d   :  { %v1952_v11 = vrot.slane %v1951_v25, 1  ;;  %v2091_v49 = vadd.f32 %v2090_v5, %v2089_v27 }
 0x46f   :  { %v1953_v45 = vadd.f32 %v1952_v11, %v1951_v25 }
 0x471   :  { %2104 = vpush %v1953_v45 }
 0x472   :  { %2106 = vpush %v2091_v49 }
 0x4a2   :  { %s2105_s0 = spop %2104 }
 0x4a3   :  { %v1955_v46 = vstv %s2105_s0  ;;  %s2107_s8 = spop %2106 }
 0x4a4   :  { %1956 = vst [vmem:[%s5114_s3] sm:$0xff] %v1955_v46  ;;  %v2093_v4 = vstv %s2107_s8 }
 0x4a5   :  { %2094 = vst [vmem:[%s5115_s4] sm:$0xff] %v2093_v4 }

</bundles_post_ra>
